<compile_context>
chip_gen: v5e
topology: v5e:2x2
jax: 0.10.0
libtpu: 0.0.40
codegen_flags: <defaults>
</compile_context>

<pallas_src>
import functools

import jax
import jax.numpy as jnp
from jax import lax
from jax.experimental import pallas as pl
from jax.experimental.pallas import tpu as pltpu


def _round_up(x, m):
    return (x + m - 1) // m * m


# ----------------------------------------------------------------------------
# Fused kernel builder (num_layer / shapes / unroll are static Python values)
# ----------------------------------------------------------------------------
def _make_fused_kernel(num_layer, T, B, E, H, num_class, Cp, unroll):
    """All dims here are the padded kernel-side dims (B=B_pad, E=E_pad, ...)."""

    def kernel(*refs):
        embed_ref = refs[0]                                       # (T, B, E)  bf16
        logits0_ref = refs[1]                                     # (B, Cp)    f32
        idx = 2
        wih_refs = refs[idx:idx + num_layer]; idx += num_layer    # (Din, 4H)  bf16
        whh_refs = refs[idx:idx + num_layer]; idx += num_layer    # (H, 4H)    bf16
        b_refs = refs[idx:idx + num_layer]; idx += num_layer      # (1, 4H)    f32
        fch_ref = refs[idx]; idx += 1                             # (T*H, Cp)  bf16
        fcb_ref = refs[idx]; idx += 1                             # (1, Cp)    f32
        out_ref = refs[idx]; idx += 1                             # (B, Cp)    f32
        gproj_sc = refs[idx]; idx += 1                            # VMEM (T, B, 4H) bf16
        seq_sc = refs[idx]; idx += 1                              # VMEM (T, B, H)  bf16

        for l in range(num_layer):                     # layers unrolled (static)
            # ---- hoisted input projection: one (T*B, Din)@(Din, 4H) MXU matmul
            if l == 0:
                x_flat = embed_ref[...].reshape(T * B, E)
            else:
                x_flat = seq_sc[...].reshape(T * B, H)
            xproj = jnp.dot(x_flat, wih_refs[l][...],
                            preferred_element_type=jnp.float32)
            # stored bf16; f32 bias re-added inside the step for accuracy
            gproj_sc[...] = xproj.astype(jnp.bfloat16).reshape(T, B, 4 * H)

            whh = whh_refs[l][...]                      # (H, 4H) bf16
            bias = b_refs[l][...]                       # (1, 4H) f32
            is_last = (l == num_layer - 1)

            def body(t, carry, whh=whh, bias=bias, is_last=is_last):
                h, c = carry
                # exactly ONE matmul on the serial critical path
                gates = (jnp.dot(h.astype(jnp.bfloat16), whh,
                                 preferred_element_type=jnp.float32)
                         + gproj_sc[t] + bias)
                # 128-lane-aligned gate slices (H is a multiple of 128).
                # TODO(synk): on v6e/v7x these could run in bf16 on the EUP
                # (~2x throughput); kept f32 for v5e + gate-precision parity.
                i_g = jax.nn.sigmoid(gates[:, 0 * H:1 * H])
                f_g = jax.nn.sigmoid(gates[:, 1 * H:2 * H])
                g_g = jnp.tanh(gates[:, 2 * H:3 * H])
                o_g = jax.nn.sigmoid(gates[:, 3 * H:4 * H])
                c_new = f_g * c + i_g * g_g
                h_new = o_g * jnp.tanh(c_new)
                if is_last:
                    # only the classifier head consumes the last layer's output
                    seq_sc[t] = jnp.maximum(h_new, 0.0).astype(jnp.bfloat16)
                else:
                    seq_sc[t] = h_new.astype(jnp.bfloat16)   # feeds next layer
                return h_new, c_new

            init = (jnp.zeros((B, H), jnp.float32),
                    jnp.zeros((B, H), jnp.float32))
            lax.fori_loop(0, T, body, init, unroll=unroll)

        # ---- hidden-side head: ONE (B, T*H)@(T*H, Cp) matmul, out of the loop.
        # TODO(synk): for long production T replace the static lane-concat with a
        # chunked accumulation (or transpose+reshape) to bound vreg pressure.
        h_cat = jnp.concatenate([seq_sc[t] for t in range(T)], axis=1)
        logits = logits0_ref[...] + jnp.dot(h_cat, fch_ref[...],
                                            preferred_element_type=jnp.float32)
        logits = logits + fcb_ref[...]

        # ---- softmax over the real classes (padded lanes masked), exact divide
        col = lax.broadcasted_iota(jnp.int32, (B, Cp), 1)
        logits = jnp.where(col < num_class, logits, -1e30)
        m = jnp.max(logits, axis=1, keepdims=True)
        e = jnp.exp(logits - m)
        out_ref[...] = e / jnp.sum(e, axis=1, keepdims=True)

    return kernel


# ----------------------------------------------------------------------------
# Param preparation: pad / transpose / pre-sum ONCE into kernel-ready layout
# ----------------------------------------------------------------------------
def prepare_params(params, embed_size, hidden_size, num_class, word_length):
    E, H, C, T = embed_size, hidden_size, num_class, word_length
    Ep, Hp, Cp = _round_up(E, 128), _round_up(H, 128), _round_up(C, 128)

    emb = params["embedding"]
    emb = emb.at[emb.shape[0] - 1].set(0.0)      # re-assert padding_idx row == 0
    emb_p = jnp.pad(emb, ((0, 0), (0, Ep - E)))  # (V, Ep) f32

    wih_list, whh_list, b_list = [], [], []
    for l, layer in enumerate(params["lstm"]):
        Din = E if l == 0 else H
        Dp = Ep if l == 0 else Hp
        # gate-blocked padding so i/f/g/o slices stay at k*Hp lane offsets
        w_ih = layer["w_ih"].reshape(4, H, Din)
        w_ih = jnp.pad(w_ih, ((0, 0), (0, Hp - H), (0, Dp - Din)))
        wih_t = jnp.transpose(w_ih.reshape(4 * Hp, Dp))            # (Dp, 4Hp)
        w_hh = layer["w_hh"].reshape(4, H, H)
        w_hh = jnp.pad(w_hh, ((0, 0), (0, Hp - H), (0, Hp - H)))
        whh_t = jnp.transpose(w_hh.reshape(4 * Hp, Hp))            # (Hp, 4Hp)
        b = (layer["b_ih"] + layer["b_hh"]).reshape(4, H)
        b = jnp.pad(b, ((0, 0), (0, Hp - H))).reshape(1, 4 * Hp)
        wih_list.append(wih_t.astype(jnp.bfloat16))
        whh_list.append(whh_t.astype(jnp.bfloat16))
        b_list.append(b.astype(jnp.float32))

    # fc weight split per-timestep into embed / hidden chunks (matches the
    # PyTorch (B, T, E+H).reshape(B, -1) flatten order).
    fc_w = params["fc_w"].reshape(C, T, E + H)
    fce = jnp.transpose(fc_w[:, :, :E], (1, 2, 0))                 # (T, E, C)
    fch = jnp.transpose(fc_w[:, :, E:], (1, 2, 0))                 # (T, H, C)
    # fce stays f32: the embed-side head is computed in the JAX wrapper.
    fce = jnp.pad(fce, ((0, 0), (0, Ep - E), (0, Cp - C))).astype(jnp.float32)
    # fch flattened to (T*Hp, Cp) for the single in-kernel hidden-head matmul.
    fch = jnp.pad(fch, ((0, 0), (0, Hp - H), (0, Cp - C)))
    fch = fch.reshape(T * Hp, Cp).astype(jnp.bfloat16)
    fcb = jnp.pad(params["fc_b"], (0, Cp - C)).reshape(1, Cp).astype(jnp.float32)

    return {"embedding": emb_p, "wih": tuple(wih_list), "whh": tuple(whh_list),
            "b": tuple(b_list), "fce": fce, "fch": fch, "fcb": fcb}


# ----------------------------------------------------------------------------
# Full forward (mirrors Model.forward)
# ----------------------------------------------------------------------------
@functools.partial(jax.jit, static_argnames=("num_class",))
def model_forward(x_ids, kparams, *, num_class):
    B, T = x_ids.shape
    num_layer = len(kparams["wih"])
    Ep = kparams["embedding"].shape[1]
    Hp = kparams["whh"][0].shape[0]
    Cp = kparams["fcb"].shape[1]
    Bp = max(_round_up(B, 8), 8)                       # f32 sublane alignment
    # TODO(synk): for batched serving pack independent sequences so Bp reaches
    # the MXU M dimension (128 v5e / 256 v6e+v7x) and, on v7x, add a batch-tile
    # grid axis with dimension_semantics=("parallel",) to use both TensorCores.

    # pad batch with padding_idx rows (their embedding row is all-zero)
    pad_id = kparams["embedding"].shape[0] - 1
    ids = jnp.pad(x_ids, ((0, Bp - B), (0, 0)), constant_values=pad_id)

    # gather directly in time-major (no (B,T,E)->(T,B,E) relayout copy)
    embed_tm = jnp.take(kparams["embedding"], ids.T, axis=0)      # (T, Bp, Ep) f32

    # embed-side classifier head hoisted out of the kernel: depends only on the
    # embedding, so it is one large f32 contraction here instead of T tiny MXU
    # ops inside the serial recurrence.
    logits0 = jnp.einsum("tbe,tec->bc", jnp.maximum(embed_tm, 0.0),
                         kparams["fce"])                          # (Bp, Cp) f32

    embed_bf = embed_tm.astype(jnp.bfloat16)           # halves HBM->VMEM DMA

    unroll = True if T <= 32 else 8
    kernel = _make_fused_kernel(num_layer, T, Bp, Ep, Hp, num_class, Cp, unroll)

    kernel_inputs = (embed_bf, logits0, *kparams["wih"], *kparams["whh"],
                     *kparams["b"], kparams["fch"], kparams["fcb"])
    in_bytes = sum(a.size * a.dtype.itemsize for a in kernel_inputs)
    scratch_bytes = (T * Bp * 4 * Hp + T * Bp * Hp) * 2           # bf16 scratch
    out_bytes = Bp * Cp * 4
    vmem_limit = int(min(max(2 * (in_bytes + scratch_bytes + out_bytes)
                             + (2 << 20), 32 << 20), 112 << 20))

    out = pl.pallas_call(
        kernel,
        out_shape=jax.ShapeDtypeStruct((Bp, Cp), jnp.float32),
        scratch_shapes=[
            pltpu.VMEM((T, Bp, 4 * Hp), jnp.bfloat16),   # hoisted gate pre-acts
            pltpu.VMEM((T, Bp, Hp), jnp.bfloat16),       # inter-layer / relu(h)
        ],
        compiler_params=pltpu.CompilerParams(vmem_limit_bytes=vmem_limit),
        # TODO(synk): at production T/H, chunk gproj over T (emit_pipeline or a
        # T-chunk grid) and prefetch layer l+1's weights (pl.ANY +
        # make_async_copy) while layer l's recurrence runs.
    )(*kernel_inputs)

    return out[:B, :num_class]


# ----------------------------------------------------------------------------
# Pure-JAX reference (PyTorch semantics) and init
# ----------------------------------------------------------------------------
def reference_forward(x_ids, params, hidden_size):
    embed = params["embedding"][x_ids]                      # (B, T, E)
    out = embed
    H = hidden_size
    for layer in params["lstm"]:
        b = layer["b_ih"] + layer["b_hh"]
        Bsz, T, _ = out.shape
        h = jnp.zeros((Bsz, H)); c = jnp.zeros((Bsz, H))
        hs = []
        for t in range(T):
            g = out[:, t, :] @ layer["w_ih"].T + h @ layer["w_hh"].T + b
            i = jax.nn.sigmoid(g[:, :H]); f = jax.nn.sigmoid(g[:, H:2 * H])
            gg = jnp.tanh(g[:, 2 * H:3 * H]); o = jax.nn.sigmoid(g[:, 3 * H:])
            c = f * c + i * gg
            h = o * jnp.tanh(c)
            hs.append(h)
        out = jnp.stack(hs, axis=1)
    cat = jnp.concatenate([embed, out], axis=2)
    feat = jnp.maximum(cat, 0.0).reshape(cat.shape[0], -1)
    logits = feat @ params["fc_w"].T + params["fc_b"]
    return jax.nn.softmax(logits, axis=1)


def init_params(key, dict_size, embed_size, num_class, hidden_size, num_layer,
                word_length):
    keys = jax.random.split(key, 3 + 4 * num_layer)
    k_emb, k_fcw, k_fcb = keys[0], keys[1], keys[2]
    lstm_keys = keys[3:]

    emb = jax.random.normal(k_emb, (dict_size, embed_size), jnp.float32)
    emb = emb.at[dict_size - 1].set(0.0)                    # padding_idx row

    lstm_params = []
    stdv = 1.0 / jnp.sqrt(hidden_size)
    for l in range(num_layer):
        in_dim = embed_size if l == 0 else hidden_size
        kw_ih, kw_hh, kb_ih, kb_hh = lstm_keys[4 * l:4 * l + 4]
        lstm_params.append({
            "w_ih": jax.random.uniform(kw_ih, (4 * hidden_size, in_dim),
                                       jnp.float32, -stdv, stdv),
            "w_hh": jax.random.uniform(kw_hh, (4 * hidden_size, hidden_size),
                                       jnp.float32, -stdv, stdv),
            "b_ih": jax.random.uniform(kb_ih, (4 * hidden_size,),
                                       jnp.float32, -stdv, stdv),
            "b_hh": jax.random.uniform(kb_hh, (4 * hidden_size,),
                                       jnp.float32, -stdv, stdv),
        })

    fc_in = (embed_size + hidden_size) * word_length
    bound = 1.0 / jnp.sqrt(fc_in)
    fc_w = jax.random.uniform(k_fcw, (num_class, fc_in), jnp.float32, -bound, bound)
    fc_b = jax.random.uniform(k_fcb, (num_class,), jnp.float32, -bound, bound)

    return {"embedding": emb, "lstm": tuple(lstm_params), "fc_w": fc_w, "fc_b": fc_b}


if __name__ == "__main__":
    DICT_SIZE = 20
    EMBED_SIZE = 16
    NUM_CLASS = 5
    HIDDEN_SIZE = 32
    NUM_LAYER = 2
    WORD_LENGTH = 8     # sequence length T
    BATCH = 2

    key = jax.random.PRNGKey(0)
    k_params, k_ids = jax.random.split(key)

    params = init_params(k_params, DICT_SIZE, EMBED_SIZE, NUM_CLASS,
                         HIDDEN_SIZE, NUM_LAYER, WORD_LENGTH)
    kparams = prepare_params(params, EMBED_SIZE, HIDDEN_SIZE, NUM_CLASS,
                             WORD_LENGTH)
    x_ids = jax.random.randint(k_ids, (BATCH, WORD_LENGTH), 0, DICT_SIZE,
                               dtype=jnp.int32)

    probs = model_forward(x_ids, kparams, num_class=NUM_CLASS)
    probs = jax.block_until_ready(probs)

    assert probs.shape == (BATCH, NUM_CLASS)
    assert bool(jnp.all(jnp.isfinite(probs)))
    # rows sum to 1 (exact divide in the softmax)
    assert bool(jnp.allclose(jnp.sum(probs, axis=1), 1.0, atol=1e-5))
    # match the f32 pure-JAX reference (bf16 matmuls / storage => loose tolerance)
    ref = reference_forward(x_ids, params, HIDDEN_SIZE)
    assert bool(jnp.allclose(probs, ref, atol=2e-2))

    print("KERNEL_OK")
</pallas_src>

<mosaic_0001>
module attributes {stable_mosaic.version = 11 : i64} {
  func.func @kernel(%arg0: memref<8x8x128xbf16, #tpu.memory_space<vmem>>, %arg1: memref<8x128xf32, #tpu.memory_space<vmem>>, %arg2: memref<128x512xbf16, #tpu.memory_space<vmem>>, %arg3: memref<128x512xbf16, #tpu.memory_space<vmem>>, %arg4: memref<128x512xbf16, #tpu.memory_space<vmem>>, %arg5: memref<128x512xbf16, #tpu.memory_space<vmem>>, %arg6: memref<1x512xf32, #tpu.memory_space<vmem>>, %arg7: memref<1x512xf32, #tpu.memory_space<vmem>>, %arg8: memref<1024x128xbf16, #tpu.memory_space<vmem>>, %arg9: memref<1x128xf32, #tpu.memory_space<vmem>>, %arg10: memref<8x128xf32, #tpu.memory_space<vmem>>, %arg11: memref<8x8x512xbf16, #tpu.memory_space<vmem>>, %arg12: memref<8x8x128xbf16, #tpu.memory_space<vmem>>) attributes {dimension_semantics = [], scalar_prefetch = 0 : i64, scratch_operands = 2 : i64, tpu.core_type = #tpu.core_type<tc>} {
    %c0 = arith.constant 0 : index
    %c0_0 = arith.constant 0 : index
    %c0_1 = arith.constant 0 : index
    %0 = vector.load %arg0[%c0, %c0_0, %c0_1] : memref<8x8x128xbf16, #tpu.memory_space<vmem>>, vector<8x8x128xbf16>
    %1 = vector.shape_cast %0 : vector<8x8x128xbf16> to vector<64x128xbf16>
    %c0_2 = arith.constant 0 : index
    %c0_3 = arith.constant 0 : index
    %2 = vector.load %arg2[%c0_2, %c0_3] : memref<128x512xbf16, #tpu.memory_space<vmem>>, vector<128x512xbf16>
    %cst = arith.constant dense<0.000000e+00> : vector<64x512xf32>
    %3 = tpu.matmul %1, %2, %cst {dimension_numbers = #tpu.dot_dimension_numbers<[1], [0], [0], [1], [0, 0, 1, 1], [], []>} : vector<64x128xbf16>, vector<128x512xbf16>, vector<64x512xf32> -> vector<64x512xf32>
    %4 = arith.truncf %3 : vector<64x512xf32> to vector<64x512xbf16>
    %5 = vector.shape_cast %4 : vector<64x512xbf16> to vector<8x8x512xbf16>
    %c0_4 = arith.constant 0 : index
    %c0_5 = arith.constant 0 : index
    %c0_6 = arith.constant 0 : index
    %6 = vector.load %arg11[%c0_4, %c0_5, %c0_6] : memref<8x8x512xbf16, #tpu.memory_space<vmem>>, vector<8x8x512xbf16>
    tpu.vector_store %arg11[%c0_4, %c0_5, %c0_6], %5 {strides = array<i32>} : memref<8x8x512xbf16, #tpu.memory_space<vmem>>, vector<8x8x512xbf16>,
    %c0_7 = arith.constant 0 : index
    %c0_8 = arith.constant 0 : index
    %7 = vector.load %arg4[%c0_7, %c0_8] : memref<128x512xbf16, #tpu.memory_space<vmem>>, vector<128x512xbf16>
    %c0_9 = arith.constant 0 : index
    %c0_10 = arith.constant 0 : index
    %8 = vector.load %arg6[%c0_9, %c0_10] : memref<1x512xf32, #tpu.memory_space<vmem>>, vector<1x512xf32>
    %cst_11 = arith.constant 0.000000e+00 : f32
    %9 = vector.broadcast %cst_11 : f32 to vector<8x128xf32>
    %cst_12 = arith.constant 0.000000e+00 : f32
    %10 = vector.broadcast %cst_12 : f32 to vector<8x128xf32>
    %c0_i32 = arith.constant 0 : i32
    %11 = arith.truncf %9 : vector<8x128xf32> to vector<8x128xbf16>
    %cst_13 = arith.constant dense<0.000000e+00> : vector<8x512xf32>
    %12 = tpu.matmul %11, %7, %cst_13 {dimension_numbers = #tpu.dot_dimension_numbers<[1], [0], [0], [1], [0, 0, 1, 1], [], []>} : vector<8x128xbf16>, vector<128x512xbf16>, vector<8x512xf32> -> vector<8x512xf32>
    %13 = arith.index_cast %c0_i32 : i32 to index
    %c0_14 = arith.constant 0 : index
    %c0_15 = arith.constant 0 : index
    %14 = vector.load %arg11[%13, %c0_14, %c0_15] : memref<8x8x512xbf16, #tpu.memory_space<vmem>>, vector<1x8x512xbf16>
    %15 = vector.shape_cast %14 : vector<1x8x512xbf16> to vector<8x512xbf16>
    %16 = arith.extf %15 : vector<8x512xbf16> to vector<8x512xf32>
    %17 = arith.addf %12, %16 : vector<8x512xf32>
    %18 = vector.broadcast %8 : vector<1x512xf32> to vector<8x512xf32>
    %19 = arith.addf %17, %18 : vector<8x512xf32>
    %20 = vector.extract_strided_slice %19 {offsets = [0, 0], sizes = [8, 128], strides = [1, 1]} : vector<8x512xf32> to vector<8x128xf32>
    %21 = arith.negf %20 : vector<8x128xf32>
    %22 = math.exp %21 : vector<8x128xf32>
    %cst_16 = arith.constant 1.000000e+00 : f32
    %23 = vector.broadcast %cst_16 : f32 to vector<8x128xf32>
    %24 = arith.addf %23, %22 : vector<8x128xf32>
    %25 = arith.divf %23, %24 : vector<8x128xf32>
    %26 = vector.extract_strided_slice %19 {offsets = [0, 128], sizes = [8, 128], strides = [1, 1]} : vector<8x512xf32> to vector<8x128xf32>
    %27 = arith.negf %26 : vector<8x128xf32>
    %28 = math.exp %27 : vector<8x128xf32>
    %cst_17 = arith.constant 1.000000e+00 : f32
    %29 = vector.broadcast %cst_17 : f32 to vector<8x128xf32>
    %30 = arith.addf %29, %28 : vector<8x128xf32>
    %31 = arith.divf %29, %30 : vector<8x128xf32>
    %32 = vector.extract_strided_slice %19 {offsets = [0, 256], sizes = [8, 128], strides = [1, 1]} : vector<8x512xf32> to vector<8x128xf32>
    %33 = math.tanh %32 : vector<8x128xf32>
    %34 = vector.extract_strided_slice %19 {offsets = [0, 384], sizes = [8, 128], strides = [1, 1]} : vector<8x512xf32> to vector<8x128xf32>
    %35 = arith.negf %34 : vector<8x128xf32>
    %36 = math.exp %35 : vector<8x128xf32>
    %cst_18 = arith.constant 1.000000e+00 : f32
    %37 = vector.broadcast %cst_18 : f32 to vector<8x128xf32>
    %38 = arith.addf %37, %36 : vector<8x128xf32>
    %39 = arith.divf %37, %38 : vector<8x128xf32>
    %40 = arith.mulf %31, %10 : vector<8x128xf32>
    %41 = arith.mulf %25, %33 : vector<8x128xf32>
    %42 = arith.addf %40, %41 : vector<8x128xf32>
    %43 = math.tanh %42 : vector<8x128xf32>
    %44 = arith.mulf %39, %43 : vector<8x128xf32>
    %45 = arith.truncf %44 : vector<8x128xf32> to vector<8x128xbf16>
    %46 = arith.index_cast %c0_i32 : i32 to index
    %c0_19 = arith.constant 0 : index
    %c0_20 = arith.constant 0 : index
    %47 = vector.load %arg12[%46, %c0_19, %c0_20] : memref<8x8x128xbf16, #tpu.memory_space<vmem>>, vector<1x8x128xbf16>
    %48 = vector.shape_cast %47 : vector<1x8x128xbf16> to vector<8x128xbf16>
    %49 = vector.shape_cast %45 : vector<8x128xbf16> to vector<1x8x128xbf16>
    tpu.vector_store %arg12[%46, %c0_19, %c0_20], %49 {strides = array<i32>} : memref<8x8x128xbf16, #tpu.memory_space<vmem>>, vector<1x8x128xbf16>,
    %c1_i32 = arith.constant 1 : i32
    %50 = arith.truncf %44 : vector<8x128xf32> to vector<8x128xbf16>
    %cst_21 = arith.constant dense<0.000000e+00> : vector<8x512xf32>
    %51 = tpu.matmul %50, %7, %cst_21 {dimension_numbers = #tpu.dot_dimension_numbers<[1], [0], [0], [1], [0, 0, 1, 1], [], []>} : vector<8x128xbf16>, vector<128x512xbf16>, vector<8x512xf32> -> vector<8x512xf32>
    %52 = arith.index_cast %c1_i32 : i32 to index
    %c0_22 = arith.constant 0 : index
    %c0_23 = arith.constant 0 : index
    %53 = vector.load %arg11[%52, %c0_22, %c0_23] : memref<8x8x512xbf16, #tpu.memory_space<vmem>>, vector<1x8x512xbf16>
    %54 = vector.shape_cast %53 : vector<1x8x512xbf16> to vector<8x512xbf16>
    %55 = arith.extf %54 : vector<8x512xbf16> to vector<8x512xf32>
    %56 = arith.addf %51, %55 : vector<8x512xf32>
    %57 = vector.broadcast %8 : vector<1x512xf32> to vector<8x512xf32>
    %58 = arith.addf %56, %57 : vector<8x512xf32>
    %59 = vector.extract_strided_slice %58 {offsets = [0, 0], sizes = [8, 128], strides = [1, 1]} : vector<8x512xf32> to vector<8x128xf32>
    %60 = arith.negf %59 : vector<8x128xf32>
    %61 = math.exp %60 : vector<8x128xf32>
    %cst_24 = arith.constant 1.000000e+00 : f32
    %62 = vector.broadcast %cst_24 : f32 to vector<8x128xf32>
    %63 = arith.addf %62, %61 : vector<8x128xf32>
    %64 = arith.divf %62, %63 : vector<8x128xf32>
    %65 = vector.extract_strided_slice %58 {offsets = [0, 128], sizes = [8, 128], strides = [1, 1]} : vector<8x512xf32> to vector<8x128xf32>
    %66 = arith.negf %65 : vector<8x128xf32>
    %67 = math.exp %66 : vector<8x128xf32>
    %cst_25 = arith.constant 1.000000e+00 : f32
    %68 = vector.broadcast %cst_25 : f32 to vector<8x128xf32>
    %69 = arith.addf %68, %67 : vector<8x128xf32>
    %70 = arith.divf %68, %69 : vector<8x128xf32>
    %71 = vector.extract_strided_slice %58 {offsets = [0, 256], sizes = [8, 128], strides = [1, 1]} : vector<8x512xf32> to vector<8x128xf32>
    %72 = math.tanh %71 : vector<8x128xf32>
    %73 = vector.extract_strided_slice %58 {offsets = [0, 384], sizes = [8, 128], strides = [1, 1]} : vector<8x512xf32> to vector<8x128xf32>
    %74 = arith.negf %73 : vector<8x128xf32>
    %75 = math.exp %74 : vector<8x128xf32>
    %cst_26 = arith.constant 1.000000e+00 : f32
    %76 = vector.broadcast %cst_26 : f32 to vector<8x128xf32>
    %77 = arith.addf %76, %75 : vector<8x128xf32>
    %78 = arith.divf %76, %77 : vector<8x128xf32>
    %79 = arith.mulf %70, %42 : vector<8x128xf32>
    %80 = arith.mulf %64, %72 : vector<8x128xf32>
    %81 = arith.addf %79, %80 : vector<8x128xf32>
    %82 = math.tanh %81 : vector<8x128xf32>
    %83 = arith.mulf %78, %82 : vector<8x128xf32>
    %84 = arith.truncf %83 : vector<8x128xf32> to vector<8x128xbf16>
    %85 = arith.index_cast %c1_i32 : i32 to index
    %c0_27 = arith.constant 0 : index
    %c0_28 = arith.constant 0 : index
    %86 = vector.load %arg12[%85, %c0_27, %c0_28] : memref<8x8x128xbf16, #tpu.memory_space<vmem>>, vector<1x8x128xbf16>
    %87 = vector.shape_cast %86 : vector<1x8x128xbf16> to vector<8x128xbf16>
    %88 = vector.shape_cast %84 : vector<8x128xbf16> to vector<1x8x128xbf16>
    tpu.vector_store %arg12[%85, %c0_27, %c0_28], %88 {strides = array<i32>} : memref<8x8x128xbf16, #tpu.memory_space<vmem>>, vector<1x8x128xbf16>,
    %c2_i32 = arith.constant 2 : i32
    %89 = arith.truncf %83 : vector<8x128xf32> to vector<8x128xbf16>
    %cst_29 = arith.constant dense<0.000000e+00> : vector<8x512xf32>
    %90 = tpu.matmul %89, %7, %cst_29 {dimension_numbers = #tpu.dot_dimension_numbers<[1], [0], [0], [1], [0, 0, 1, 1], [], []>} : vector<8x128xbf16>, vector<128x512xbf16>, vector<8x512xf32> -> vector<8x512xf32>
    %91 = arith.index_cast %c2_i32 : i32 to index
    %c0_30 = arith.constant 0 : index
    %c0_31 = arith.constant 0 : index
    %92 = vector.load %arg11[%91, %c0_30, %c0_31] : memref<8x8x512xbf16, #tpu.memory_space<vmem>>, vector<1x8x512xbf16>
    %93 = vector.shape_cast %92 : vector<1x8x512xbf16> to vector<8x512xbf16>
    %94 = arith.extf %93 : vector<8x512xbf16> to vector<8x512xf32>
    %95 = arith.addf %90, %94 : vector<8x512xf32>
    %96 = vector.broadcast %8 : vector<1x512xf32> to vector<8x512xf32>
    %97 = arith.addf %95, %96 : vector<8x512xf32>
    %98 = vector.extract_strided_slice %97 {offsets = [0, 0], sizes = [8, 128], strides = [1, 1]} : vector<8x512xf32> to vector<8x128xf32>
    %99 = arith.negf %98 : vector<8x128xf32>
    %100 = math.exp %99 : vector<8x128xf32>
    %cst_32 = arith.constant 1.000000e+00 : f32
    %101 = vector.broadcast %cst_32 : f32 to vector<8x128xf32>
    %102 = arith.addf %101, %100 : vector<8x128xf32>
    %103 = arith.divf %101, %102 : vector<8x128xf32>
    %104 = vector.extract_strided_slice %97 {offsets = [0, 128], sizes = [8, 128], strides = [1, 1]} : vector<8x512xf32> to vector<8x128xf32>
    %105 = arith.negf %104 : vector<8x128xf32>
    %106 = math.exp %105 : vector<8x128xf32>
    %cst_33 = arith.constant 1.000000e+00 : f32
    %107 = vector.broadcast %cst_33 : f32 to vector<8x128xf32>
    %108 = arith.addf %107, %106 : vector<8x128xf32>
    %109 = arith.divf %107, %108 : vector<8x128xf32>
    %110 = vector.extract_strided_slice %97 {offsets = [0, 256], sizes = [8, 128], strides = [1, 1]} : vector<8x512xf32> to vector<8x128xf32>
    %111 = math.tanh %110 : vector<8x128xf32>
    %112 = vector.extract_strided_slice %97 {offsets = [0, 384], sizes = [8, 128], strides = [1, 1]} : vector<8x512xf32> to vector<8x128xf32>
    %113 = arith.negf %112 : vector<8x128xf32>
    %114 = math.exp %113 : vector<8x128xf32>
    %cst_34 = arith.constant 1.000000e+00 : f32
    %115 = vector.broadcast %cst_34 : f32 to vector<8x128xf32>
    %116 = arith.addf %115, %114 : vector<8x128xf32>
    %117 = arith.divf %115, %116 : vector<8x128xf32>
    %118 = arith.mulf %109, %81 : vector<8x128xf32>
    %119 = arith.mulf %103, %111 : vector<8x128xf32>
    %120 = arith.addf %118, %119 : vector<8x128xf32>
    %121 = math.tanh %120 : vector<8x128xf32>
    %122 = arith.mulf %117, %121 : vector<8x128xf32>
    %123 = arith.truncf %122 : vector<8x128xf32> to vector<8x128xbf16>
    %124 = arith.index_cast %c2_i32 : i32 to index
    %c0_35 = arith.constant 0 : index
    %c0_36 = arith.constant 0 : index
    %125 = vector.load %arg12[%124, %c0_35, %c0_36] : memref<8x8x128xbf16, #tpu.memory_space<vmem>>, vector<1x8x128xbf16>
    %126 = vector.shape_cast %125 : vector<1x8x128xbf16> to vector<8x128xbf16>
    %127 = vector.shape_cast %123 : vector<8x128xbf16> to vector<1x8x128xbf16>
    tpu.vector_store %arg12[%124, %c0_35, %c0_36], %127 {strides = array<i32>} : memref<8x8x128xbf16, #tpu.memory_space<vmem>>, vector<1x8x128xbf16>,
    %c3_i32 = arith.constant 3 : i32
    %128 = arith.truncf %122 : vector<8x128xf32> to vector<8x128xbf16>
    %cst_37 = arith.constant dense<0.000000e+00> : vector<8x512xf32>
    %129 = tpu.matmul %128, %7, %cst_37 {dimension_numbers = #tpu.dot_dimension_numbers<[1], [0], [0], [1], [0, 0, 1, 1], [], []>} : vector<8x128xbf16>, vector<128x512xbf16>, vector<8x512xf32> -> vector<8x512xf32>
    %130 = arith.index_cast %c3_i32 : i32 to index
    %c0_38 = arith.constant 0 : index
    %c0_39 = arith.constant 0 : index
    %131 = vector.load %arg11[%130, %c0_38, %c0_39] : memref<8x8x512xbf16, #tpu.memory_space<vmem>>, vector<1x8x512xbf16>
    %132 = vector.shape_cast %131 : vector<1x8x512xbf16> to vector<8x512xbf16>
    %133 = arith.extf %132 : vector<8x512xbf16> to vector<8x512xf32>
    %134 = arith.addf %129, %133 : vector<8x512xf32>
    %135 = vector.broadcast %8 : vector<1x512xf32> to vector<8x512xf32>
    %136 = arith.addf %134, %135 : vector<8x512xf32>
    %137 = vector.extract_strided_slice %136 {offsets = [0, 0], sizes = [8, 128], strides = [1, 1]} : vector<8x512xf32> to vector<8x128xf32>
    %138 = arith.negf %137 : vector<8x128xf32>
    %139 = math.exp %138 : vector<8x128xf32>
    %cst_40 = arith.constant 1.000000e+00 : f32
    %140 = vector.broadcast %cst_40 : f32 to vector<8x128xf32>
    %141 = arith.addf %140, %139 : vector<8x128xf32>
    %142 = arith.divf %140, %141 : vector<8x128xf32>
    %143 = vector.extract_strided_slice %136 {offsets = [0, 128], sizes = [8, 128], strides = [1, 1]} : vector<8x512xf32> to vector<8x128xf32>
    %144 = arith.negf %143 : vector<8x128xf32>
    %145 = math.exp %144 : vector<8x128xf32>
    %cst_41 = arith.constant 1.000000e+00 : f32
    %146 = vector.broadcast %cst_41 : f32 to vector<8x128xf32>
    %147 = arith.addf %146, %145 : vector<8x128xf32>
    %148 = arith.divf %146, %147 : vector<8x128xf32>
    %149 = vector.extract_strided_slice %136 {offsets = [0, 256], sizes = [8, 128], strides = [1, 1]} : vector<8x512xf32> to vector<8x128xf32>
    %150 = math.tanh %149 : vector<8x128xf32>
    %151 = vector.extract_strided_slice %136 {offsets = [0, 384], sizes = [8, 128], strides = [1, 1]} : vector<8x512xf32> to vector<8x128xf32>
    %152 = arith.negf %151 : vector<8x128xf32>
    %153 = math.exp %152 : vector<8x128xf32>
    %cst_42 = arith.constant 1.000000e+00 : f32
    %154 = vector.broadcast %cst_42 : f32 to vector<8x128xf32>
    %155 = arith.addf %154, %153 : vector<8x128xf32>
    %156 = arith.divf %154, %155 : vector<8x128xf32>
    %157 = arith.mulf %148, %120 : vector<8x128xf32>
    %158 = arith.mulf %142, %150 : vector<8x128xf32>
    %159 = arith.addf %157, %158 : vector<8x128xf32>
    %160 = math.tanh %159 : vector<8x128xf32>
    %161 = arith.mulf %156, %160 : vector<8x128xf32>
    %162 = arith.truncf %161 : vector<8x128xf32> to vector<8x128xbf16>
    %163 = arith.index_cast %c3_i32 : i32 to index
    %c0_43 = arith.constant 0 : index
    %c0_44 = arith.constant 0 : index
    %164 = vector.load %arg12[%163, %c0_43, %c0_44] : memref<8x8x128xbf16, #tpu.memory_space<vmem>>, vector<1x8x128xbf16>
    %165 = vector.shape_cast %164 : vector<1x8x128xbf16> to vector<8x128xbf16>
    %166 = vector.shape_cast %162 : vector<8x128xbf16> to vector<1x8x128xbf16>
    tpu.vector_store %arg12[%163, %c0_43, %c0_44], %166 {strides = array<i32>} : memref<8x8x128xbf16, #tpu.memory_space<vmem>>, vector<1x8x128xbf16>,
    %c4_i32 = arith.constant 4 : i32
    %167 = arith.truncf %161 : vector<8x128xf32> to vector<8x128xbf16>
    %cst_45 = arith.constant dense<0.000000e+00> : vector<8x512xf32>
    %168 = tpu.matmul %167, %7, %cst_45 {dimension_numbers = #tpu.dot_dimension_numbers<[1], [0], [0], [1], [0, 0, 1, 1], [], []>} : vector<8x128xbf16>, vector<128x512xbf16>, vector<8x512xf32> -> vector<8x512xf32>
    %169 = arith.index_cast %c4_i32 : i32 to index
    %c0_46 = arith.constant 0 : index
    %c0_47 = arith.constant 0 : index
    %170 = vector.load %arg11[%169, %c0_46, %c0_47] : memref<8x8x512xbf16, #tpu.memory_space<vmem>>, vector<1x8x512xbf16>
    %171 = vector.shape_cast %170 : vector<1x8x512xbf16> to vector<8x512xbf16>
    %172 = arith.extf %171 : vector<8x512xbf16> to vector<8x512xf32>
    %173 = arith.addf %168, %172 : vector<8x512xf32>
    %174 = vector.broadcast %8 : vector<1x512xf32> to vector<8x512xf32>
    %175 = arith.addf %173, %174 : vector<8x512xf32>
    %176 = vector.extract_strided_slice %175 {offsets = [0, 0], sizes = [8, 128], strides = [1, 1]} : vector<8x512xf32> to vector<8x128xf32>
    %177 = arith.negf %176 : vector<8x128xf32>
    %178 = math.exp %177 : vector<8x128xf32>
    %cst_48 = arith.constant 1.000000e+00 : f32
    %179 = vector.broadcast %cst_48 : f32 to vector<8x128xf32>
    %180 = arith.addf %179, %178 : vector<8x128xf32>
    %181 = arith.divf %179, %180 : vector<8x128xf32>
    %182 = vector.extract_strided_slice %175 {offsets = [0, 128], sizes = [8, 128], strides = [1, 1]} : vector<8x512xf32> to vector<8x128xf32>
    %183 = arith.negf %182 : vector<8x128xf32>
    %184 = math.exp %183 : vector<8x128xf32>
    %cst_49 = arith.constant 1.000000e+00 : f32
    %185 = vector.broadcast %cst_49 : f32 to vector<8x128xf32>
    %186 = arith.addf %185, %184 : vector<8x128xf32>
    %187 = arith.divf %185, %186 : vector<8x128xf32>
    %188 = vector.extract_strided_slice %175 {offsets = [0, 256], sizes = [8, 128], strides = [1, 1]} : vector<8x512xf32> to vector<8x128xf32>
    %189 = math.tanh %188 : vector<8x128xf32>
    %190 = vector.extract_strided_slice %175 {offsets = [0, 384], sizes = [8, 128], strides = [1, 1]} : vector<8x512xf32> to vector<8x128xf32>
    %191 = arith.negf %190 : vector<8x128xf32>
    %192 = math.exp %191 : vector<8x128xf32>
    %cst_50 = arith.constant 1.000000e+00 : f32
    %193 = vector.broadcast %cst_50 : f32 to vector<8x128xf32>
    %194 = arith.addf %193, %192 : vector<8x128xf32>
    %195 = arith.divf %193, %194 : vector<8x128xf32>
    %196 = arith.mulf %187, %159 : vector<8x128xf32>
    %197 = arith.mulf %181, %189 : vector<8x128xf32>
    %198 = arith.addf %196, %197 : vector<8x128xf32>
    %199 = math.tanh %198 : vector<8x128xf32>
    %200 = arith.mulf %195, %199 : vector<8x128xf32>
    %201 = arith.truncf %200 : vector<8x128xf32> to vector<8x128xbf16>
    %202 = arith.index_cast %c4_i32 : i32 to index
    %c0_51 = arith.constant 0 : index
    %c0_52 = arith.constant 0 : index
    %203 = vector.load %arg12[%202, %c0_51, %c0_52] : memref<8x8x128xbf16, #tpu.memory_space<vmem>>, vector<1x8x128xbf16>
    %204 = vector.shape_cast %203 : vector<1x8x128xbf16> to vector<8x128xbf16>
    %205 = vector.shape_cast %201 : vector<8x128xbf16> to vector<1x8x128xbf16>
    tpu.vector_store %arg12[%202, %c0_51, %c0_52], %205 {strides = array<i32>} : memref<8x8x128xbf16, #tpu.memory_space<vmem>>, vector<1x8x128xbf16>,
    %c5_i32 = arith.constant 5 : i32
    %206 = arith.truncf %200 : vector<8x128xf32> to vector<8x128xbf16>
    %cst_53 = arith.constant dense<0.000000e+00> : vector<8x512xf32>
    %207 = tpu.matmul %206, %7, %cst_53 {dimension_numbers = #tpu.dot_dimension_numbers<[1], [0], [0], [1], [0, 0, 1, 1], [], []>} : vector<8x128xbf16>, vector<128x512xbf16>, vector<8x512xf32> -> vector<8x512xf32>
    %208 = arith.index_cast %c5_i32 : i32 to index
    %c0_54 = arith.constant 0 : index
    %c0_55 = arith.constant 0 : index
    %209 = vector.load %arg11[%208, %c0_54, %c0_55] : memref<8x8x512xbf16, #tpu.memory_space<vmem>>, vector<1x8x512xbf16>
    %210 = vector.shape_cast %209 : vector<1x8x512xbf16> to vector<8x512xbf16>
    %211 = arith.extf %210 : vector<8x512xbf16> to vector<8x512xf32>
    %212 = arith.addf %207, %211 : vector<8x512xf32>
    %213 = vector.broadcast %8 : vector<1x512xf32> to vector<8x512xf32>
    %214 = arith.addf %212, %213 : vector<8x512xf32>
    %215 = vector.extract_strided_slice %214 {offsets = [0, 0], sizes = [8, 128], strides = [1, 1]} : vector<8x512xf32> to vector<8x128xf32>
    %216 = arith.negf %215 : vector<8x128xf32>
    %217 = math.exp %216 : vector<8x128xf32>
    %cst_56 = arith.constant 1.000000e+00 : f32
    %218 = vector.broadcast %cst_56 : f32 to vector<8x128xf32>
    %219 = arith.addf %218, %217 : vector<8x128xf32>
    %220 = arith.divf %218, %219 : vector<8x128xf32>
    %221 = vector.extract_strided_slice %214 {offsets = [0, 128], sizes = [8, 128], strides = [1, 1]} : vector<8x512xf32> to vector<8x128xf32>
    %222 = arith.negf %221 : vector<8x128xf32>
    %223 = math.exp %222 : vector<8x128xf32>
    %cst_57 = arith.constant 1.000000e+00 : f32
    %224 = vector.broadcast %cst_57 : f32 to vector<8x128xf32>
    %225 = arith.addf %224, %223 : vector<8x128xf32>
    %226 = arith.divf %224, %225 : vector<8x128xf32>
    %227 = vector.extract_strided_slice %214 {offsets = [0, 256], sizes = [8, 128], strides = [1, 1]} : vector<8x512xf32> to vector<8x128xf32>
    %228 = math.tanh %227 : vector<8x128xf32>
    %229 = vector.extract_strided_slice %214 {offsets = [0, 384], sizes = [8, 128], strides = [1, 1]} : vector<8x512xf32> to vector<8x128xf32>
    %230 = arith.negf %229 : vector<8x128xf32>
    %231 = math.exp %230 : vector<8x128xf32>
    %cst_58 = arith.constant 1.000000e+00 : f32
    %232 = vector.broadcast %cst_58 : f32 to vector<8x128xf32>
    %233 = arith.addf %232, %231 : vector<8x128xf32>
    %234 = arith.divf %232, %233 : vector<8x128xf32>
    %235 = arith.mulf %226, %198 : vector<8x128xf32>
    %236 = arith.mulf %220, %228 : vector<8x128xf32>
    %237 = arith.addf %235, %236 : vector<8x128xf32>
    %238 = math.tanh %237 : vector<8x128xf32>
    %239 = arith.mulf %234, %238 : vector<8x128xf32>
    %240 = arith.truncf %239 : vector<8x128xf32> to vector<8x128xbf16>
    %241 = arith.index_cast %c5_i32 : i32 to index
    %c0_59 = arith.constant 0 : index
    %c0_60 = arith.constant 0 : index
    %242 = vector.load %arg12[%241, %c0_59, %c0_60] : memref<8x8x128xbf16, #tpu.memory_space<vmem>>, vector<1x8x128xbf16>
    %243 = vector.shape_cast %242 : vector<1x8x128xbf16> to vector<8x128xbf16>
    %244 = vector.shape_cast %240 : vector<8x128xbf16> to vector<1x8x128xbf16>
    tpu.vector_store %arg12[%241, %c0_59, %c0_60], %244 {strides = array<i32>} : memref<8x8x128xbf16, #tpu.memory_space<vmem>>, vector<1x8x128xbf16>,
    %c6_i32 = arith.constant 6 : i32
    %245 = arith.truncf %239 : vector<8x128xf32> to vector<8x128xbf16>
    %cst_61 = arith.constant dense<0.000000e+00> : vector<8x512xf32>
    %246 = tpu.matmul %245, %7, %cst_61 {dimension_numbers = #tpu.dot_dimension_numbers<[1], [0], [0], [1], [0, 0, 1, 1], [], []>} : vector<8x128xbf16>, vector<128x512xbf16>, vector<8x512xf32> -> vector<8x512xf32>
    %247 = arith.index_cast %c6_i32 : i32 to index
    %c0_62 = arith.constant 0 : index
    %c0_63 = arith.constant 0 : index
    %248 = vector.load %arg11[%247, %c0_62, %c0_63] : memref<8x8x512xbf16, #tpu.memory_space<vmem>>, vector<1x8x512xbf16>
    %249 = vector.shape_cast %248 : vector<1x8x512xbf16> to vector<8x512xbf16>
    %250 = arith.extf %249 : vector<8x512xbf16> to vector<8x512xf32>
    %251 = arith.addf %246, %250 : vector<8x512xf32>
    %252 = vector.broadcast %8 : vector<1x512xf32> to vector<8x512xf32>
    %253 = arith.addf %251, %252 : vector<8x512xf32>
    %254 = vector.extract_strided_slice %253 {offsets = [0, 0], sizes = [8, 128], strides = [1, 1]} : vector<8x512xf32> to vector<8x128xf32>
    %255 = arith.negf %254 : vector<8x128xf32>
    %256 = math.exp %255 : vector<8x128xf32>
    %cst_64 = arith.constant 1.000000e+00 : f32
    %257 = vector.broadcast %cst_64 : f32 to vector<8x128xf32>
    %258 = arith.addf %257, %256 : vector<8x128xf32>
    %259 = arith.divf %257, %258 : vector<8x128xf32>
    %260 = vector.extract_strided_slice %253 {offsets = [0, 128], sizes = [8, 128], strides = [1, 1]} : vector<8x512xf32> to vector<8x128xf32>
    %261 = arith.negf %260 : vector<8x128xf32>
    %262 = math.exp %261 : vector<8x128xf32>
    %cst_65 = arith.constant 1.000000e+00 : f32
    %263 = vector.broadcast %cst_65 : f32 to vector<8x128xf32>
    %264 = arith.addf %263, %262 : vector<8x128xf32>
    %265 = arith.divf %263, %264 : vector<8x128xf32>
    %266 = vector.extract_strided_slice %253 {offsets = [0, 256], sizes = [8, 128], strides = [1, 1]} : vector<8x512xf32> to vector<8x128xf32>
    %267 = math.tanh %266 : vector<8x128xf32>
    %268 = vector.extract_strided_slice %253 {offsets = [0, 384], sizes = [8, 128], strides = [1, 1]} : vector<8x512xf32> to vector<8x128xf32>
    %269 = arith.negf %268 : vector<8x128xf32>
    %270 = math.exp %269 : vector<8x128xf32>
    %cst_66 = arith.constant 1.000000e+00 : f32
    %271 = vector.broadcast %cst_66 : f32 to vector<8x128xf32>
    %272 = arith.addf %271, %270 : vector<8x128xf32>
    %273 = arith.divf %271, %272 : vector<8x128xf32>
    %274 = arith.mulf %265, %237 : vector<8x128xf32>
    %275 = arith.mulf %259, %267 : vector<8x128xf32>
    %276 = arith.addf %274, %275 : vector<8x128xf32>
    %277 = math.tanh %276 : vector<8x128xf32>
    %278 = arith.mulf %273, %277 : vector<8x128xf32>
    %279 = arith.truncf %278 : vector<8x128xf32> to vector<8x128xbf16>
    %280 = arith.index_cast %c6_i32 : i32 to index
    %c0_67 = arith.constant 0 : index
    %c0_68 = arith.constant 0 : index
    %281 = vector.load %arg12[%280, %c0_67, %c0_68] : memref<8x8x128xbf16, #tpu.memory_space<vmem>>, vector<1x8x128xbf16>
    %282 = vector.shape_cast %281 : vector<1x8x128xbf16> to vector<8x128xbf16>
    %283 = vector.shape_cast %279 : vector<8x128xbf16> to vector<1x8x128xbf16>
    tpu.vector_store %arg12[%280, %c0_67, %c0_68], %283 {strides = array<i32>} : memref<8x8x128xbf16, #tpu.memory_space<vmem>>, vector<1x8x128xbf16>,
    %c7_i32 = arith.constant 7 : i32
    %284 = arith.truncf %278 : vector<8x128xf32> to vector<8x128xbf16>
    %cst_69 = arith.constant dense<0.000000e+00> : vector<8x512xf32>
    %285 = tpu.matmul %284, %7, %cst_69 {dimension_numbers = #tpu.dot_dimension_numbers<[1], [0], [0], [1], [0, 0, 1, 1], [], []>} : vector<8x128xbf16>, vector<128x512xbf16>, vector<8x512xf32> -> vector<8x512xf32>
    %286 = arith.index_cast %c7_i32 : i32 to index
    %c0_70 = arith.constant 0 : index
    %c0_71 = arith.constant 0 : index
    %287 = vector.load %arg11[%286, %c0_70, %c0_71] : memref<8x8x512xbf16, #tpu.memory_space<vmem>>, vector<1x8x512xbf16>
    %288 = vector.shape_cast %287 : vector<1x8x512xbf16> to vector<8x512xbf16>
    %289 = arith.extf %288 : vector<8x512xbf16> to vector<8x512xf32>
    %290 = arith.addf %285, %289 : vector<8x512xf32>
    %291 = vector.broadcast %8 : vector<1x512xf32> to vector<8x512xf32>
    %292 = arith.addf %290, %291 : vector<8x512xf32>
    %293 = vector.extract_strided_slice %292 {offsets = [0, 0], sizes = [8, 128], strides = [1, 1]} : vector<8x512xf32> to vector<8x128xf32>
    %294 = arith.negf %293 : vector<8x128xf32>
    %295 = math.exp %294 : vector<8x128xf32>
    %cst_72 = arith.constant 1.000000e+00 : f32
    %296 = vector.broadcast %cst_72 : f32 to vector<8x128xf32>
    %297 = arith.addf %296, %295 : vector<8x128xf32>
    %298 = arith.divf %296, %297 : vector<8x128xf32>
    %299 = vector.extract_strided_slice %292 {offsets = [0, 128], sizes = [8, 128], strides = [1, 1]} : vector<8x512xf32> to vector<8x128xf32>
    %300 = arith.negf %299 : vector<8x128xf32>
    %301 = math.exp %300 : vector<8x128xf32>
    %cst_73 = arith.constant 1.000000e+00 : f32
    %302 = vector.broadcast %cst_73 : f32 to vector<8x128xf32>
    %303 = arith.addf %302, %301 : vector<8x128xf32>
    %304 = arith.divf %302, %303 : vector<8x128xf32>
    %305 = vector.extract_strided_slice %292 {offsets = [0, 256], sizes = [8, 128], strides = [1, 1]} : vector<8x512xf32> to vector<8x128xf32>
    %306 = math.tanh %305 : vector<8x128xf32>
    %307 = vector.extract_strided_slice %292 {offsets = [0, 384], sizes = [8, 128], strides = [1, 1]} : vector<8x512xf32> to vector<8x128xf32>
    %308 = arith.negf %307 : vector<8x128xf32>
    %309 = math.exp %308 : vector<8x128xf32>
    %cst_74 = arith.constant 1.000000e+00 : f32
    %310 = vector.broadcast %cst_74 : f32 to vector<8x128xf32>
    %311 = arith.addf %310, %309 : vector<8x128xf32>
    %312 = arith.divf %310, %311 : vector<8x128xf32>
    %313 = arith.mulf %304, %276 : vector<8x128xf32>
    %314 = arith.mulf %298, %306 : vector<8x128xf32>
    %315 = arith.addf %313, %314 : vector<8x128xf32>
    %316 = math.tanh %315 : vector<8x128xf32>
    %317 = arith.mulf %312, %316 : vector<8x128xf32>
    %318 = arith.truncf %317 : vector<8x128xf32> to vector<8x128xbf16>
    %319 = arith.index_cast %c7_i32 : i32 to index
    %c0_75 = arith.constant 0 : index
    %c0_76 = arith.constant 0 : index
    %320 = vector.load %arg12[%319, %c0_75, %c0_76] : memref<8x8x128xbf16, #tpu.memory_space<vmem>>, vector<1x8x128xbf16>
    %321 = vector.shape_cast %320 : vector<1x8x128xbf16> to vector<8x128xbf16>
    %322 = vector.shape_cast %318 : vector<8x128xbf16> to vector<1x8x128xbf16>
    tpu.vector_store %arg12[%319, %c0_75, %c0_76], %322 {strides = array<i32>} : memref<8x8x128xbf16, #tpu.memory_space<vmem>>, vector<1x8x128xbf16>,
    %c8_i32 = arith.constant 8 : i32
    %c0_77 = arith.constant 0 : index
    %c0_78 = arith.constant 0 : index
    %c0_79 = arith.constant 0 : index
    %323 = vector.load %arg12[%c0_77, %c0_78, %c0_79] : memref<8x8x128xbf16, #tpu.memory_space<vmem>>, vector<8x8x128xbf16>
    %324 = vector.shape_cast %323 : vector<8x8x128xbf16> to vector<64x128xbf16>
    %c0_80 = arith.constant 0 : index
    %c0_81 = arith.constant 0 : index
    %325 = vector.load %arg3[%c0_80, %c0_81] : memref<128x512xbf16, #tpu.memory_space<vmem>>, vector<128x512xbf16>
    %cst_82 = arith.constant dense<0.000000e+00> : vector<64x512xf32>
    %326 = tpu.matmul %324, %325, %cst_82 {dimension_numbers = #tpu.dot_dimension_numbers<[1], [0], [0], [1], [0, 0, 1, 1], [], []>} : vector<64x128xbf16>, vector<128x512xbf16>, vector<64x512xf32> -> vector<64x512xf32>
    %327 = arith.truncf %326 : vector<64x512xf32> to vector<64x512xbf16>
    %328 = vector.shape_cast %327 : vector<64x512xbf16> to vector<8x8x512xbf16>
    %c0_83 = arith.constant 0 : index
    %c0_84 = arith.constant 0 : index
    %c0_85 = arith.constant 0 : index
    %329 = vector.load %arg11[%c0_83, %c0_84, %c0_85] : memref<8x8x512xbf16, #tpu.memory_space<vmem>>, vector<8x8x512xbf16>
    tpu.vector_store %arg11[%c0_83, %c0_84, %c0_85], %328 {strides = array<i32>} : memref<8x8x512xbf16, #tpu.memory_space<vmem>>, vector<8x8x512xbf16>,
    %c0_86 = arith.constant 0 : index
    %c0_87 = arith.constant 0 : index
    %330 = vector.load %arg5[%c0_86, %c0_87] : memref<128x512xbf16, #tpu.memory_space<vmem>>, vector<128x512xbf16>
    %c0_88 = arith.constant 0 : index
    %c0_89 = arith.constant 0 : index
    %331 = vector.load %arg7[%c0_88, %c0_89] : memref<1x512xf32, #tpu.memory_space<vmem>>, vector<1x512xf32>
    %cst_90 = arith.constant 0.000000e+00 : f32
    %332 = vector.broadcast %cst_90 : f32 to vector<8x128xf32>
    %cst_91 = arith.constant 0.000000e+00 : f32
    %333 = vector.broadcast %cst_91 : f32 to vector<8x128xf32>
    %c0_i32_92 = arith.constant 0 : i32
    %334 = arith.truncf %332 : vector<8x128xf32> to vector<8x128xbf16>
    %cst_93 = arith.constant dense<0.000000e+00> : vector<8x512xf32>
    %335 = tpu.matmul %334, %330, %cst_93 {dimension_numbers = #tpu.dot_dimension_numbers<[1], [0], [0], [1], [0, 0, 1, 1], [], []>} : vector<8x128xbf16>, vector<128x512xbf16>, vector<8x512xf32> -> vector<8x512xf32>
    %336 = arith.index_cast %c0_i32_92 : i32 to index
    %c0_94 = arith.constant 0 : index
    %c0_95 = arith.constant 0 : index
    %337 = vector.load %arg11[%336, %c0_94, %c0_95] : memref<8x8x512xbf16, #tpu.memory_space<vmem>>, vector<1x8x512xbf16>
    %338 = vector.shape_cast %337 : vector<1x8x512xbf16> to vector<8x512xbf16>
    %339 = arith.extf %338 : vector<8x512xbf16> to vector<8x512xf32>
    %340 = arith.addf %335, %339 : vector<8x512xf32>
    %341 = vector.broadcast %331 : vector<1x512xf32> to vector<8x512xf32>
    %342 = arith.addf %340, %341 : vector<8x512xf32>
    %343 = vector.extract_strided_slice %342 {offsets = [0, 0], sizes = [8, 128], strides = [1, 1]} : vector<8x512xf32> to vector<8x128xf32>
    %344 = arith.negf %343 : vector<8x128xf32>
    %345 = math.exp %344 : vector<8x128xf32>
    %cst_96 = arith.constant 1.000000e+00 : f32
    %346 = vector.broadcast %cst_96 : f32 to vector<8x128xf32>
    %347 = arith.addf %346, %345 : vector<8x128xf32>
    %348 = arith.divf %346, %347 : vector<8x128xf32>
    %349 = vector.extract_strided_slice %342 {offsets = [0, 128], sizes = [8, 128], strides = [1, 1]} : vector<8x512xf32> to vector<8x128xf32>
    %350 = arith.negf %349 : vector<8x128xf32>
    %351 = math.exp %350 : vector<8x128xf32>
    %cst_97 = arith.constant 1.000000e+00 : f32
    %352 = vector.broadcast %cst_97 : f32 to vector<8x128xf32>
    %353 = arith.addf %352, %351 : vector<8x128xf32>
    %354 = arith.divf %352, %353 : vector<8x128xf32>
    %355 = vector.extract_strided_slice %342 {offsets = [0, 256], sizes = [8, 128], strides = [1, 1]} : vector<8x512xf32> to vector<8x128xf32>
    %356 = math.tanh %355 : vector<8x128xf32>
    %357 = vector.extract_strided_slice %342 {offsets = [0, 384], sizes = [8, 128], strides = [1, 1]} : vector<8x512xf32> to vector<8x128xf32>
    %358 = arith.negf %357 : vector<8x128xf32>
    %359 = math.exp %358 : vector<8x128xf32>
    %cst_98 = arith.constant 1.000000e+00 : f32
    %360 = vector.broadcast %cst_98 : f32 to vector<8x128xf32>
    %361 = arith.addf %360, %359 : vector<8x128xf32>
    %362 = arith.divf %360, %361 : vector<8x128xf32>
    %363 = arith.mulf %354, %333 : vector<8x128xf32>
    %364 = arith.mulf %348, %356 : vector<8x128xf32>
    %365 = arith.addf %363, %364 : vector<8x128xf32>
    %366 = math.tanh %365 : vector<8x128xf32>
    %367 = arith.mulf %362, %366 : vector<8x128xf32>
    %cst_99 = arith.constant 0.000000e+00 : f32
    %368 = vector.broadcast %cst_99 : f32 to vector<8x128xf32>
    %369 = arith.maximumf %367, %368 : vector<8x128xf32>
    %370 = arith.truncf %369 : vector<8x128xf32> to vector<8x128xbf16>
    %371 = arith.index_cast %c0_i32_92 : i32 to index
    %c0_100 = arith.constant 0 : index
    %c0_101 = arith.constant 0 : index
    %372 = vector.load %arg12[%371, %c0_100, %c0_101] : memref<8x8x128xbf16, #tpu.memory_space<vmem>>, vector<1x8x128xbf16>
    %373 = vector.shape_cast %372 : vector<1x8x128xbf16> to vector<8x128xbf16>
    %374 = vector.shape_cast %370 : vector<8x128xbf16> to vector<1x8x128xbf16>
    tpu.vector_store %arg12[%371, %c0_100, %c0_101], %374 {strides = array<i32>} : memref<8x8x128xbf16, #tpu.memory_space<vmem>>, vector<1x8x128xbf16>,
    %c1_i32_102 = arith.constant 1 : i32
    %375 = arith.truncf %367 : vector<8x128xf32> to vector<8x128xbf16>
    %cst_103 = arith.constant dense<0.000000e+00> : vector<8x512xf32>
    %376 = tpu.matmul %375, %330, %cst_103 {dimension_numbers = #tpu.dot_dimension_numbers<[1], [0], [0], [1], [0, 0, 1, 1], [], []>} : vector<8x128xbf16>, vector<128x512xbf16>, vector<8x512xf32> -> vector<8x512xf32>
    %377 = arith.index_cast %c1_i32_102 : i32 to index
    %c0_104 = arith.constant 0 : index
    %c0_105 = arith.constant 0 : index
    %378 = vector.load %arg11[%377, %c0_104, %c0_105] : memref<8x8x512xbf16, #tpu.memory_space<vmem>>, vector<1x8x512xbf16>
    %379 = vector.shape_cast %378 : vector<1x8x512xbf16> to vector<8x512xbf16>
    %380 = arith.extf %379 : vector<8x512xbf16> to vector<8x512xf32>
    %381 = arith.addf %376, %380 : vector<8x512xf32>
    %382 = vector.broadcast %331 : vector<1x512xf32> to vector<8x512xf32>
    %383 = arith.addf %381, %382 : vector<8x512xf32>
    %384 = vector.extract_strided_slice %383 {offsets = [0, 0], sizes = [8, 128], strides = [1, 1]} : vector<8x512xf32> to vector<8x128xf32>
    %385 = arith.negf %384 : vector<8x128xf32>
    %386 = math.exp %385 : vector<8x128xf32>
    %cst_106 = arith.constant 1.000000e+00 : f32
    %387 = vector.broadcast %cst_106 : f32 to vector<8x128xf32>
    %388 = arith.addf %387, %386 : vector<8x128xf32>
    %389 = arith.divf %387, %388 : vector<8x128xf32>
    %390 = vector.extract_strided_slice %383 {offsets = [0, 128], sizes = [8, 128], strides = [1, 1]} : vector<8x512xf32> to vector<8x128xf32>
    %391 = arith.negf %390 : vector<8x128xf32>
    %392 = math.exp %391 : vector<8x128xf32>
    %cst_107 = arith.constant 1.000000e+00 : f32
    %393 = vector.broadcast %cst_107 : f32 to vector<8x128xf32>
    %394 = arith.addf %393, %392 : vector<8x128xf32>
    %395 = arith.divf %393, %394 : vector<8x128xf32>
    %396 = vector.extract_strided_slice %383 {offsets = [0, 256], sizes = [8, 128], strides = [1, 1]} : vector<8x512xf32> to vector<8x128xf32>
    %397 = math.tanh %396 : vector<8x128xf32>
    %398 = vector.extract_strided_slice %383 {offsets = [0, 384], sizes = [8, 128], strides = [1, 1]} : vector<8x512xf32> to vector<8x128xf32>
    %399 = arith.negf %398 : vector<8x128xf32>
    %400 = math.exp %399 : vector<8x128xf32>
    %cst_108 = arith.constant 1.000000e+00 : f32
    %401 = vector.broadcast %cst_108 : f32 to vector<8x128xf32>
    %402 = arith.addf %401, %400 : vector<8x128xf32>
    %403 = arith.divf %401, %402 : vector<8x128xf32>
    %404 = arith.mulf %395, %365 : vector<8x128xf32>
    %405 = arith.mulf %389, %397 : vector<8x128xf32>
    %406 = arith.addf %404, %405 : vector<8x128xf32>
    %407 = math.tanh %406 : vector<8x128xf32>
    %408 = arith.mulf %403, %407 : vector<8x128xf32>
    %cst_109 = arith.constant 0.000000e+00 : f32
    %409 = vector.broadcast %cst_109 : f32 to vector<8x128xf32>
    %410 = arith.maximumf %408, %409 : vector<8x128xf32>
    %411 = arith.truncf %410 : vector<8x128xf32> to vector<8x128xbf16>
    %412 = arith.index_cast %c1_i32_102 : i32 to index
    %c0_110 = arith.constant 0 : index
    %c0_111 = arith.constant 0 : index
    %413 = vector.load %arg12[%412, %c0_110, %c0_111] : memref<8x8x128xbf16, #tpu.memory_space<vmem>>, vector<1x8x128xbf16>
    %414 = vector.shape_cast %413 : vector<1x8x128xbf16> to vector<8x128xbf16>
    %415 = vector.shape_cast %411 : vector<8x128xbf16> to vector<1x8x128xbf16>
    tpu.vector_store %arg12[%412, %c0_110, %c0_111], %415 {strides = array<i32>} : memref<8x8x128xbf16, #tpu.memory_space<vmem>>, vector<1x8x128xbf16>,
    %c2_i32_112 = arith.constant 2 : i32
    %416 = arith.truncf %408 : vector<8x128xf32> to vector<8x128xbf16>
    %cst_113 = arith.constant dense<0.000000e+00> : vector<8x512xf32>
    %417 = tpu.matmul %416, %330, %cst_113 {dimension_numbers = #tpu.dot_dimension_numbers<[1], [0], [0], [1], [0, 0, 1, 1], [], []>} : vector<8x128xbf16>, vector<128x512xbf16>, vector<8x512xf32> -> vector<8x512xf32>
    %418 = arith.index_cast %c2_i32_112 : i32 to index
    %c0_114 = arith.constant 0 : index
    %c0_115 = arith.constant 0 : index
    %419 = vector.load %arg11[%418, %c0_114, %c0_115] : memref<8x8x512xbf16, #tpu.memory_space<vmem>>, vector<1x8x512xbf16>
    %420 = vector.shape_cast %419 : vector<1x8x512xbf16> to vector<8x512xbf16>
    %421 = arith.extf %420 : vector<8x512xbf16> to vector<8x512xf32>
    %422 = arith.addf %417, %421 : vector<8x512xf32>
    %423 = vector.broadcast %331 : vector<1x512xf32> to vector<8x512xf32>
    %424 = arith.addf %422, %423 : vector<8x512xf32>
    %425 = vector.extract_strided_slice %424 {offsets = [0, 0], sizes = [8, 128], strides = [1, 1]} : vector<8x512xf32> to vector<8x128xf32>
    %426 = arith.negf %425 : vector<8x128xf32>
    %427 = math.exp %426 : vector<8x128xf32>
    %cst_116 = arith.constant 1.000000e+00 : f32
    %428 = vector.broadcast %cst_116 : f32 to vector<8x128xf32>
    %429 = arith.addf %428, %427 : vector<8x128xf32>
    %430 = arith.divf %428, %429 : vector<8x128xf32>
    %431 = vector.extract_strided_slice %424 {offsets = [0, 128], sizes = [8, 128], strides = [1, 1]} : vector<8x512xf32> to vector<8x128xf32>
    %432 = arith.negf %431 : vector<8x128xf32>
    %433 = math.exp %432 : vector<8x128xf32>
    %cst_117 = arith.constant 1.000000e+00 : f32
    %434 = vector.broadcast %cst_117 : f32 to vector<8x128xf32>
    %435 = arith.addf %434, %433 : vector<8x128xf32>
    %436 = arith.divf %434, %435 : vector<8x128xf32>
    %437 = vector.extract_strided_slice %424 {offsets = [0, 256], sizes = [8, 128], strides = [1, 1]} : vector<8x512xf32> to vector<8x128xf32>
    %438 = math.tanh %437 : vector<8x128xf32>
    %439 = vector.extract_strided_slice %424 {offsets = [0, 384], sizes = [8, 128], strides = [1, 1]} : vector<8x512xf32> to vector<8x128xf32>
    %440 = arith.negf %439 : vector<8x128xf32>
    %441 = math.exp %440 : vector<8x128xf32>
    %cst_118 = arith.constant 1.000000e+00 : f32
    %442 = vector.broadcast %cst_118 : f32 to vector<8x128xf32>
    %443 = arith.addf %442, %441 : vector<8x128xf32>
    %444 = arith.divf %442, %443 : vector<8x128xf32>
    %445 = arith.mulf %436, %406 : vector<8x128xf32>
    %446 = arith.mulf %430, %438 : vector<8x128xf32>
    %447 = arith.addf %445, %446 : vector<8x128xf32>
    %448 = math.tanh %447 : vector<8x128xf32>
    %449 = arith.mulf %444, %448 : vector<8x128xf32>
    %cst_119 = arith.constant 0.000000e+00 : f32
    %450 = vector.broadcast %cst_119 : f32 to vector<8x128xf32>
    %451 = arith.maximumf %449, %450 : vector<8x128xf32>
    %452 = arith.truncf %451 : vector<8x128xf32> to vector<8x128xbf16>
    %453 = arith.index_cast %c2_i32_112 : i32 to index
    %c0_120 = arith.constant 0 : index
    %c0_121 = arith.constant 0 : index
    %454 = vector.load %arg12[%453, %c0_120, %c0_121] : memref<8x8x128xbf16, #tpu.memory_space<vmem>>, vector<1x8x128xbf16>
    %455 = vector.shape_cast %454 : vector<1x8x128xbf16> to vector<8x128xbf16>
    %456 = vector.shape_cast %452 : vector<8x128xbf16> to vector<1x8x128xbf16>
    tpu.vector_store %arg12[%453, %c0_120, %c0_121], %456 {strides = array<i32>} : memref<8x8x128xbf16, #tpu.memory_space<vmem>>, vector<1x8x128xbf16>,
    %c3_i32_122 = arith.constant 3 : i32
    %457 = arith.truncf %449 : vector<8x128xf32> to vector<8x128xbf16>
    %cst_123 = arith.constant dense<0.000000e+00> : vector<8x512xf32>
    %458 = tpu.matmul %457, %330, %cst_123 {dimension_numbers = #tpu.dot_dimension_numbers<[1], [0], [0], [1], [0, 0, 1, 1], [], []>} : vector<8x128xbf16>, vector<128x512xbf16>, vector<8x512xf32> -> vector<8x512xf32>
    %459 = arith.index_cast %c3_i32_122 : i32 to index
    %c0_124 = arith.constant 0 : index
    %c0_125 = arith.constant 0 : index
    %460 = vector.load %arg11[%459, %c0_124, %c0_125] : memref<8x8x512xbf16, #tpu.memory_space<vmem>>, vector<1x8x512xbf16>
    %461 = vector.shape_cast %460 : vector<1x8x512xbf16> to vector<8x512xbf16>
    %462 = arith.extf %461 : vector<8x512xbf16> to vector<8x512xf32>
    %463 = arith.addf %458, %462 : vector<8x512xf32>
    %464 = vector.broadcast %331 : vector<1x512xf32> to vector<8x512xf32>
    %465 = arith.addf %463, %464 : vector<8x512xf32>
    %466 = vector.extract_strided_slice %465 {offsets = [0, 0], sizes = [8, 128], strides = [1, 1]} : vector<8x512xf32> to vector<8x128xf32>
    %467 = arith.negf %466 : vector<8x128xf32>
    %468 = math.exp %467 : vector<8x128xf32>
    %cst_126 = arith.constant 1.000000e+00 : f32
    %469 = vector.broadcast %cst_126 : f32 to vector<8x128xf32>
    %470 = arith.addf %469, %468 : vector<8x128xf32>
    %471 = arith.divf %469, %470 : vector<8x128xf32>
    %472 = vector.extract_strided_slice %465 {offsets = [0, 128], sizes = [8, 128], strides = [1, 1]} : vector<8x512xf32> to vector<8x128xf32>
    %473 = arith.negf %472 : vector<8x128xf32>
    %474 = math.exp %473 : vector<8x128xf32>
    %cst_127 = arith.constant 1.000000e+00 : f32
    %475 = vector.broadcast %cst_127 : f32 to vector<8x128xf32>
    %476 = arith.addf %475, %474 : vector<8x128xf32>
    %477 = arith.divf %475, %476 : vector<8x128xf32>
    %478 = vector.extract_strided_slice %465 {offsets = [0, 256], sizes = [8, 128], strides = [1, 1]} : vector<8x512xf32> to vector<8x128xf32>
    %479 = math.tanh %478 : vector<8x128xf32>
    %480 = vector.extract_strided_slice %465 {offsets = [0, 384], sizes = [8, 128], strides = [1, 1]} : vector<8x512xf32> to vector<8x128xf32>
    %481 = arith.negf %480 : vector<8x128xf32>
    %482 = math.exp %481 : vector<8x128xf32>
    %cst_128 = arith.constant 1.000000e+00 : f32
    %483 = vector.broadcast %cst_128 : f32 to vector<8x128xf32>
    %484 = arith.addf %483, %482 : vector<8x128xf32>
    %485 = arith.divf %483, %484 : vector<8x128xf32>
    %486 = arith.mulf %477, %447 : vector<8x128xf32>
    %487 = arith.mulf %471, %479 : vector<8x128xf32>
    %488 = arith.addf %486, %487 : vector<8x128xf32>
    %489 = math.tanh %488 : vector<8x128xf32>
    %490 = arith.mulf %485, %489 : vector<8x128xf32>
    %cst_129 = arith.constant 0.000000e+00 : f32
    %491 = vector.broadcast %cst_129 : f32 to vector<8x128xf32>
    %492 = arith.maximumf %490, %491 : vector<8x128xf32>
    %493 = arith.truncf %492 : vector<8x128xf32> to vector<8x128xbf16>
    %494 = arith.index_cast %c3_i32_122 : i32 to index
    %c0_130 = arith.constant 0 : index
    %c0_131 = arith.constant 0 : index
    %495 = vector.load %arg12[%494, %c0_130, %c0_131] : memref<8x8x128xbf16, #tpu.memory_space<vmem>>, vector<1x8x128xbf16>
    %496 = vector.shape_cast %495 : vector<1x8x128xbf16> to vector<8x128xbf16>
    %497 = vector.shape_cast %493 : vector<8x128xbf16> to vector<1x8x128xbf16>
    tpu.vector_store %arg12[%494, %c0_130, %c0_131], %497 {strides = array<i32>} : memref<8x8x128xbf16, #tpu.memory_space<vmem>>, vector<1x8x128xbf16>,
    %c4_i32_132 = arith.constant 4 : i32
    %498 = arith.truncf %490 : vector<8x128xf32> to vector<8x128xbf16>
    %cst_133 = arith.constant dense<0.000000e+00> : vector<8x512xf32>
    %499 = tpu.matmul %498, %330, %cst_133 {dimension_numbers = #tpu.dot_dimension_numbers<[1], [0], [0], [1], [0, 0, 1, 1], [], []>} : vector<8x128xbf16>, vector<128x512xbf16>, vector<8x512xf32> -> vector<8x512xf32>
    %500 = arith.index_cast %c4_i32_132 : i32 to index
    %c0_134 = arith.constant 0 : index
    %c0_135 = arith.constant 0 : index
    %501 = vector.load %arg11[%500, %c0_134, %c0_135] : memref<8x8x512xbf16, #tpu.memory_space<vmem>>, vector<1x8x512xbf16>
    %502 = vector.shape_cast %501 : vector<1x8x512xbf16> to vector<8x512xbf16>
    %503 = arith.extf %502 : vector<8x512xbf16> to vector<8x512xf32>
    %504 = arith.addf %499, %503 : vector<8x512xf32>
    %505 = vector.broadcast %331 : vector<1x512xf32> to vector<8x512xf32>
    %506 = arith.addf %504, %505 : vector<8x512xf32>
    %507 = vector.extract_strided_slice %506 {offsets = [0, 0], sizes = [8, 128], strides = [1, 1]} : vector<8x512xf32> to vector<8x128xf32>
    %508 = arith.negf %507 : vector<8x128xf32>
    %509 = math.exp %508 : vector<8x128xf32>
    %cst_136 = arith.constant 1.000000e+00 : f32
    %510 = vector.broadcast %cst_136 : f32 to vector<8x128xf32>
    %511 = arith.addf %510, %509 : vector<8x128xf32>
    %512 = arith.divf %510, %511 : vector<8x128xf32>
    %513 = vector.extract_strided_slice %506 {offsets = [0, 128], sizes = [8, 128], strides = [1, 1]} : vector<8x512xf32> to vector<8x128xf32>
    %514 = arith.negf %513 : vector<8x128xf32>
    %515 = math.exp %514 : vector<8x128xf32>
    %cst_137 = arith.constant 1.000000e+00 : f32
    %516 = vector.broadcast %cst_137 : f32 to vector<8x128xf32>
    %517 = arith.addf %516, %515 : vector<8x128xf32>
    %518 = arith.divf %516, %517 : vector<8x128xf32>
    %519 = vector.extract_strided_slice %506 {offsets = [0, 256], sizes = [8, 128], strides = [1, 1]} : vector<8x512xf32> to vector<8x128xf32>
    %520 = math.tanh %519 : vector<8x128xf32>
    %521 = vector.extract_strided_slice %506 {offsets = [0, 384], sizes = [8, 128], strides = [1, 1]} : vector<8x512xf32> to vector<8x128xf32>
    %522 = arith.negf %521 : vector<8x128xf32>
    %523 = math.exp %522 : vector<8x128xf32>
    %cst_138 = arith.constant 1.000000e+00 : f32
    %524 = vector.broadcast %cst_138 : f32 to vector<8x128xf32>
    %525 = arith.addf %524, %523 : vector<8x128xf32>
    %526 = arith.divf %524, %525 : vector<8x128xf32>
    %527 = arith.mulf %518, %488 : vector<8x128xf32>
    %528 = arith.mulf %512, %520 : vector<8x128xf32>
    %529 = arith.addf %527, %528 : vector<8x128xf32>
    %530 = math.tanh %529 : vector<8x128xf32>
    %531 = arith.mulf %526, %530 : vector<8x128xf32>
    %cst_139 = arith.constant 0.000000e+00 : f32
    %532 = vector.broadcast %cst_139 : f32 to vector<8x128xf32>
    %533 = arith.maximumf %531, %532 : vector<8x128xf32>
    %534 = arith.truncf %533 : vector<8x128xf32> to vector<8x128xbf16>
    %535 = arith.index_cast %c4_i32_132 : i32 to index
    %c0_140 = arith.constant 0 : index
    %c0_141 = arith.constant 0 : index
    %536 = vector.load %arg12[%535, %c0_140, %c0_141] : memref<8x8x128xbf16, #tpu.memory_space<vmem>>, vector<1x8x128xbf16>
    %537 = vector.shape_cast %536 : vector<1x8x128xbf16> to vector<8x128xbf16>
    %538 = vector.shape_cast %534 : vector<8x128xbf16> to vector<1x8x128xbf16>
    tpu.vector_store %arg12[%535, %c0_140, %c0_141], %538 {strides = array<i32>} : memref<8x8x128xbf16, #tpu.memory_space<vmem>>, vector<1x8x128xbf16>,
    %c5_i32_142 = arith.constant 5 : i32
    %539 = arith.truncf %531 : vector<8x128xf32> to vector<8x128xbf16>
    %cst_143 = arith.constant dense<0.000000e+00> : vector<8x512xf32>
    %540 = tpu.matmul %539, %330, %cst_143 {dimension_numbers = #tpu.dot_dimension_numbers<[1], [0], [0], [1], [0, 0, 1, 1], [], []>} : vector<8x128xbf16>, vector<128x512xbf16>, vector<8x512xf32> -> vector<8x512xf32>
    %541 = arith.index_cast %c5_i32_142 : i32 to index
    %c0_144 = arith.constant 0 : index
    %c0_145 = arith.constant 0 : index
    %542 = vector.load %arg11[%541, %c0_144, %c0_145] : memref<8x8x512xbf16, #tpu.memory_space<vmem>>, vector<1x8x512xbf16>
    %543 = vector.shape_cast %542 : vector<1x8x512xbf16> to vector<8x512xbf16>
    %544 = arith.extf %543 : vector<8x512xbf16> to vector<8x512xf32>
    %545 = arith.addf %540, %544 : vector<8x512xf32>
    %546 = vector.broadcast %331 : vector<1x512xf32> to vector<8x512xf32>
    %547 = arith.addf %545, %546 : vector<8x512xf32>
    %548 = vector.extract_strided_slice %547 {offsets = [0, 0], sizes = [8, 128], strides = [1, 1]} : vector<8x512xf32> to vector<8x128xf32>
    %549 = arith.negf %548 : vector<8x128xf32>
    %550 = math.exp %549 : vector<8x128xf32>
    %cst_146 = arith.constant 1.000000e+00 : f32
    %551 = vector.broadcast %cst_146 : f32 to vector<8x128xf32>
    %552 = arith.addf %551, %550 : vector<8x128xf32>
    %553 = arith.divf %551, %552 : vector<8x128xf32>
    %554 = vector.extract_strided_slice %547 {offsets = [0, 128], sizes = [8, 128], strides = [1, 1]} : vector<8x512xf32> to vector<8x128xf32>
    %555 = arith.negf %554 : vector<8x128xf32>
    %556 = math.exp %555 : vector<8x128xf32>
    %cst_147 = arith.constant 1.000000e+00 : f32
    %557 = vector.broadcast %cst_147 : f32 to vector<8x128xf32>
    %558 = arith.addf %557, %556 : vector<8x128xf32>
    %559 = arith.divf %557, %558 : vector<8x128xf32>
    %560 = vector.extract_strided_slice %547 {offsets = [0, 256], sizes = [8, 128], strides = [1, 1]} : vector<8x512xf32> to vector<8x128xf32>
    %561 = math.tanh %560 : vector<8x128xf32>
    %562 = vector.extract_strided_slice %547 {offsets = [0, 384], sizes = [8, 128], strides = [1, 1]} : vector<8x512xf32> to vector<8x128xf32>
    %563 = arith.negf %562 : vector<8x128xf32>
    %564 = math.exp %563 : vector<8x128xf32>
    %cst_148 = arith.constant 1.000000e+00 : f32
    %565 = vector.broadcast %cst_148 : f32 to vector<8x128xf32>
    %566 = arith.addf %565, %564 : vector<8x128xf32>
    %567 = arith.divf %565, %566 : vector<8x128xf32>
    %568 = arith.mulf %559, %529 : vector<8x128xf32>
    %569 = arith.mulf %553, %561 : vector<8x128xf32>
    %570 = arith.addf %568, %569 : vector<8x128xf32>
    %571 = math.tanh %570 : vector<8x128xf32>
    %572 = arith.mulf %567, %571 : vector<8x128xf32>
    %cst_149 = arith.constant 0.000000e+00 : f32
    %573 = vector.broadcast %cst_149 : f32 to vector<8x128xf32>
    %574 = arith.maximumf %572, %573 : vector<8x128xf32>
    %575 = arith.truncf %574 : vector<8x128xf32> to vector<8x128xbf16>
    %576 = arith.index_cast %c5_i32_142 : i32 to index
    %c0_150 = arith.constant 0 : index
    %c0_151 = arith.constant 0 : index
    %577 = vector.load %arg12[%576, %c0_150, %c0_151] : memref<8x8x128xbf16, #tpu.memory_space<vmem>>, vector<1x8x128xbf16>
    %578 = vector.shape_cast %577 : vector<1x8x128xbf16> to vector<8x128xbf16>
    %579 = vector.shape_cast %575 : vector<8x128xbf16> to vector<1x8x128xbf16>
    tpu.vector_store %arg12[%576, %c0_150, %c0_151], %579 {strides = array<i32>} : memref<8x8x128xbf16, #tpu.memory_space<vmem>>, vector<1x8x128xbf16>,
    %c6_i32_152 = arith.constant 6 : i32
    %580 = arith.truncf %572 : vector<8x128xf32> to vector<8x128xbf16>
    %cst_153 = arith.constant dense<0.000000e+00> : vector<8x512xf32>
    %581 = tpu.matmul %580, %330, %cst_153 {dimension_numbers = #tpu.dot_dimension_numbers<[1], [0], [0], [1], [0, 0, 1, 1], [], []>} : vector<8x128xbf16>, vector<128x512xbf16>, vector<8x512xf32> -> vector<8x512xf32>
    %582 = arith.index_cast %c6_i32_152 : i32 to index
    %c0_154 = arith.constant 0 : index
    %c0_155 = arith.constant 0 : index
    %583 = vector.load %arg11[%582, %c0_154, %c0_155] : memref<8x8x512xbf16, #tpu.memory_space<vmem>>, vector<1x8x512xbf16>
    %584 = vector.shape_cast %583 : vector<1x8x512xbf16> to vector<8x512xbf16>
    %585 = arith.extf %584 : vector<8x512xbf16> to vector<8x512xf32>
    %586 = arith.addf %581, %585 : vector<8x512xf32>
    %587 = vector.broadcast %331 : vector<1x512xf32> to vector<8x512xf32>
    %588 = arith.addf %586, %587 : vector<8x512xf32>
    %589 = vector.extract_strided_slice %588 {offsets = [0, 0], sizes = [8, 128], strides = [1, 1]} : vector<8x512xf32> to vector<8x128xf32>
    %590 = arith.negf %589 : vector<8x128xf32>
    %591 = math.exp %590 : vector<8x128xf32>
    %cst_156 = arith.constant 1.000000e+00 : f32
    %592 = vector.broadcast %cst_156 : f32 to vector<8x128xf32>
    %593 = arith.addf %592, %591 : vector<8x128xf32>
    %594 = arith.divf %592, %593 : vector<8x128xf32>
    %595 = vector.extract_strided_slice %588 {offsets = [0, 128], sizes = [8, 128], strides = [1, 1]} : vector<8x512xf32> to vector<8x128xf32>
    %596 = arith.negf %595 : vector<8x128xf32>
    %597 = math.exp %596 : vector<8x128xf32>
    %cst_157 = arith.constant 1.000000e+00 : f32
    %598 = vector.broadcast %cst_157 : f32 to vector<8x128xf32>
    %599 = arith.addf %598, %597 : vector<8x128xf32>
    %600 = arith.divf %598, %599 : vector<8x128xf32>
    %601 = vector.extract_strided_slice %588 {offsets = [0, 256], sizes = [8, 128], strides = [1, 1]} : vector<8x512xf32> to vector<8x128xf32>
    %602 = math.tanh %601 : vector<8x128xf32>
    %603 = vector.extract_strided_slice %588 {offsets = [0, 384], sizes = [8, 128], strides = [1, 1]} : vector<8x512xf32> to vector<8x128xf32>
    %604 = arith.negf %603 : vector<8x128xf32>
    %605 = math.exp %604 : vector<8x128xf32>
    %cst_158 = arith.constant 1.000000e+00 : f32
    %606 = vector.broadcast %cst_158 : f32 to vector<8x128xf32>
    %607 = arith.addf %606, %605 : vector<8x128xf32>
    %608 = arith.divf %606, %607 : vector<8x128xf32>
    %609 = arith.mulf %600, %570 : vector<8x128xf32>
    %610 = arith.mulf %594, %602 : vector<8x128xf32>
    %611 = arith.addf %609, %610 : vector<8x128xf32>
    %612 = math.tanh %611 : vector<8x128xf32>
    %613 = arith.mulf %608, %612 : vector<8x128xf32>
    %cst_159 = arith.constant 0.000000e+00 : f32
    %614 = vector.broadcast %cst_159 : f32 to vector<8x128xf32>
    %615 = arith.maximumf %613, %614 : vector<8x128xf32>
    %616 = arith.truncf %615 : vector<8x128xf32> to vector<8x128xbf16>
    %617 = arith.index_cast %c6_i32_152 : i32 to index
    %c0_160 = arith.constant 0 : index
    %c0_161 = arith.constant 0 : index
    %618 = vector.load %arg12[%617, %c0_160, %c0_161] : memref<8x8x128xbf16, #tpu.memory_space<vmem>>, vector<1x8x128xbf16>
    %619 = vector.shape_cast %618 : vector<1x8x128xbf16> to vector<8x128xbf16>
    %620 = vector.shape_cast %616 : vector<8x128xbf16> to vector<1x8x128xbf16>
    tpu.vector_store %arg12[%617, %c0_160, %c0_161], %620 {strides = array<i32>} : memref<8x8x128xbf16, #tpu.memory_space<vmem>>, vector<1x8x128xbf16>,
    %c7_i32_162 = arith.constant 7 : i32
    %621 = arith.truncf %613 : vector<8x128xf32> to vector<8x128xbf16>
    %cst_163 = arith.constant dense<0.000000e+00> : vector<8x512xf32>
    %622 = tpu.matmul %621, %330, %cst_163 {dimension_numbers = #tpu.dot_dimension_numbers<[1], [0], [0], [1], [0, 0, 1, 1], [], []>} : vector<8x128xbf16>, vector<128x512xbf16>, vector<8x512xf32> -> vector<8x512xf32>
    %623 = arith.index_cast %c7_i32_162 : i32 to index
    %c0_164 = arith.constant 0 : index
    %c0_165 = arith.constant 0 : index
    %624 = vector.load %arg11[%623, %c0_164, %c0_165] : memref<8x8x512xbf16, #tpu.memory_space<vmem>>, vector<1x8x512xbf16>
    %625 = vector.shape_cast %624 : vector<1x8x512xbf16> to vector<8x512xbf16>
    %626 = arith.extf %625 : vector<8x512xbf16> to vector<8x512xf32>
    %627 = arith.addf %622, %626 : vector<8x512xf32>
    %628 = vector.broadcast %331 : vector<1x512xf32> to vector<8x512xf32>
    %629 = arith.addf %627, %628 : vector<8x512xf32>
    %630 = vector.extract_strided_slice %629 {offsets = [0, 0], sizes = [8, 128], strides = [1, 1]} : vector<8x512xf32> to vector<8x128xf32>
    %631 = arith.negf %630 : vector<8x128xf32>
    %632 = math.exp %631 : vector<8x128xf32>
    %cst_166 = arith.constant 1.000000e+00 : f32
    %633 = vector.broadcast %cst_166 : f32 to vector<8x128xf32>
    %634 = arith.addf %633, %632 : vector<8x128xf32>
    %635 = arith.divf %633, %634 : vector<8x128xf32>
    %636 = vector.extract_strided_slice %629 {offsets = [0, 128], sizes = [8, 128], strides = [1, 1]} : vector<8x512xf32> to vector<8x128xf32>
    %637 = arith.negf %636 : vector<8x128xf32>
    %638 = math.exp %637 : vector<8x128xf32>
    %cst_167 = arith.constant 1.000000e+00 : f32
    %639 = vector.broadcast %cst_167 : f32 to vector<8x128xf32>
    %640 = arith.addf %639, %638 : vector<8x128xf32>
    %641 = arith.divf %639, %640 : vector<8x128xf32>
    %642 = vector.extract_strided_slice %629 {offsets = [0, 256], sizes = [8, 128], strides = [1, 1]} : vector<8x512xf32> to vector<8x128xf32>
    %643 = math.tanh %642 : vector<8x128xf32>
    %644 = vector.extract_strided_slice %629 {offsets = [0, 384], sizes = [8, 128], strides = [1, 1]} : vector<8x512xf32> to vector<8x128xf32>
    %645 = arith.negf %644 : vector<8x128xf32>
    %646 = math.exp %645 : vector<8x128xf32>
    %cst_168 = arith.constant 1.000000e+00 : f32
    %647 = vector.broadcast %cst_168 : f32 to vector<8x128xf32>
    %648 = arith.addf %647, %646 : vector<8x128xf32>
    %649 = arith.divf %647, %648 : vector<8x128xf32>
    %650 = arith.mulf %641, %611 : vector<8x128xf32>
    %651 = arith.mulf %635, %643 : vector<8x128xf32>
    %652 = arith.addf %650, %651 : vector<8x128xf32>
    %653 = math.tanh %652 : vector<8x128xf32>
    %654 = arith.mulf %649, %653 : vector<8x128xf32>
    %cst_169 = arith.constant 0.000000e+00 : f32
    %655 = vector.broadcast %cst_169 : f32 to vector<8x128xf32>
    %656 = arith.maximumf %654, %655 : vector<8x128xf32>
    %657 = arith.truncf %656 : vector<8x128xf32> to vector<8x128xbf16>
    %658 = arith.index_cast %c7_i32_162 : i32 to index
    %c0_170 = arith.constant 0 : index
    %c0_171 = arith.constant 0 : index
    %659 = vector.load %arg12[%658, %c0_170, %c0_171] : memref<8x8x128xbf16, #tpu.memory_space<vmem>>, vector<1x8x128xbf16>
    %660 = vector.shape_cast %659 : vector<1x8x128xbf16> to vector<8x128xbf16>
    %661 = vector.shape_cast %657 : vector<8x128xbf16> to vector<1x8x128xbf16>
    tpu.vector_store %arg12[%658, %c0_170, %c0_171], %661 {strides = array<i32>} : memref<8x8x128xbf16, #tpu.memory_space<vmem>>, vector<1x8x128xbf16>,
    %c8_i32_172 = arith.constant 8 : i32
    %c0_173 = arith.constant 0 : index
    %c0_174 = arith.constant 0 : index
    %c0_175 = arith.constant 0 : index
    %662 = vector.load %arg12[%c0_173, %c0_174, %c0_175] : memref<8x8x128xbf16, #tpu.memory_space<vmem>>, vector<1x8x128xbf16>
    %663 = vector.shape_cast %662 : vector<1x8x128xbf16> to vector<8x128xbf16>
    %c1 = arith.constant 1 : index
    %c0_176 = arith.constant 0 : index
    %c0_177 = arith.constant 0 : index
    %664 = vector.load %arg12[%c1, %c0_176, %c0_177] : memref<8x8x128xbf16, #tpu.memory_space<vmem>>, vector<1x8x128xbf16>
    %665 = vector.shape_cast %664 : vector<1x8x128xbf16> to vector<8x128xbf16>
    %c2 = arith.constant 2 : index
    %c0_178 = arith.constant 0 : index
    %c0_179 = arith.constant 0 : index
    %666 = vector.load %arg12[%c2, %c0_178, %c0_179] : memref<8x8x128xbf16, #tpu.memory_space<vmem>>, vector<1x8x128xbf16>
    %667 = vector.shape_cast %666 : vector<1x8x128xbf16> to vector<8x128xbf16>
    %c3 = arith.constant 3 : index
    %c0_180 = arith.constant 0 : index
    %c0_181 = arith.constant 0 : index
    %668 = vector.load %arg12[%c3, %c0_180, %c0_181] : memref<8x8x128xbf16, #tpu.memory_space<vmem>>, vector<1x8x128xbf16>
    %669 = vector.shape_cast %668 : vector<1x8x128xbf16> to vector<8x128xbf16>
    %c4 = arith.constant 4 : index
    %c0_182 = arith.constant 0 : index
    %c0_183 = arith.constant 0 : index
    %670 = vector.load %arg12[%c4, %c0_182, %c0_183] : memref<8x8x128xbf16, #tpu.memory_space<vmem>>, vector<1x8x128xbf16>
    %671 = vector.shape_cast %670 : vector<1x8x128xbf16> to vector<8x128xbf16>
    %c5 = arith.constant 5 : index
    %c0_184 = arith.constant 0 : index
    %c0_185 = arith.constant 0 : index
    %672 = vector.load %arg12[%c5, %c0_184, %c0_185] : memref<8x8x128xbf16, #tpu.memory_space<vmem>>, vector<1x8x128xbf16>
    %673 = vector.shape_cast %672 : vector<1x8x128xbf16> to vector<8x128xbf16>
    %c6 = arith.constant 6 : index
    %c0_186 = arith.constant 0 : index
    %c0_187 = arith.constant 0 : index
    %674 = vector.load %arg12[%c6, %c0_186, %c0_187] : memref<8x8x128xbf16, #tpu.memory_space<vmem>>, vector<1x8x128xbf16>
    %675 = vector.shape_cast %674 : vector<1x8x128xbf16> to vector<8x128xbf16>
    %c7 = arith.constant 7 : index
    %c0_188 = arith.constant 0 : index
    %c0_189 = arith.constant 0 : index
    %676 = vector.load %arg12[%c7, %c0_188, %c0_189] : memref<8x8x128xbf16, #tpu.memory_space<vmem>>, vector<1x8x128xbf16>
    %677 = vector.shape_cast %676 : vector<1x8x128xbf16> to vector<8x128xbf16>
    %678 = tpu.concatenate %663, %665, %667, %669, %671, %673, %675, %677 in 1 : vector<8x128xbf16>, vector<8x128xbf16>, vector<8x128xbf16>, vector<8x128xbf16>, vector<8x128xbf16>, vector<8x128xbf16>, vector<8x128xbf16>, vector<8x128xbf16> -> vector<8x1024xbf16>
    %c0_190 = arith.constant 0 : index
    %c0_191 = arith.constant 0 : index
    %679 = vector.load %arg1[%c0_190, %c0_191] : memref<8x128xf32, #tpu.memory_space<vmem>>, vector<8x128xf32>
    %c0_192 = arith.constant 0 : index
    %c0_193 = arith.constant 0 : index
    %680 = vector.load %arg8[%c0_192, %c0_193] : memref<1024x128xbf16, #tpu.memory_space<vmem>>, vector<1024x128xbf16>
    %cst_194 = arith.constant dense<0.000000e+00> : vector<8x128xf32>
    %681 = tpu.matmul %678, %680, %cst_194 {dimension_numbers = #tpu.dot_dimension_numbers<[1], [0], [0], [1], [0, 0, 1, 1], [], []>} : vector<8x1024xbf16>, vector<1024x128xbf16>, vector<8x128xf32> -> vector<8x128xf32>
    %682 = arith.addf %679, %681 : vector<8x128xf32>
    %c0_195 = arith.constant 0 : index
    %c0_196 = arith.constant 0 : index
    %683 = vector.load %arg9[%c0_195, %c0_196] : memref<1x128xf32, #tpu.memory_space<vmem>>, vector<1x128xf32>
    %684 = vector.broadcast %683 : vector<1x128xf32> to vector<8x128xf32>
    %685 = arith.addf %682, %684 : vector<8x128xf32>
    %686 = tpu.iota {dimensions = array<i32: 1>} : vector<8x128xi32>
    %c5_i32_197 = arith.constant 5 : i32
    %687 = vector.broadcast %c5_i32_197 : i32 to vector<8x128xi32>
    %688 = arith.cmpi slt, %686, %687 : vector<8x128xi32>
    %cst_198 = arith.constant -1.000000e+30 : f32
    %689 = vector.broadcast %cst_198 : f32 to vector<8x128xf32>
    %690 = arith.select %688, %685, %689 : vector<8x128xi1>, vector<8x128xf32>
    %cst_199 = arith.constant dense<0xFF800000> : vector<8xf32>
    %691 = vector.multi_reduction <maximumf>, %690, %cst_199 [1] : vector<8x128xf32> to vector<8xf32>
    %692 = vector.shape_cast %691 : vector<8xf32> to vector<8x1xf32>
    %693 = vector.broadcast %692 : vector<8x1xf32> to vector<8x128xf32>
    %694 = arith.subf %690, %693 : vector<8x128xf32>
    %695 = math.exp %694 : vector<8x128xf32>
    %cst_200 = arith.constant dense<0.000000e+00> : vector<8xf32>
    %696 = vector.multi_reduction <add>, %695, %cst_200 [1] : vector<8x128xf32> to vector<8xf32>
    %697 = vector.shape_cast %696 : vector<8xf32> to vector<8x1xf32>
    %698 = vector.broadcast %697 : vector<8x1xf32> to vector<8x128xf32>
    %699 = arith.divf %695, %698 : vector<8x128xf32>
    %c0_201 = arith.constant 0 : index
    %c0_202 = arith.constant 0 : index
    %700 = vector.load %arg10[%c0_201, %c0_202] : memref<8x128xf32, #tpu.memory_space<vmem>>, vector<8x128xf32>
    tpu.vector_store %arg10[%c0_201, %c0_202], %699 {strides = array<i32>} : memref<8x128xf32, #tpu.memory_space<vmem>>, vector<8x128xf32>,
    return
  }
}

</mosaic_0001>

<bundles_post_ra>
// kernel: model_forward.1
= control target key start
LH: loop header
LB: loop body
LE: loop exit
PB: predicated region body
PF: predicated region fallthrough
CT: control target
= control target key end

     0   :  { %15 = vsyncpa [#allocation5], 0  ;;  %s5263_s16 = smov [#allocation4]   ;;  %s5264_s18 = smov 256   ;;  %s7186_s0 = inlined_call_operand.vmem [shape: bf16[8,8,128], index: 0, kind: input, shape index: {}]   ;;  %s7187_s1 = inlined_call_operand.vmem [shape: f32[8,128], index: 1, kind: input, shape index: {}]   ;;  %s7188_s2 = inlined_call_operand.vmem [shape: bf16[128,512], index: 2, kind: input, shape index: {}]   ;;  %s7189_s3 = inlined_call_operand.vmem [shape: bf16[128,512], index: 3, kind: input, shape index: {}]   ;;  %s7190_s4 = inlined_call_operand.vmem [shape: bf16[128,512], index: 4, kind: input, shape index: {}]   ;;  %s7191_s5 = inlined_call_operand.hbm [shape: bf16[128,512], index: 5, kind: input, shape index: {}]   ;;  %s7192_s6 = inlined_call_operand.vmem [shape: f32[1,512], index: 6, kind: input, shape index: {}]   ;;  %s7193_s7 = inlined_call_operand.vmem [shape: f32[1,512], index: 7, kind: input, shape index: {}]   ;;  %s7194_s8 = inlined_call_operand.vmem [shape: bf16[1024,128], index: 8, kind: input, shape index: {}]   ;;  %s7195_s9 = inlined_call_operand.vmem [shape: f32[1,128], index: 9, kind: input, shape index: {}]   ;;  %s7196_s10 = inlined_call_operand.vmem [shape: f32[8,128], index: 10, kind: output, shape index: {}]  }
   0x1   :  { %s30_s15 = sshll.u32 %s7191_s5, 4  ;;  %s32_s17 = sshll.u32 %s5263_s16, 4  ;;  %s31_s15 = int_to_ptr.hbm [resolvable:$true] %s30_s15  ;;  %s33_s17 = int_to_ptr.vmem [resolvable:$true] %s32_s17 }
   0x2   :  { %s5265_s19 = smov 16  }
   0x3   :  { %38 = dma.hbm_to_vmem [thread:$0]  %s31_s15, 4096, %s33_s17, [#allocation5], %s5264_s18, %s5264_s18, %s5265_s19  }
   0x4   :  { %5261 = dma.done.wait [#allocation5], 4096  }
   0x5   :  { %5262 = vsyncadd [#allocation5], 4294963200  ;;  %v4054_v0 = vld [vmem:[%s7188_s2 + $0xe0] sm:$0xf]  ;;  %v4806_v1 = vld [vmem:[%s7188_s2 + $0xec] sm:$0xf0] }
   0x6   :  { %v4804_v2 = vld [vmem:[%s7188_s2 + $0xe4] sm:$0xf]  ;;  %v4055_v3 = vor.u32 %v4806_v1, %v4054_v0  ;;  %v4056_v4 = vld [vmem:[%s7188_s2 + $0xf0] sm:$0xf0]  ;;  %v4062_v5 = vld [vmem:[%s7188_s2 + $0xe8] sm:$0xf] }
   0x7   :  { %v4807_v6 = vld [vmem:[%s7188_s2 + $0xf4] sm:$0xf0]  ;;  %v4059_v7 = vor.u32 %v4804_v2, %v4056_v4  ;;  %v4805_v9 = vld [vmem:[%s7188_s2 + $0xec] sm:$0xf]  ;;  %v4064_v10 = vld [vmem:[%s7188_s2 + $0xf8] sm:$0xf0] }
   0x8   :  { %v4063_v8 = vor.u32 %v4807_v6, %v4062_v5  ;;  %v4038_v11 = vld [vmem:[%s7188_s2 + $0xc0] sm:$0xf]  ;;  %276 = vmatpush.bf16.msra.mxu0 %v4055_v3  ;;  %v4067_v12 = vor.u32 %v4805_v9, %v4064_v10  ;;  %v4802_v13 = vld [vmem:[%s7188_s2 + $0xcc] sm:$0xf0]  ;;  %v4800_v14 = vld [vmem:[%s7188_s2 + $0xc4] sm:$0xf] }
   0x9   :  { %v4040_v15 = vld [vmem:[%s7188_s2 + $0xd0] sm:$0xf0]  ;;  %305 = vmatpush.bf16.msra.mxu1 %v4059_v7  ;;  %v4039_v16 = vor.u32 %v4802_v13, %v4038_v11  ;;  %v4046_v18 = vld [vmem:[%s7188_s2 + $0xc8] sm:$0xf]  ;;  %v4803_v19 = vld [vmem:[%s7188_s2 + $0xd4] sm:$0xf0] }
   0xa   :  { %334 = vmatpush.bf16.msra.mxu2 %v4063_v8  ;;  %v4043_v17 = vor.u32 %v4800_v14, %v4040_v15  ;;  %v4801_v20 = vld [vmem:[%s7188_s2 + $0xcc] sm:$0xf]  ;;  %363 = vmatpush.bf16.msra.mxu3 %v4067_v12  ;;  %v4047_v21 = vor.u32 %v4803_v19, %v4046_v18  ;;  %v4048_v22 = vld [vmem:[%s7188_s2 + $0xd8] sm:$0xf0]  ;;  %v4022_v23 = vld [vmem:[%s7188_s2 + $0xa0] sm:$0xf] }
   0xb   :  { %v4798_v24 = vld [vmem:[%s7188_s2 + $0xac] sm:$0xf0]  ;;  %v4051_v25 = vor.u32 %v4801_v20, %v4048_v22  ;;  %v4796_v26 = vld [vmem:[%s7188_s2 + $0xa4] sm:$0xf]  ;;  %v4024_v27 = vld [vmem:[%s7188_s2 + $0xb0] sm:$0xf0] }
   0xc   :  { %v4030_v28 = vld [vmem:[%s7188_s2 + $0xa8] sm:$0xf]  ;;  %277 = vmatpush.bf16.msra.mxu0 %v4039_v16  ;;  %v4023_v29 = vor.u32 %v4798_v24, %v4022_v23  ;;  %v4799_v30 = vld [vmem:[%s7188_s2 + $0xb4] sm:$0xf0]  ;;  %v4797_v31 = vld [vmem:[%s7188_s2 + $0xac] sm:$0xf]  ;;  %v4027_v33 = vor.u32 %v4796_v26, %v4024_v27 }
   0xd   :  { %v4032_v32 = vld [vmem:[%s7188_s2 + $0xb8] sm:$0xf0]  ;;  %306 = vmatpush.bf16.msra.mxu1 %v4043_v17  ;;  %v4031_v34 = vor.u32 %v4799_v30, %v4030_v28  ;;  %v4006_v35 = vld [vmem:[%s7188_s2 + $0x80] sm:$0xf]  ;;  %v4794_v36 = vld [vmem:[%s7188_s2 + $0x8c] sm:$0xf0] }
   0xe   :  { %335 = vmatpush.bf16.msra.mxu2 %v4047_v21  ;;  %v4792_v37 = vld [vmem:[%s7188_s2 + $0x84] sm:$0xf]  ;;  %364 = vmatpush.bf16.msra.mxu3 %v4051_v25  ;;  %v4035_v38 = vor.u32 %v4797_v31, %v4032_v32  ;;  %v4008_v39 = vld [vmem:[%s7188_s2 + $0x90] sm:$0xf0]  ;;  %v4014_v40 = vld [vmem:[%s7188_s2 + $0x88] sm:$0xf]  ;;  %v4007_v44 = vor.u32 %v4794_v36, %v4006_v35 }
   0xf   :  { %v4795_v41 = vld [vmem:[%s7188_s2 + $0x94] sm:$0xf0]  ;;  %v4793_v42 = vld [vmem:[%s7188_s2 + $0x8c] sm:$0xf]  ;;  %v4016_v43 = vld [vmem:[%s7188_s2 + $0x98] sm:$0xf0]  ;;  %v4011_v45 = vor.u32 %v4792_v37, %v4008_v39 }
  0x10   :  { %278 = vmatpush.bf16.msra.mxu0 %v4023_v29  ;;  %v4015_v46 = vor.u32 %v4795_v41, %v4014_v40  ;;  %v3990_v47 = vld [vmem:[%s7188_s2 + $0x60] sm:$0xf]  ;;  %v4790_v48 = vld [vmem:[%s7188_s2 + $0x6c] sm:$0xf0]  ;;  %v4788_v49 = vld [vmem:[%s7188_s2 + $0x64] sm:$0xf]  ;;  %v4019_v50 = vor.u32 %v4793_v42, %v4016_v43 }
  0x11   :  { %307 = vmatpush.bf16.msra.mxu1 %v4027_v33  ;;  %v3992_v51 = vld [vmem:[%s7188_s2 + $0x70] sm:$0xf0]  ;;  %v3998_v52 = vld [vmem:[%s7188_s2 + $0x68] sm:$0xf]  ;;  %v4791_v53 = vld [vmem:[%s7188_s2 + $0x74] sm:$0xf0]  ;;  %v3991_v56 = vor.u32 %v4790_v48, %v3990_v47 }
  0x12   :  { %336 = vmatpush.bf16.msra.mxu2 %v4031_v34  ;;  %365 = vmatpush.bf16.msra.mxu3 %v4035_v38  ;;  %v4789_v54 = vld [vmem:[%s7188_s2 + $0x6c] sm:$0xf]  ;;  %v4000_v55 = vld [vmem:[%s7188_s2 + $0x78] sm:$0xf0]  ;;  %v3995_v57 = vor.u32 %v4788_v49, %v3992_v51  ;;  %v3999_v58 = vor.u32 %v4791_v53, %v3998_v52  ;;  %v3974_v59 = vld [vmem:[%s7188_s2 + $0x40] sm:$0xf] }
  0x13   :  { %v4786_v60 = vld [vmem:[%s7188_s2 + $0x4c] sm:$0xf0]  ;;  %v4784_v61 = vld [vmem:[%s7188_s2 + $0x44] sm:$0xf]  ;;  %v4003_v62 = vor.u32 %v4789_v54, %v4000_v55  ;;  %v3976_v63 = vld [vmem:[%s7188_s2 + $0x50] sm:$0xf0] }
  0x14   :  { %279 = vmatpush.bf16.msra.mxu0 %v4007_v44  ;;  %v3982_v0 = vld [vmem:[%s7188_s2 + $0x48] sm:$0xf]  ;;  %v4787_v1 = vld [vmem:[%s7188_s2 + $0x54] sm:$0xf0]  ;;  %v4785_v2 = vld [vmem:[%s7188_s2 + $0x4c] sm:$0xf]  ;;  %v3975_v4 = vor.u32 %v4786_v60, %v3974_v59  ;;  %v3979_v5 = vor.u32 %v4784_v61, %v3976_v63 }
  0x15   :  { %308 = vmatpush.bf16.msra.mxu1 %v4011_v45  ;;  %v3984_v3 = vld [vmem:[%s7188_s2 + $0x58] sm:$0xf0]  ;;  %v3983_v6 = vor.u32 %v4787_v1, %v3982_v0  ;;  %v3958_v7 = vld [vmem:[%s7188_s2 + $0x20] sm:$0xf]  ;;  %v4782_v8 = vld [vmem:[%s7188_s2 + $0x2c] sm:$0xf0] }
  0x16   :  { %337 = vmatpush.bf16.msra.mxu2 %v4015_v46  ;;  %366 = vmatpush.bf16.msra.mxu3 %v4019_v50  ;;  %v4780_v9 = vld [vmem:[%s7188_s2 + $0x24] sm:$0xf]  ;;  %v3987_v10 = vor.u32 %v4785_v2, %v3984_v3  ;;  %v3960_v11 = vld [vmem:[%s7188_s2 + $0x30] sm:$0xf0]  ;;  %v3966_v12 = vld [vmem:[%s7188_s2 + $0x28] sm:$0xf]  ;;  %v3959_v16 = vor.u32 %v4782_v8, %v3958_v7 }
  0x17   :  { %v4783_v13 = vld [vmem:[%s7188_s2 + $0x34] sm:$0xf0]  ;;  %v4781_v14 = vld [vmem:[%s7188_s2 + $0x2c] sm:$0xf]  ;;  %v3968_v15 = vld [vmem:[%s7188_s2 + $0x38] sm:$0xf0]  ;;  %v3963_v18 = vor.u32 %v4780_v9, %v3960_v11 }
  0x18   :  { %280 = vmatpush.bf16.msra.mxu0 %v3991_v56  ;;  %v3942_v17 = vld [vmem:[%s7188_s2] sm:$0xf]  ;;  %v3967_v19 = vor.u32 %v4783_v13, %v3966_v12  ;;  %v4778_v20 = vld [vmem:[%s7188_s2 + $0xc] sm:$0xf0]  ;;  %v4776_v21 = vld [vmem:[%s7188_s2 + $0x4] sm:$0xf]  ;;  %v3971_v23 = vor.u32 %v4781_v14, %v3968_v15 }
  0x19   :  { %309 = vmatpush.bf16.msra.mxu1 %v3995_v57  ;;  %v3944_v22 = vld [vmem:[%s7188_s2 + $0x10] sm:$0xf0]  ;;  %v3950_v24 = vld [vmem:[%s7188_s2 + $0x8] sm:$0xf]  ;;  %v4779_v25 = vld [vmem:[%s7188_s2 + $0x14] sm:$0xf0]  ;;  %v3943_v30 = vor.u32 %v4778_v20, %v3942_v17 }
  0x1a   :  { %338 = vmatpush.bf16.msra.mxu2 %v3999_v58  ;;  %367 = vmatpush.bf16.msra.mxu3 %v4003_v62  ;;  %v4777_v26 = vld [vmem:[%s7188_s2 + $0xc] sm:$0xf]  ;;  %v3952_v27 = vld [vmem:[%s7188_s2 + $0x18] sm:$0xf0]  ;;  %v4182_v28 = vld [vmem:[%s7190_s4 + $0xe0] sm:$0xf]  ;;  %v3947_v33 = vor.u32 %v4776_v21, %v3944_v22  ;;  %v3951_v34 = vor.u32 %v4779_v25, %v3950_v24 }
  0x1b   :  { %v4838_v29 = vld [vmem:[%s7190_s4 + $0xec] sm:$0xf0]  ;;  %v4836_v31 = vld [vmem:[%s7190_s4 + $0xe4] sm:$0xf]  ;;  %v4184_v32 = vld [vmem:[%s7190_s4 + $0xf0] sm:$0xf0]  ;;  %v3955_v36 = vor.u32 %v4777_v26, %v3952_v27 }
  0x1c   :  { %281 = vmatpush.bf16.msra.mxu0 %v3975_v4  ;;  %v4772_v35 = vld [vmem:[%s7186_s0] sm:$0xff]  ;;  %v5532_v37 = vor.u32 %v4838_v29, %v4182_v28  ;;  %v4837_v38 = vld [vmem:[%s7190_s4 + $0xec] sm:$0xf]  ;;  %v4190_v39 = vld [vmem:[%s7190_s4 + $0xe8] sm:$0xf]  ;;  %v5543_v41 = vor.u32 %v4836_v31, %v4184_v32 }
  0x1d   :  { %310 = vmatpush.bf16.msra.mxu1 %v3979_v5  ;;  %v4839_v40 = vld [vmem:[%s7190_s4 + $0xf4] sm:$0xf0]  ;;  %v4192_v42 = vld [vmem:[%s7190_s4 + $0xf8] sm:$0xf0]  ;;  %v4166_v43 = vld [vmem:[%s7190_s4 + $0xc0] sm:$0xf] }
  0x1e   :  { %339 = vmatpush.bf16.msra.mxu2 %v3983_v6  ;;  %368 = vmatpush.bf16.msra.mxu3 %v3987_v10  ;;  %v4834_v44 = vld [vmem:[%s7190_s4 + $0xcc] sm:$0xf0]  ;;  %v4832_v45 = vld [vmem:[%s7190_s4 + $0xc4] sm:$0xf]  ;;  %v4168_v46 = vld [vmem:[%s7190_s4 + $0xd0] sm:$0xf0]  ;;  %v5560_v47 = vor.u32 %v4839_v40, %v4190_v39  ;;  %v5563_v48 = vor.u32 %v4837_v38, %v4192_v42 }
  0x1f   :  { %v5565_v49 = vor.u32 %v4834_v44, %v4166_v43  ;;  %v4833_v50 = vld [vmem:[%s7190_s4 + $0xcc] sm:$0xf]  ;;  %v4174_v51 = vld [vmem:[%s7190_s4 + $0xc8] sm:$0xf]  ;;  %v4835_v52 = vld [vmem:[%s7190_s4 + $0xd4] sm:$0xf0]  ;;  %v5577_v53 = vor.u32 %v4832_v45, %v4168_v46 }
  0x20   :  { %282 = vmatpush.bf16.msra.mxu0 %v3959_v16  ;;  %v4176_v54 = vld [vmem:[%s7190_s4 + $0xd8] sm:$0xf0]  ;;  %v4150_v55 = vld [vmem:[%s7190_s4 + $0xa0] sm:$0xf]  ;;  %v4830_v56 = vld [vmem:[%s7190_s4 + $0xac] sm:$0xf0]  ;;  %v5595_v59 = vor.u32 %v4835_v52, %v4174_v51 }
  0x21   :  { %311 = vmatpush.bf16.msra.mxu1 %v3963_v18  ;;  %v4828_v57 = vld [vmem:[%s7190_s4 + $0xa4] sm:$0xf]  ;;  %v4152_v58 = vld [vmem:[%s7190_s4 + $0xb0] sm:$0xf0]  ;;  %v5599_v60 = vor.u32 %v4833_v50, %v4176_v54  ;;  %v5601_v61 = vor.u32 %v4830_v56, %v4150_v55  ;;  %v4829_v62 = vld [vmem:[%s7190_s4 + $0xac] sm:$0xf] }
  0x22   :  { %340 = vmatpush.bf16.msra.mxu2 %v3967_v19  ;;  %369 = vmatpush.bf16.msra.mxu3 %v3971_v23  ;;  %v4158_v63 = vld [vmem:[%s7190_s4 + $0xa8] sm:$0xf]  ;;  %v4831_v0 = vld [vmem:[%s7190_s4 + $0xb4] sm:$0xf0]  ;;  %v5613_v1 = vor.u32 %v4828_v57, %v4152_v58  ;;  %v4160_v2 = vld [vmem:[%s7190_s4 + $0xb8] sm:$0xf0] }
  0x23   :  { %v4134_v3 = vld [vmem:[%s7190_s4 + $0x80] sm:$0xf]  ;;  %v4826_v4 = vld [vmem:[%s7190_s4 + $0x8c] sm:$0xf0]  ;;  %v4824_v5 = vld [vmem:[%s7190_s4 + $0x84] sm:$0xf]  ;;  %v5631_v7 = vor.u32 %v4831_v0, %v4158_v63  ;;  %v5635_v8 = vor.u32 %v4829_v62, %v4160_v2 }
  0x24   :  { %283 = vmatpush.bf16.msra.mxu0 %v3943_v30  ;;  %v4136_v6 = vld [vmem:[%s7190_s4 + $0x90] sm:$0xf0]  ;;  %v5637_v9 = vor.u32 %v4826_v4, %v4134_v3  ;;  %v4825_v10 = vld [vmem:[%s7190_s4 + $0x8c] sm:$0xf]  ;;  %v4142_v11 = vld [vmem:[%s7190_s4 + $0x88] sm:$0xf] }
  0x25   :  { %312 = vmatpush.bf16.msra.mxu1 %v3947_v33  ;;  %v4827_v12 = vld [vmem:[%s7190_s4 + $0x94] sm:$0xf0]  ;;  %v5649_v13 = vor.u32 %v4824_v5, %v4136_v6  ;;  %v4144_v14 = vld [vmem:[%s7190_s4 + $0x98] sm:$0xf0]  ;;  %v4118_v15 = vld [vmem:[%s7190_s4 + $0x60] sm:$0xf] }
  0x26   :  { %341 = vmatpush.bf16.msra.mxu2 %v3951_v34  ;;  %370 = vmatpush.bf16.msra.mxu3 %v3955_v36  ;;  %v4822_v16 = vld [vmem:[%s7190_s4 + $0x6c] sm:$0xf0]  ;;  %v4820_v17 = vld [vmem:[%s7190_s4 + $0x64] sm:$0xf]  ;;  %v4120_v18 = vld [vmem:[%s7190_s4 + $0x70] sm:$0xf0]  ;;  %v5670_v20 = vor.u32 %v4827_v12, %v4142_v11  ;;  %v5674_v21 = vor.u32 %v4825_v10, %v4144_v14 }
  0x27   :  { %284 = vmatmul.bf16.vlgmr.msra.gmra.mxu0 %v4772_v35  ;;  %v4773_v19 = vld [vmem:[%s7186_s0 + $0x8] sm:$0xff]  ;;  %v5676_v22 = vor.u32 %v4822_v16, %v4118_v15  ;;  %v4823_v25 = vld [vmem:[%s7190_s4 + $0x74] sm:$0xf0]  ;;  %v5688_v26 = vor.u32 %v4820_v17, %v4120_v18  ;;  %v4128_v27 = vld [vmem:[%s7190_s4 + $0x78] sm:$0xf0]  ;;  %v7197_v18 = vmov 0  }
  0x28   :  { %623 = vmatpush.bf16.msrb.mxu0 %v5532_v37  ;;  %313 = vmatmul.bf16.vlgmr.msra.gmra.mxu1 %v4772_v35  ;;  %v4821_v23 = vld [vmem:[%s7190_s4 + $0x6c] sm:$0xf]  ;;  %v4126_v24 = vld [vmem:[%s7190_s4 + $0x68] sm:$0xf]  ;;  %v4102_v28 = vld [vmem:[%s7190_s4 + $0x40] sm:$0xf] }
  0x29   :  { %636 = vmatpush.bf16.msrb.mxu1 %v5543_v41  ;;  %342 = vmatmul.bf16.vlgmr.msra.gmra.mxu2 %v4772_v35  ;;  %v4818_v29 = vld [vmem:[%s7190_s4 + $0x4c] sm:$0xf0]  ;;  %v4816_v30 = vld [vmem:[%s7190_s4 + $0x44] sm:$0xf]  ;;  %v4104_v31 = vld [vmem:[%s7190_s4 + $0x50] sm:$0xf0]  ;;  %v5706_v32 = vor.u32 %v4823_v25, %v4126_v24  ;;  %v5710_v33 = vor.u32 %v4821_v23, %v4128_v27 }
  0x2a   :  { %371 = vmatmul.bf16.vlgmr.msra.gmra.mxu3 %v4772_v35  ;;  %649 = vmatpush.bf16.msrb.mxu2 %v5560_v47  ;;  %v5712_v34 = vor.u32 %v4818_v29, %v4102_v28  ;;  %v5715_v35 = vor.u32 %v4816_v30, %v4104_v31  ;;  %v4817_v36 = vld [vmem:[%s7190_s4 + $0x4c] sm:$0xf]  ;;  %v4112_v38 = vld [vmem:[%s7190_s4 + $0x58] sm:$0xf0]  ;;  %v4086_v39 = vld [vmem:[%s7190_s4 + $0x20] sm:$0xf] }
  0x2b   :  { %662 = vmatpush.bf16.msrb.mxu3 %v5563_v48  ;;  %v4814_v40 = vld [vmem:[%s7190_s4 + $0x2c] sm:$0xf0]  ;;  %v4812_v42 = vld [vmem:[%s7190_s4 + $0x24] sm:$0xf]  ;;  %v5735_v43 = vor.u32 %v4817_v36, %v4112_v38  ;;  %v4088_v45 = vld [vmem:[%s7190_s4 + $0x30] sm:$0xf0] }
  0x2c   :  { %624 = vmatpush.bf16.msrb.mxu0 %v5565_v49  ;;  %v5737_v44 = vor.u32 %v4814_v40, %v4086_v39  ;;  %v4110_v46 = vld [vmem:[%s7190_s4 + $0x48] sm:$0xf]  ;;  %v4819_v50 = vld [vmem:[%s7190_s4 + $0x54] sm:$0xf0]  ;;  %v5749_v51 = vor.u32 %v4812_v42, %v4088_v45  ;;  %v4813_v54 = vld [vmem:[%s7190_s4 + $0x2c] sm:$0xf] }
  0x2d   :  { %637 = vmatpush.bf16.msrb.mxu1 %v5577_v53  ;;  %v5751_v52 = vor.u32 %v4819_v50, %v4110_v46  ;;  %v4096_v55 = vld [vmem:[%s7190_s4 + $0x38] sm:$0xf0]  ;;  %v4070_v56 = vld [vmem:[%s7190_s4] sm:$0xf]  ;;  %v4810_v57 = vld [vmem:[%s7190_s4 + $0xc] sm:$0xf0] }
  0x2e   :  { %650 = vmatpush.bf16.msrb.mxu2 %v5595_v59  ;;  %v4808_v58 = vld [vmem:[%s7190_s4 + $0x4] sm:$0xf]  ;;  %v4072_v62 = vld [vmem:[%s7190_s4 + $0x10] sm:$0xf0]  ;;  %v4094_v63 = vld [vmem:[%s7190_s4 + $0x28] sm:$0xf]  ;;  %v5780_v2 = vor.u32 %v4813_v54, %v4096_v55  ;;  %v5782_v3 = vor.u32 %v4810_v57, %v4070_v56 }
  0x2f   :  { %663 = vmatpush.bf16.msrb.mxu3 %v5599_v60  ;;  %v4815_v0 = vld [vmem:[%s7190_s4 + $0x34] sm:$0xf0]  ;;  %v4078_v5 = vld [vmem:[%s7190_s4 + $0x8] sm:$0xf]  ;;  %v5793_v10 = vor.u32 %v4808_v58, %v4072_v62  ;;  %v4809_v11 = vld [vmem:[%s7190_s4 + $0xc] sm:$0xf] }
  0x30   :  { %625 = vmatpush.bf16.msrb.mxu0 %v5601_v61  ;;  %v5784_v4 = vor.u32 %v4815_v0, %v4094_v63  ;;  %v4811_v6 = vld [vmem:[%s7190_s4 + $0x14] sm:$0xf0]  ;;  %v4080_v12 = vld [vmem:[%s7190_s4 + $0x18] sm:$0xf0]  ;;  %v4774_v16 = vld [vmem:[%s7186_s0 + $0x10] sm:$0xff] }
  0x31   :  { %638 = vmatpush.bf16.msrb.mxu1 %v5613_v1  ;;  %v5802_v14 = vor.u32 %v4811_v6, %v4078_v5  ;;  %v5806_v15 = vor.u32 %v4809_v11, %v4080_v12  ;;  %v4775_v17 = vld [vmem:[%s7186_s0 + $0x18] sm:$0xff] }
  0x32   :  { %651 = vmatpush.bf16.msrb.mxu2 %v5631_v7 }
  0x33   :  { %664 = vmatpush.bf16.msrb.mxu3 %v5635_v8 }
  0x34   :  { %626 = vmatpush.bf16.msrb.mxu0 %v5637_v9 }
  0x35   :  { %639 = vmatpush.bf16.msrb.mxu1 %v5649_v13 }
  0x36   :  { %652 = vmatpush.bf16.msrb.mxu2 %v5670_v20 }
  0x37   :  { %665 = vmatpush.bf16.msrb.mxu3 %v5674_v21  ;;  %289 = vmatmul.bf16.gmra.mxu0 %v4773_v19 }
  0x38   :  { %627 = vmatpush.bf16.msrb.mxu0 %v5676_v22  ;;  %318 = vmatmul.bf16.gmra.mxu1 %v4773_v19 }
  0x39   :  { %640 = vmatpush.bf16.msrb.mxu1 %v5688_v26  ;;  %347 = vmatmul.bf16.gmra.mxu2 %v4773_v19 }
  0x3a   :  { %376 = vmatmul.bf16.gmra.mxu3 %v4773_v19  ;;  %653 = vmatpush.bf16.msrb.mxu2 %v5706_v32 }
  0x3b   :  { %666 = vmatpush.bf16.msrb.mxu3 %v5710_v33 }
  0x3c   :  { %628 = vmatpush.bf16.msrb.mxu0 %v5712_v34 }
  0x3d   :  { %641 = vmatpush.bf16.msrb.mxu1 %v5715_v35 }
  0x3e   :  { %654 = vmatpush.bf16.msrb.mxu2 %v5751_v52 }
  0x3f   :  { %667 = vmatpush.bf16.msrb.mxu3 %v5735_v43 }
  0x40   :  { %629 = vmatpush.bf16.msrb.mxu0 %v5737_v44 }
  0x41   :  { %642 = vmatpush.bf16.msrb.mxu1 %v5749_v51 }
  0x42   :  { %655 = vmatpush.bf16.msrb.mxu2 %v5784_v4 }
  0x43   :  { %668 = vmatpush.bf16.msrb.mxu3 %v5780_v2 }
  0x44   :  { %630 = vmatpush.bf16.msrb.mxu0 %v5782_v3 }
  0x45   :  { %643 = vmatpush.bf16.msrb.mxu1 %v5793_v10 }
  0x46   :  { %656 = vmatpush.bf16.msrb.mxu2 %v5802_v14 }
  0x47   :  { %669 = vmatpush.bf16.msrb.mxu3 %v5806_v15  ;;  %294 = vmatmul.bf16.gmra.mxu0 %v4774_v16 }
  0x48   :  { %760 = vmatpush.bf16.msra.mxu0 %v5532_v37  ;;  %323 = vmatmul.bf16.gmra.mxu1 %v4774_v16 }
  0x49   :  { %773 = vmatpush.bf16.msra.mxu1 %v5543_v41  ;;  %352 = vmatmul.bf16.gmra.mxu2 %v4774_v16 }
  0x4a   :  { %786 = vmatpush.bf16.msra.mxu2 %v5560_v47  ;;  %381 = vmatmul.bf16.gmra.mxu3 %v4774_v16 }
  0x4b   :  { %799 = vmatpush.bf16.msra.mxu3 %v5563_v48 }
  0x4c   :  { %761 = vmatpush.bf16.msra.mxu0 %v5565_v49 }
  0x4d   :  { %774 = vmatpush.bf16.msra.mxu1 %v5577_v53 }
  0x4e   :  { %787 = vmatpush.bf16.msra.mxu2 %v5595_v59 }
  0x4f   :  { %800 = vmatpush.bf16.msra.mxu3 %v5599_v60 }
  0x50   :  { %762 = vmatpush.bf16.msra.mxu0 %v5601_v61 }
  0x51   :  { %775 = vmatpush.bf16.msra.mxu1 %v5613_v1 }
  0x52   :  { %788 = vmatpush.bf16.msra.mxu2 %v5631_v7 }
  0x53   :  { %801 = vmatpush.bf16.msra.mxu3 %v5635_v8 }
  0x54   :  { %763 = vmatpush.bf16.msra.mxu0 %v5637_v9 }
  0x55   :  { %776 = vmatpush.bf16.msra.mxu1 %v5649_v13 }
  0x56   :  { %789 = vmatpush.bf16.msra.mxu2 %v5670_v20 }
  0x57   :  { %802 = vmatpush.bf16.msra.mxu3 %v5674_v21  ;;  %299 = vmatmul.bf16.gmra.mxu0 %v4775_v17 }
  0x58   :  { %764 = vmatpush.bf16.msra.mxu0 %v5676_v22  ;;  %328 = vmatmul.bf16.gmra.mxu1 %v4775_v17 }
  0x59   :  { %777 = vmatpush.bf16.msra.mxu1 %v5688_v26  ;;  %357 = vmatmul.bf16.gmra.mxu2 %v4775_v17 }
  0x5a   :  { %790 = vmatpush.bf16.msra.mxu2 %v5706_v32  ;;  %386 = vmatmul.bf16.gmra.mxu3 %v4775_v17 }
  0x5b   :  { %803 = vmatpush.bf16.msra.mxu3 %v5710_v33 }
  0x5c   :  { %765 = vmatpush.bf16.msra.mxu0 %v5712_v34 }
  0x5d   :  { %778 = vmatpush.bf16.msra.mxu1 %v5715_v35 }
  0x5e   :  { %791 = vmatpush.bf16.msra.mxu2 %v5751_v52 }
  0x5f   :  { %804 = vmatpush.bf16.msra.mxu3 %v5735_v43 }
  0x60   :  { %766 = vmatpush.bf16.msra.mxu0 %v5737_v44 }
  0x61   :  { %779 = vmatpush.bf16.msra.mxu1 %v5749_v51 }
  0x62   :  { %792 = vmatpush.bf16.msra.mxu2 %v5784_v4 }
  0x63   :  { %805 = vmatpush.bf16.msra.mxu3 %v5780_v2 }
  0x64   :  { %767 = vmatpush.bf16.msra.mxu0 %v5782_v3 }
  0x65   :  { %780 = vmatpush.bf16.msra.mxu1 %v5793_v10 }
  0x66   :  { %793 = vmatpush.bf16.msra.mxu2 %v5802_v14 }
  0x67   :  { %806 = vmatpush.bf16.msra.mxu3 %v5806_v15  ;;  %631 = vmatmul.bf16.vlgmr.msrb.gmra.mxu0 %v7197_v18 }
  0x68   :  { %644 = vmatmul.bf16.vlgmr.msrb.gmra.mxu1 %v7197_v18  ;;  %889 = vmatpush.bf16.msrb.mxu0 %v5532_v37 }
  0x69   :  { %657 = vmatmul.bf16.vlgmr.msrb.gmra.mxu2 %v7197_v18  ;;  %902 = vmatpush.bf16.msrb.mxu1 %v5543_v41 }
  0x6a   :  { %670 = vmatmul.bf16.vlgmr.msrb.gmra.mxu3 %v7197_v18  ;;  %915 = vmatpush.bf16.msrb.mxu2 %v5560_v47 }
  0x6b   :  { %928 = vmatpush.bf16.msrb.mxu3 %v5563_v48 }
  0x6c   :  { %890 = vmatpush.bf16.msrb.mxu0 %v5565_v49 }
  0x6d   :  { %903 = vmatpush.bf16.msrb.mxu1 %v5577_v53 }
  0x6e   :  { %916 = vmatpush.bf16.msrb.mxu2 %v5595_v59 }
  0x6f   :  { %929 = vmatpush.bf16.msrb.mxu3 %v5599_v60 }
  0x70   :  { %891 = vmatpush.bf16.msrb.mxu0 %v5601_v61 }
  0x71   :  { %904 = vmatpush.bf16.msrb.mxu1 %v5613_v1 }
  0x72   :  { %917 = vmatpush.bf16.msrb.mxu2 %v5631_v7 }
  0x73   :  { %930 = vmatpush.bf16.msrb.mxu3 %v5635_v8 }
  0x74   :  { %892 = vmatpush.bf16.msrb.mxu0 %v5637_v9 }
  0x75   :  { %905 = vmatpush.bf16.msrb.mxu1 %v5649_v13 }
  0x76   :  { %918 = vmatpush.bf16.msrb.mxu2 %v5670_v20 }
  0x77   :  { %931 = vmatpush.bf16.msrb.mxu3 %v5674_v21 }
  0x78   :  { %893 = vmatpush.bf16.msrb.mxu0 %v5676_v22 }
  0x79   :  { %906 = vmatpush.bf16.msrb.mxu1 %v5688_v26 }
  0x7a   :  { %919 = vmatpush.bf16.msrb.mxu2 %v5706_v32 }
  0x7b   :  { %932 = vmatpush.bf16.msrb.mxu3 %v5710_v33 }
  0x7c   :  { %894 = vmatpush.bf16.msrb.mxu0 %v5712_v34 }
  0x7d   :  { %907 = vmatpush.bf16.msrb.mxu1 %v5715_v35 }
  0x7e   :  { %920 = vmatpush.bf16.msrb.mxu2 %v5751_v52 }
  0x7f   :  { %933 = vmatpush.bf16.msrb.mxu3 %v5735_v43 }
  0x80   :  { %895 = vmatpush.bf16.msrb.mxu0 %v5737_v44 }
  0x81   :  { %908 = vmatpush.bf16.msrb.mxu1 %v5749_v51 }
  0x82   :  { %921 = vmatpush.bf16.msrb.mxu2 %v5784_v4 }
  0x83   :  { %934 = vmatpush.bf16.msrb.mxu3 %v5780_v2 }
  0x84   :  { %896 = vmatpush.bf16.msrb.mxu0 %v5782_v3 }
  0x85   :  { %909 = vmatpush.bf16.msrb.mxu1 %v5793_v10 }
  0x86   :  { %922 = vmatpush.bf16.msrb.mxu2 %v5802_v14 }
  0x87   :  { %935 = vmatpush.bf16.msrb.mxu3 %v5806_v15 }
  0xa4   :  { %v285_v19 = vpop.f32.mrf.mxu0 }
  0xa5   :  { %v314_v23 = vpop.f32.mrf.mxu1 }
  0xac   :  { %v343_v24 = vpop.f32.mrf.mxu2  ;;  %v5885_v27 = vpop.f32.mrf.mxu0 }
  0xad   :  { %v372_v25 = vpop.f32.mrf.mxu3  ;;  %v5889_v29 = vpop.f32.mrf.mxu1 }
  0xae   :  { %v5887_v28 = vpack.c.bf16 %v372_v25, %v343_v24 }
  0xb4   :  { %v5891_v30 = vpop.f32.mrf.mxu2  ;;  %v290_v36 = vpop.f32.mrf.mxu0 }
  0xb5   :  { %v5893_v31 = vpop.f32.mrf.mxu3  ;;  %v319_v38 = vpop.f32.mrf.mxu1 }
  0xb6   :  { %v5895_v39 = vpack.c.bf16 %v319_v38, %v290_v36 }
  0xb8   :  { %7219 = vst [vmem:[#allocation7_spill] sm:$0xff] %v5895_v39 }
  0xbc   :  { %v348_v40 = vpop.f32.mrf.mxu2  ;;  %v5897_v45 = vpop.f32.mrf.mxu0 }
  0xbd   :  { %v377_v42 = vpop.f32.mrf.mxu3  ;;  %7220 = vst [vmem:[#allocation8_spill] sm:$0xff] %v5897_v45  ;;  %v5901_v50 = vpop.f32.mrf.mxu1 }
  0xbe   :  { %v5899_v46 = vpack.c.bf16 %v377_v42, %v348_v40  ;;  %7222 = vst [vmem:[#allocation10_spill] sm:$0xff] %v5901_v50 }
  0xc0   :  { %7221 = vst [vmem:[#allocation9_spill] sm:$0xff] %v5899_v46 }
  0xc4   :  { %v5903_v54 = vpop.f32.mrf.mxu2  ;;  %v295_v56 = vpop.f32.mrf.mxu0 }
  0xc5   :  { %7223 = vst [vmem:[#allocation11_spill] sm:$0xff] %v5903_v54  ;;  %v5905_v55 = vpop.f32.mrf.mxu3  ;;  %v324_v57 = vpop.f32.mrf.mxu1 }
  0xc6   :  { %7224 = vst [vmem:[#allocation12_spill] sm:$0xff] %v5905_v55  ;;  %v5907_v58 = vpack.c.bf16 %v324_v57, %v295_v56  ;;  %v392_v56 = vpack.c.bf16 %v314_v23, %v285_v19  ;;  %v456_v57 = vld [vmem:[%s7192_s6] sm:$0xf] }
  0xc7   :  { %v5932_v18 = vperm.slane %v456_v57, 0 }
  0xc8   :  { %7225 = vst [vmem:[#allocation13_spill] sm:$0xff] %v5907_v58 }
  0xcc   :  { %v353_v62 = vpop.f32.mrf.mxu2  ;;  %v5909_v0 = vpop.f32.mrf.mxu0 }
  0xcd   :  { %v382_v63 = vpop.f32.mrf.mxu3  ;;  %7226 = vst [vmem:[#allocation14_spill] sm:$0xff] %v5909_v0  ;;  %v5913_v6 = vpop.f32.mrf.mxu1 }
  0xce   :  { %v5911_v5 = vpack.c.bf16 %v382_v63, %v353_v62  ;;  %7228 = vst [vmem:[#allocation16_spill] sm:$0xff] %v5913_v6  ;;  %v459_v63 = vunpack.c.l.bf16 %v392_v56  ;;  %v5941_v6 = vperm.slane %v456_v57, 3 }
  0xd0   :  { %7227 = vst [vmem:[#allocation15_spill] sm:$0xff] %v5911_v5 }
  0xd4   :  { %v5915_v11 = vpop.f32.mrf.mxu2  ;;  %v300_v16 = vpop.f32.mrf.mxu0 }
  0xd5   :  { %7229 = vst [vmem:[#allocation17_spill] sm:$0xff] %v5915_v11  ;;  %v5917_v12 = vpop.f32.mrf.mxu3  ;;  %v329_v17 = vpop.f32.mrf.mxu1  ;;  %v462_v11 = vunpack.c.h.bf16 %v5887_v28 }
  0xd6   :  { %7230 = vst [vmem:[#allocation18_spill] sm:$0xff] %v5917_v12  ;;  %v5919_v24 = vpack.c.bf16 %v329_v17, %v300_v16  ;;  %v5936_v12 = vperm.slane %v456_v57, 1 }
  0xd8   :  { %7231 = vst [vmem:[#allocation19_spill] sm:$0xff] %v5919_v24  ;;  %v460_v24 = vunpack.c.h.bf16 %v392_v56 }
  0xdc   :  { %v358_v25 = vpop.f32.mrf.mxu2  ;;  %v5921_v38 = vpop.f32.mrf.mxu0 }
  0xdd   :  { %v387_v36 = vpop.f32.mrf.mxu3  ;;  %7232 = vst [vmem:[#allocation20_spill] sm:$0xff] %v5921_v38  ;;  %v5925_v42 = vpop.f32.mrf.mxu1 }
  0xde   :  { %v5923_v40 = vpack.c.bf16 %v387_v36, %v358_v25  ;;  %7234 = vst [vmem:[#allocation22_spill] sm:$0xff] %v5925_v42 }
  0xe0   :  { %7233 = vst [vmem:[#allocation21_spill] sm:$0xff] %v5923_v40 }
  0xe4   :  { %v5930_v62 = vpop.f32.mrf.mxu2  ;;  %v632_v17 = vpop.f32.mrf.mxu0 }
  0xe5   :  { %7235 = vst [vmem:[#allocation23_spill] sm:$0xff] %v5930_v62  ;;  %v5934_v16 = vpop.f32.mrf.mxu3  ;;  %v633_v25 = vadd.f32 %v632_v17, %v459_v63  ;;  %v645_v36 = vpop.f32.mrf.mxu1 }
  0xe6   :  { %7236 = vst [vmem:[#allocation24_spill] sm:$0xff] %v5934_v16  ;;  %v646_v38 = vadd.f32 %v645_v36, %v460_v24 }
  0xe7   :  { %v684_v19 = vadd.f32 %v5932_v18, %v633_v25 }
  0xe8   :  { %v685_v23 = vadd.f32 %v5936_v12, %v646_v38 }
  0xe9   :  { %v4196_v42 = vmul.f32 -1.442695, %v684_v19 }
  0xea   :  { %v4197_v40 = vmul.f32 -1.442695, %v685_v23 }
  0xeb   :  { %4977 = vpow2.f32 %v4196_v42  ;;  %v461_v42 = vunpack.c.l.bf16 %v5887_v28 }
  0xec   :  { %v658_v62 = vpop.f32.mrf.mxu2  ;;  %4979 = vpow2.f32 %v4197_v40  ;;  %v634_v56 = vpop.f32.mrf.mxu0  ;;  %v5945_v40 = vperm.slane %v456_v57, 2 }
  0xed   :  { %v671_v16 = vpop.f32.mrf.mxu3  ;;  %v647_v5 = vpop.f32.mrf.mxu1  ;;  %v659_v58 = vadd.f32 %v658_v62, %v461_v42 }
  0xee   :  { %v672_v0 = vadd.f32 %v671_v16, %v462_v11  ;;  %7237 = vst [vmem:[#allocation25_spill] sm:$0xff] %v5945_v40 }
  0xef   :  { %v686_v5 = vadd.f32 %v5945_v40, %v659_v58 }
  0xf0   :  { %v687_v63 = vadd.f32 %v5941_v6, %v672_v0 }
  0xf1   :  { %v4978_v24 = vpop.eup %4977 }
  0xf2   :  { %v4198_v17 = vmul.f32 -1.442695, %v687_v63  ;;  %v4980_v25 = vpop.eup %4979  ;;  %v691_v36 = vadd.f32 1.0, %v4978_v24 }
  0xf3   :  { %v710_v38 = vadd.f32 1.0, %v4980_v25 }
  0xf4   :  { %4981 = vpow2.f32 %v4198_v17  ;;  %v660_v19 = vpop.f32.mrf.mxu2  ;;  %v703_v25 = vand.u32 2147483648, %v691_v36  ;;  %vm697_vm2 = vweird.f32 %v691_v36 }
  0xf5   :  { %4983 = vrcp.f32 %v691_v36  ;;  %v673_v23 = vpop.f32.mrf.mxu3  ;;  %v722_v19 = vand.u32 2147483648, %v710_v38  ;;  %v720_v57 = vand.u32 2147483647, %v710_v38  ;;  %vm716_vm3 = vweird.f32 %v710_v38 }
  0xf6   :  { %4985 = vrcp.f32 %v710_v38  ;;  %v701_v23 = vand.u32 2147483647, %v691_v36  ;;  %v704_v58 = vor.u32 1.1754944e-38, %v703_v25 }
  0xf7   :  { %v723_v50 = vor.u32 1.1754944e-38, %v722_v19  ;;  %vm721_vm7 = vcmp.eq.f32.partialorder %v720_v57, 8.507059e+37 }
  0xf8   :  { %vm702_vm5 = vcmp.eq.f32.partialorder %v701_v23, 8.507059e+37 }
  0xfa   :  { %v4982_v56 = vpop.eup %4981 }
  0xfb   :  { %v4984_v11 = vpop.eup %4983  ;;  %v730_v0 = vadd.f32 1.0, %v4982_v56 }
  0xfc   :  { %v4986_v16 = vpop.eup %4985  ;;  %v693_v63 = vmul.f32 %v4984_v11, %v691_v36  ;;  %vm698_vm0 = vweird.f32 %v4984_v11 }
  0xfd   :  { %v712_v55 = vmul.f32 %v4986_v16, %v710_v38  ;;  %4987 = vrcp.f32 %v730_v0  ;;  %vm717_vm1 = vweird.f32 %v4986_v16  ;;  %vm699_vm4 = vmor %vm697_vm2, %vm698_vm0  ;;  %v742_v25 = vand.u32 2147483648, %v730_v0 }
  0xfe   :  { %v694_v24 = vsub.f32 1.0, %v693_v63  ;;  %4989 = vtanh.f32 %v686_v5  ;;  %vm718_vm6 = vmor %vm716_vm3, %vm717_vm1  ;;  %vm736_vm9 = vweird.f32 %v730_v0 }
  0xff   :  { %v713_v17 = vsub.f32 1.0, %v712_v55  ;;  %v743_v23 = vor.u32 1.1754944e-38, %v742_v25 }
 0x100   :  { %v695_v28 = vmul.f32 %v4984_v11, %v694_v24 }
 0x101   :  { %v714_v62 = vmul.f32 %v4986_v16, %v713_v17 }
 0x102   :  { %v696_v42 = vadd.f32 %v4984_v11, %v695_v28 }
 0x103   :  { %v4988_v54 = vpop.eup %4987  ;;  %v715_v56 = vadd.f32 %v4986_v16, %v714_v62 }
 0x104   :  { %v700_v45 = vsel %vm699_vm4, %v4984_v11, %v696_v42  ;;  %v732_v55 = vmul.f32 %v4988_v54, %v730_v0  ;;  %v4990_v5 = vpop.eup %4989  ;;  %vm737_vm8 = vweird.f32 %v4988_v54  ;;  %v740_v11 = vand.u32 2147483647, %v730_v0 }
 0x105   :  { %v705_v63 = vsel %vm702_vm5, %v704_v58, %v700_v45  ;;  %v719_v24 = vsel %vm718_vm6, %v4986_v16, %v715_v56  ;;  %vm738_vm10 = vmor %vm736_vm9, %vm737_vm8  ;;  %v395_v58 = vpack.c.bf16 %v5893_v31, %v5891_v30 }
 0x106   :  { %v724_v46 = vsel %vm721_vm7, %v723_v50, %v719_v24  ;;  %v747_v17 = vmul.f32 %v4990_v5, %v705_v63  ;;  %v733_v39 = vsub.f32 1.0, %v732_v55  ;;  %vm741_vm11 = vcmp.eq.f32.partialorder %v740_v11, 8.507059e+37 }
 0x107   :  { %v746_v40 = vmul.f32 0.0, %v724_v46  ;;  %v759_v24 = vunpack.c.h.bf16 %v395_v58 }
 0x108   :  { %v734_v28 = vmul.f32 %v4988_v54, %v733_v39  ;;  %v394_v39 = vpack.c.bf16 %v5889_v29, %v5885_v27 }
 0x109   :  { %v5948_v36 = vadd.f32 %v747_v17, %v746_v40 }
 0x10a   :  { %v735_v38 = vadd.f32 %v4988_v54, %v734_v28  ;;  %v756_v46 = vunpack.c.l.bf16 %v394_v39 }
 0x10b   :  { %4991 = vtanh.f32 %v5948_v36 }
 0x10c   :  { %v739_v19 = vsel %vm738_vm10, %v4988_v54, %v735_v38  ;;  %v757_v54 = vunpack.c.h.bf16 %v394_v39 }
 0x10d   :  { %v744_v16 = vsel %vm741_vm11, %v743_v23, %v739_v19 }
 0x111   :  { %v4992_v45 = vpop.eup %4991 }
 0x112   :  { %v750_v50 = vmul.f32 %v4992_v45, %v744_v16 }
 0x114   :  { %v751_v62 = vpack.c.bf16 %v750_v50, %v750_v50  ;;  %v758_v50 = vunpack.c.l.bf16 %v395_v58 }
 0x116   :  { %752 = vst [vmem:[#allocation3] sm:$0xf] %v751_v62  ;;  %768 = vmatmul.bf16.vlgmr.msra.gmra.mxu0 %v751_v62  ;;  %781 = vmatmul.bf16.vlgmr.msra.gmra.mxu1 %v751_v62 }
 0x117   :  { %794 = vmatmul.bf16.vlgmr.msra.gmra.mxu2 %v751_v62  ;;  %807 = vmatmul.bf16.vlgmr.msra.gmra.mxu3 %v751_v62 }
 0x118   :  { %1018 = vmatpush.bf16.msra.mxu0 %v5532_v37  ;;  %1031 = vmatpush.bf16.msra.mxu1 %v5543_v41 }
 0x119   :  { %1044 = vmatpush.bf16.msra.mxu2 %v5560_v47  ;;  %1057 = vmatpush.bf16.msra.mxu3 %v5563_v48 }
 0x11c   :  { %1019 = vmatpush.bf16.msra.mxu0 %v5565_v49  ;;  %1032 = vmatpush.bf16.msra.mxu1 %v5577_v53 }
 0x11d   :  { %1045 = vmatpush.bf16.msra.mxu2 %v5595_v59  ;;  %1058 = vmatpush.bf16.msra.mxu3 %v5599_v60 }
 0x120   :  { %1020 = vmatpush.bf16.msra.mxu0 %v5601_v61  ;;  %1033 = vmatpush.bf16.msra.mxu1 %v5613_v1 }
 0x121   :  { %1046 = vmatpush.bf16.msra.mxu2 %v5631_v7  ;;  %1059 = vmatpush.bf16.msra.mxu3 %v5635_v8 }
 0x124   :  { %1021 = vmatpush.bf16.msra.mxu0 %v5637_v9  ;;  %1034 = vmatpush.bf16.msra.mxu1 %v5649_v13 }
 0x125   :  { %1047 = vmatpush.bf16.msra.mxu2 %v5670_v20  ;;  %1060 = vmatpush.bf16.msra.mxu3 %v5674_v21 }
 0x128   :  { %1022 = vmatpush.bf16.msra.mxu0 %v5676_v22  ;;  %1035 = vmatpush.bf16.msra.mxu1 %v5688_v26 }
 0x129   :  { %1048 = vmatpush.bf16.msra.mxu2 %v5706_v32  ;;  %1061 = vmatpush.bf16.msra.mxu3 %v5710_v33 }
 0x12c   :  { %1023 = vmatpush.bf16.msra.mxu0 %v5712_v34  ;;  %1036 = vmatpush.bf16.msra.mxu1 %v5715_v35 }
 0x12d   :  { %1049 = vmatpush.bf16.msra.mxu2 %v5751_v52  ;;  %1062 = vmatpush.bf16.msra.mxu3 %v5735_v43 }
 0x130   :  { %1024 = vmatpush.bf16.msra.mxu0 %v5737_v44  ;;  %1037 = vmatpush.bf16.msra.mxu1 %v5749_v51 }
 0x131   :  { %1050 = vmatpush.bf16.msra.mxu2 %v5784_v4  ;;  %1063 = vmatpush.bf16.msra.mxu3 %v5780_v2 }
 0x134   :  { %1025 = vmatpush.bf16.msra.mxu0 %v5782_v3  ;;  %1038 = vmatpush.bf16.msra.mxu1 %v5793_v10 }
 0x135   :  { %1051 = vmatpush.bf16.msra.mxu2 %v5802_v14  ;;  %1064 = vmatpush.bf16.msra.mxu3 %v5806_v15 }
 0x193   :  { %v769_v40 = vpop.f32.mrf.mxu0  ;;  %v782_v0 = vpop.f32.mrf.mxu1 }
 0x194   :  { %v770_v57 = vadd.f32 %v769_v40, %v756_v46  ;;  %v783_v42 = vadd.f32 %v782_v0, %v757_v54  ;;  %v7238_v40 = vld [vmem:[#allocation25_spill] sm:$0xff] }
 0x196   :  { %v812_v56 = vadd.f32 %v770_v57, %v5932_v18  ;;  %v813_v55 = vadd.f32 %v783_v42, %v5936_v12 }
 0x198   :  { %v4199_v5 = vmul.f32 -1.442695, %v812_v56  ;;  %v4200_v63 = vmul.f32 -1.442695, %v813_v55 }
 0x19a   :  { %4993 = vpow2.f32 %v4199_v5  ;;  %v795_v17 = vpop.f32.mrf.mxu2  ;;  %v808_v28 = vpop.f32.mrf.mxu3 }
 0x19b   :  { %4995 = vpow2.f32 %v4200_v63  ;;  %v809_v27 = vadd.f32 %v808_v28, %v759_v24  ;;  %v771_v29 = vpop.f32.mrf.mxu0  ;;  %v784_v38 = vpop.f32.mrf.mxu1  ;;  %v796_v62 = vadd.f32 %v795_v17, %v758_v50 }
 0x19d   :  { %v815_v25 = vadd.f32 %v809_v27, %v5941_v6  ;;  %v814_v0 = vadd.f32 %v796_v62, %v7238_v40 }
 0x19f   :  { %v4201_v11 = vmul.f32 -1.442695, %v815_v25 }
 0x1a0   :  { %v4994_v19 = vpop.eup %4993 }
 0x1a1   :  { %v4996_v23 = vpop.eup %4995  ;;  %v819_v30 = vadd.f32 1.0, %v4994_v19  ;;  %4997 = vpow2.f32 %v4201_v11 }
 0x1a2   :  { %v838_v31 = vadd.f32 1.0, %v4996_v23  ;;  %v797_v45 = vpop.f32.mrf.mxu2  ;;  %v810_v16 = vpop.f32.mrf.mxu3 }
 0x1a3   :  { %4999 = vrcp.f32 %v819_v30  ;;  %v831_v63 = vand.u32 2147483648, %v819_v30  ;;  %v829_v27 = vand.u32 2147483647, %v819_v30  ;;  %vm825_vm14 = vweird.f32 %v819_v30 }
 0x1a4   :  { %5001 = vrcp.f32 %v838_v31  ;;  %v850_v24 = vand.u32 2147483648, %v838_v31  ;;  %v848_v17 = vand.u32 2147483647, %v838_v31  ;;  %vm844_vm15 = vweird.f32 %v838_v31 }
 0x1a5   :  { %v832_v25 = vor.u32 1.1754944e-38, %v831_v63  ;;  %vm830_vm2 = vcmp.eq.f32.partialorder %v829_v27, 8.507059e+37 }
 0x1a6   :  { %v851_v23 = vor.u32 1.1754944e-38, %v850_v24  ;;  %vm849_vm3 = vcmp.eq.f32.partialorder %v848_v17, 8.507059e+37 }
 0x1a7   :  { %v4998_v39 = vpop.eup %4997 }
 0x1a8   :  { %v858_v46 = vadd.f32 1.0, %v4998_v39 }
 0x1a9   :  { %v5000_v54 = vpop.eup %4999 }
 0x1aa   :  { %v5002_v57 = vpop.eup %5001  ;;  %v821_v42 = vmul.f32 %v5000_v54, %v819_v30  ;;  %5003 = vrcp.f32 %v858_v46  ;;  %vm826_vm12 = vweird.f32 %v5000_v54  ;;  %vm864_vm5 = vweird.f32 %v858_v46 }
 0x1ab   :  { %v840_v56 = vmul.f32 %v5002_v57, %v838_v31  ;;  %5005 = vtanh.f32 %v814_v0  ;;  %vm845_vm13 = vweird.f32 %v5002_v57  ;;  %vm827_vm0 = vmor %vm825_vm14, %vm826_vm12 }
 0x1ac   :  { %v822_v55 = vsub.f32 1.0, %v821_v42  ;;  %vm846_vm1 = vmor %vm844_vm15, %vm845_vm13 }
 0x1ad   :  { %v841_v5 = vsub.f32 1.0, %v840_v56 }
 0x1ae   :  { %v823_v28 = vmul.f32 %v5000_v54, %v822_v55 }
 0x1af   :  { %v842_v58 = vmul.f32 %v5002_v57, %v841_v5  ;;  %v870_v5 = vand.u32 2147483648, %v858_v46 }
 0x1b0   :  { %v5004_v29 = vpop.eup %5003  ;;  %v824_v38 = vadd.f32 %v5000_v54, %v823_v28 }
 0x1b1   :  { %v843_v11 = vadd.f32 %v5002_v57, %v842_v58  ;;  %v860_v19 = vmul.f32 %v5004_v29, %v858_v46  ;;  %v5006_v16 = vpop.eup %5005  ;;  %vm865_vm4 = vweird.f32 %v5004_v29  ;;  %v871_v24 = vor.u32 1.1754944e-38, %v870_v5 }
 0x1b2   :  { %v828_v45 = vsel %vm827_vm0, %v5000_v54, %v824_v38  ;;  %v868_v54 = vand.u32 2147483647, %v858_v46  ;;  %vm866_vm6 = vmor %vm864_vm5, %vm865_vm4 }
 0x1b3   :  { %v833_v50 = vsel %vm830_vm2, %v832_v25, %v828_v45  ;;  %v847_v62 = vsel %vm846_vm1, %v5002_v57, %v843_v11  ;;  %v861_v39 = vsub.f32 1.0, %v860_v19 }
 0x1b4   :  { %v852_v0 = vsel %vm849_vm3, %v851_v23, %v847_v62  ;;  %v875_v42 = vmul.f32 %v5006_v16, %v833_v50  ;;  %vm869_vm7 = vcmp.eq.f32.partialorder %v868_v54, 8.507059e+37  ;;  %v7240_v50 = vld [vmem:[#allocation9_spill] sm:$0xff] }
 0x1b5   :  { %v874_v56 = vmul.f32 %v852_v0, %v5948_v36  ;;  %v862_v55 = vmul.f32 %v5004_v29, %v861_v39  ;;  %v7239_v36 = vld [vmem:[#allocation7_spill] sm:$0xff]  ;;  %v888_v62 = vunpack.c.h.bf16 %v7240_v50 }
 0x1b6   :  { %v885_v46 = vunpack.c.l.bf16 %v7239_v36  ;;  %v886_v17 = vunpack.c.h.bf16 %v7239_v36 }
 0x1b7   :  { %v5992_v30 = vadd.f32 %v875_v42, %v874_v56  ;;  %v863_v31 = vadd.f32 %v5004_v29, %v862_v55 }
 0x1b9   :  { %5007 = vtanh.f32 %v5992_v30  ;;  %v867_v63 = vsel %vm866_vm6, %v5004_v29, %v863_v31 }
 0x1ba   :  { %v872_v28 = vsel %vm869_vm7, %v871_v24, %v867_v63 }
 0x1bf   :  { %v5008_v57 = vpop.eup %5007 }
 0x1c0   :  { %v878_v27 = vmul.f32 %v5008_v57, %v872_v28 }
 0x1c2   :  { %v879_v58 = vpack.c.bf16 %v878_v27, %v878_v27 }
 0x1c4   :  { %881 = vst [vmem:[#allocation3 + $0x4] sm:$0xf] %v879_v58  ;;  %897 = vmatmul.bf16.vlgmr.msrb.gmra.mxu0 %v879_v58  ;;  %910 = vmatmul.bf16.vlgmr.msrb.gmra.mxu1 %v879_v58 }
 0x1c5   :  { %923 = vmatmul.bf16.vlgmr.msrb.gmra.mxu2 %v879_v58  ;;  %936 = vmatmul.bf16.vlgmr.msrb.gmra.mxu3 %v879_v58  ;;  %v887_v58 = vunpack.c.l.bf16 %v7240_v50 }
 0x1c6   :  { %1147 = vmatpush.bf16.msrb.mxu0 %v5532_v37  ;;  %1160 = vmatpush.bf16.msrb.mxu1 %v5543_v41 }
 0x1c7   :  { %1173 = vmatpush.bf16.msrb.mxu2 %v5560_v47  ;;  %1186 = vmatpush.bf16.msrb.mxu3 %v5563_v48 }
 0x1ca   :  { %1148 = vmatpush.bf16.msrb.mxu0 %v5565_v49  ;;  %1161 = vmatpush.bf16.msrb.mxu1 %v5577_v53 }
 0x1cb   :  { %1174 = vmatpush.bf16.msrb.mxu2 %v5595_v59  ;;  %1187 = vmatpush.bf16.msrb.mxu3 %v5599_v60 }
 0x1ce   :  { %1149 = vmatpush.bf16.msrb.mxu0 %v5601_v61  ;;  %1162 = vmatpush.bf16.msrb.mxu1 %v5613_v1 }
 0x1cf   :  { %1175 = vmatpush.bf16.msrb.mxu2 %v5631_v7  ;;  %1188 = vmatpush.bf16.msrb.mxu3 %v5635_v8 }
 0x1d2   :  { %1150 = vmatpush.bf16.msrb.mxu0 %v5637_v9  ;;  %1163 = vmatpush.bf16.msrb.mxu1 %v5649_v13 }
 0x1d3   :  { %1176 = vmatpush.bf16.msrb.mxu2 %v5670_v20  ;;  %1189 = vmatpush.bf16.msrb.mxu3 %v5674_v21 }
 0x1d6   :  { %1151 = vmatpush.bf16.msrb.mxu0 %v5676_v22  ;;  %1164 = vmatpush.bf16.msrb.mxu1 %v5688_v26 }
 0x1d7   :  { %1177 = vmatpush.bf16.msrb.mxu2 %v5706_v32  ;;  %1190 = vmatpush.bf16.msrb.mxu3 %v5710_v33 }
 0x1da   :  { %1152 = vmatpush.bf16.msrb.mxu0 %v5712_v34  ;;  %1165 = vmatpush.bf16.msrb.mxu1 %v5715_v35 }
 0x1db   :  { %1178 = vmatpush.bf16.msrb.mxu2 %v5751_v52  ;;  %1191 = vmatpush.bf16.msrb.mxu3 %v5735_v43 }
 0x1de   :  { %1153 = vmatpush.bf16.msrb.mxu0 %v5737_v44  ;;  %1166 = vmatpush.bf16.msrb.mxu1 %v5749_v51 }
 0x1df   :  { %1179 = vmatpush.bf16.msrb.mxu2 %v5784_v4  ;;  %1192 = vmatpush.bf16.msrb.mxu3 %v5780_v2 }
 0x1e2   :  { %1154 = vmatpush.bf16.msrb.mxu0 %v5782_v3  ;;  %1167 = vmatpush.bf16.msrb.mxu1 %v5793_v10 }
 0x1e3   :  { %1180 = vmatpush.bf16.msrb.mxu2 %v5802_v14  ;;  %1193 = vmatpush.bf16.msrb.mxu3 %v5806_v15 }
 0x241   :  { %v898_v29 = vpop.f32.mrf.mxu0  ;;  %v911_v38 = vpop.f32.mrf.mxu1 }
 0x242   :  { %v899_v25 = vadd.f32 %v898_v29, %v885_v46  ;;  %v912_v11 = vadd.f32 %v911_v38, %v886_v17 }
 0x244   :  { %v941_v19 = vadd.f32 %v899_v25, %v5932_v18  ;;  %v942_v23 = vadd.f32 %v912_v11, %v5936_v12 }
 0x246   :  { %v4202_v45 = vmul.f32 -1.442695, %v941_v19  ;;  %v4203_v16 = vmul.f32 -1.442695, %v942_v23 }
 0x248   :  { %5009 = vpow2.f32 %v4202_v45  ;;  %v924_v39 = vpop.f32.mrf.mxu2  ;;  %v937_v0 = vpop.f32.mrf.mxu3 }
 0x249   :  { %5011 = vpow2.f32 %v4203_v16  ;;  %v938_v42 = vadd.f32 %v937_v0, %v888_v62  ;;  %v900_v56 = vpop.f32.mrf.mxu0  ;;  %v913_v55 = vpop.f32.mrf.mxu1  ;;  %v925_v36 = vadd.f32 %v924_v39, %v887_v58 }
 0x24b   :  { %v944_v31 = vadd.f32 %v938_v42, %v5941_v6  ;;  %v943_v38 = vadd.f32 %v925_v36, %v7238_v40 }
 0x24d   :  { %v4204_v5 = vmul.f32 -1.442695, %v944_v31 }
 0x24e   :  { %v5010_v54 = vpop.eup %5009 }
 0x24f   :  { %v5012_v63 = vpop.eup %5011  ;;  %v948_v24 = vadd.f32 1.0, %v5010_v54  ;;  %5013 = vpow2.f32 %v4204_v5 }
 0x250   :  { %v967_v57 = vadd.f32 1.0, %v5012_v63  ;;  %v926_v28 = vpop.f32.mrf.mxu2  ;;  %v939_v27 = vpop.f32.mrf.mxu3 }
 0x251   :  { %5015 = vrcp.f32 %v948_v24  ;;  %v960_v16 = vand.u32 2147483648, %v948_v24  ;;  %v958_v42 = vand.u32 2147483647, %v948_v24  ;;  %vm954_vm10 = vweird.f32 %v948_v24 }
 0x252   :  { %5017 = vrcp.f32 %v967_v57  ;;  %v979_v62 = vand.u32 2147483648, %v967_v57  ;;  %v977_v39 = vand.u32 2147483647, %v967_v57  ;;  %vm973_vm11 = vweird.f32 %v967_v57 }
 0x253   :  { %v961_v31 = vor.u32 1.1754944e-38, %v960_v16  ;;  %vm959_vm14 = vcmp.eq.f32.partialorder %v958_v42, 8.507059e+37 }
 0x254   :  { %v980_v63 = vor.u32 1.1754944e-38, %v979_v62  ;;  %vm978_vm15 = vcmp.eq.f32.partialorder %v977_v39, 8.507059e+37 }
 0x255   :  { %v5014_v46 = vpop.eup %5013 }
 0x256   :  { %v987_v17 = vadd.f32 1.0, %v5014_v46 }
 0x257   :  { %v5016_v29 = vpop.eup %5015 }
 0x258   :  { %v5018_v25 = vpop.eup %5017  ;;  %v950_v11 = vmul.f32 %v5016_v29, %v948_v24  ;;  %5019 = vrcp.f32 %v987_v17  ;;  %vm955_vm8 = vweird.f32 %v5016_v29  ;;  %vm993_vm1 = vweird.f32 %v987_v17 }
 0x259   :  { %v969_v19 = vmul.f32 %v5018_v25, %v967_v57  ;;  %5021 = vtanh.f32 %v943_v38  ;;  %vm974_vm9 = vweird.f32 %v5018_v25  ;;  %vm956_vm12 = vmor %vm954_vm10, %vm955_vm8 }
 0x25a   :  { %v951_v23 = vsub.f32 1.0, %v950_v11  ;;  %vm975_vm13 = vmor %vm973_vm11, %vm974_vm9 }
 0x25b   :  { %v970_v45 = vsub.f32 1.0, %v969_v19 }
 0x25c   :  { %v952_v0 = vmul.f32 %v5016_v29, %v951_v23 }
 0x25d   :  { %v971_v50 = vmul.f32 %v5018_v25, %v970_v45  ;;  %v999_v45 = vand.u32 2147483648, %v987_v17 }
 0x25e   :  { %v5020_v56 = vpop.eup %5019  ;;  %v953_v55 = vadd.f32 %v5016_v29, %v952_v0 }
 0x25f   :  { %v972_v5 = vadd.f32 %v5018_v25, %v971_v50  ;;  %v989_v54 = vmul.f32 %v5020_v56, %v987_v17  ;;  %v5022_v27 = vpop.eup %5021  ;;  %vm994_vm0 = vweird.f32 %v5020_v56  ;;  %v1000_v62 = vor.u32 1.1754944e-38, %v999_v45 }
 0x260   :  { %v957_v28 = vsel %vm956_vm12, %v5016_v29, %v953_v55  ;;  %v997_v29 = vand.u32 2147483647, %v987_v17  ;;  %vm995_vm2 = vmor %vm993_vm1, %vm994_vm0  ;;  %v7242_v17 = vld [vmem:[#allocation10_spill] sm:$0xff] }
 0x261   :  { %v962_v58 = vsel %vm959_vm14, %v961_v31, %v957_v28  ;;  %v976_v36 = vsel %vm975_vm13, %v5018_v25, %v972_v5  ;;  %v990_v46 = vsub.f32 1.0, %v989_v54  ;;  %v7243_v28 = vld [vmem:[#allocation11_spill] sm:$0xff] }
 0x262   :  { %v981_v38 = vsel %vm978_vm15, %v980_v63, %v976_v36  ;;  %v1004_v11 = vmul.f32 %v5022_v27, %v962_v58  ;;  %vm998_vm3 = vcmp.eq.f32.partialorder %v997_v29, 8.507059e+37  ;;  %v7244_v27 = vld [vmem:[#allocation12_spill] sm:$0xff] }
 0x263   :  { %v1003_v19 = vmul.f32 %v981_v38, %v5992_v30  ;;  %v991_v23 = vmul.f32 %v5020_v56, %v990_v46  ;;  %v7241_v30 = vld [vmem:[#allocation8_spill] sm:$0xff]  ;;  %v399_v58 = vpack.c.bf16 %v7244_v27, %v7243_v28 }
 0x264   :  { %v398_v39 = vpack.c.bf16 %v7242_v17, %v7241_v30 }
 0x265   :  { %v6036_v24 = vadd.f32 %v1004_v11, %v1003_v19  ;;  %v992_v57 = vadd.f32 %v5020_v56, %v991_v23  ;;  %v1017_v19 = vunpack.c.h.bf16 %v399_v58 }
 0x266   :  { %v1015_v55 = vunpack.c.h.bf16 %v398_v39 }
 0x267   :  { %5023 = vtanh.f32 %v6036_v24  ;;  %v996_v16 = vsel %vm995_vm2, %v5020_v56, %v992_v57  ;;  %v1014_v56 = vunpack.c.l.bf16 %v398_v39 }
 0x268   :  { %v1001_v0 = vsel %vm998_vm3, %v1000_v62, %v996_v16 }
 0x26d   :  { %v5024_v25 = vpop.eup %5023 }
 0x26e   :  { %v1007_v42 = vmul.f32 %v5024_v25, %v1001_v0 }
 0x270   :  { %v1008_v50 = vpack.c.bf16 %v1007_v42, %v1007_v42 }
 0x272   :  { %1010 = vst [vmem:[#allocation3 + $0x8] sm:$0xf] %v1008_v50  ;;  %1026 = vmatmul.bf16.vlgmr.msra.gmra.mxu0 %v1008_v50  ;;  %1039 = vmatmul.bf16.vlgmr.msra.gmra.mxu1 %v1008_v50 }
 0x273   :  { %1052 = vmatmul.bf16.vlgmr.msra.gmra.mxu2 %v1008_v50  ;;  %1065 = vmatmul.bf16.vlgmr.msra.gmra.mxu3 %v1008_v50 }
 0x274   :  { %1276 = vmatpush.bf16.msra.mxu0 %v5532_v37  ;;  %1289 = vmatpush.bf16.msra.mxu1 %v5543_v41 }
 0x275   :  { %1302 = vmatpush.bf16.msra.mxu2 %v5560_v47  ;;  %1315 = vmatpush.bf16.msra.mxu3 %v5563_v48 }
 0x278   :  { %1277 = vmatpush.bf16.msra.mxu0 %v5565_v49  ;;  %1290 = vmatpush.bf16.msra.mxu1 %v5577_v53 }
 0x279   :  { %1303 = vmatpush.bf16.msra.mxu2 %v5595_v59  ;;  %1316 = vmatpush.bf16.msra.mxu3 %v5599_v60 }
 0x27c   :  { %1278 = vmatpush.bf16.msra.mxu0 %v5601_v61  ;;  %1291 = vmatpush.bf16.msra.mxu1 %v5613_v1 }
 0x27d   :  { %1304 = vmatpush.bf16.msra.mxu2 %v5631_v7  ;;  %1317 = vmatpush.bf16.msra.mxu3 %v5635_v8 }
 0x280   :  { %1279 = vmatpush.bf16.msra.mxu0 %v5637_v9  ;;  %1292 = vmatpush.bf16.msra.mxu1 %v5649_v13 }
 0x281   :  { %1305 = vmatpush.bf16.msra.mxu2 %v5670_v20  ;;  %1318 = vmatpush.bf16.msra.mxu3 %v5674_v21 }
 0x284   :  { %1280 = vmatpush.bf16.msra.mxu0 %v5676_v22  ;;  %1293 = vmatpush.bf16.msra.mxu1 %v5688_v26 }
 0x285   :  { %1306 = vmatpush.bf16.msra.mxu2 %v5706_v32  ;;  %1319 = vmatpush.bf16.msra.mxu3 %v5710_v33 }
 0x288   :  { %1281 = vmatpush.bf16.msra.mxu0 %v5712_v34  ;;  %1294 = vmatpush.bf16.msra.mxu1 %v5715_v35 }
 0x289   :  { %1307 = vmatpush.bf16.msra.mxu2 %v5751_v52  ;;  %1320 = vmatpush.bf16.msra.mxu3 %v5735_v43 }
 0x28c   :  { %1282 = vmatpush.bf16.msra.mxu0 %v5737_v44  ;;  %1295 = vmatpush.bf16.msra.mxu1 %v5749_v51 }
 0x28d   :  { %1308 = vmatpush.bf16.msra.mxu2 %v5784_v4  ;;  %1321 = vmatpush.bf16.msra.mxu3 %v5780_v2 }
 0x290   :  { %1283 = vmatpush.bf16.msra.mxu0 %v5782_v3  ;;  %1296 = vmatpush.bf16.msra.mxu1 %v5793_v10 }
 0x291   :  { %1309 = vmatpush.bf16.msra.mxu2 %v5802_v14  ;;  %1322 = vmatpush.bf16.msra.mxu3 %v5806_v15 }
 0x2ef   :  { %v1027_v31 = vpop.f32.mrf.mxu0  ;;  %v1040_v5 = vpop.f32.mrf.mxu1 }
 0x2f0   :  { %v1028_v54 = vadd.f32 %v1027_v31, %v1014_v56  ;;  %v1041_v63 = vadd.f32 %v1040_v5, %v1015_v55  ;;  %v1016_v56 = vunpack.c.l.bf16 %v399_v58 }
 0x2f2   :  { %v1070_v36 = vadd.f32 %v1028_v54, %v5932_v18  ;;  %v1071_v46 = vadd.f32 %v1041_v63, %v5936_v12 }
 0x2f4   :  { %v4205_v38 = vmul.f32 -1.442695, %v1070_v36  ;;  %v4206_v11 = vmul.f32 -1.442695, %v1071_v46 }
 0x2f6   :  { %5025 = vpow2.f32 %v4205_v38  ;;  %v1053_v23 = vpop.f32.mrf.mxu2  ;;  %v1066_v57 = vpop.f32.mrf.mxu3 }
 0x2f7   :  { %5027 = vpow2.f32 %v4206_v11  ;;  %v1067_v45 = vadd.f32 %v1066_v57, %v1017_v19  ;;  %v1029_v29 = vpop.f32.mrf.mxu0  ;;  %v1042_v16 = vpop.f32.mrf.mxu1  ;;  %v1054_v55 = vadd.f32 %v1053_v23, %v1016_v56 }
 0x2f9   :  { %v1073_v62 = vadd.f32 %v1067_v45, %v5941_v6  ;;  %v1072_v63 = vadd.f32 %v1054_v55, %v7238_v40 }
 0x2fb   :  { %v4207_v25 = vmul.f32 -1.442695, %v1073_v62 }
 0x2fc   :  { %v5026_v0 = vpop.eup %5025 }
 0x2fd   :  { %v5028_v42 = vpop.eup %5027  ;;  %v1077_v50 = vadd.f32 1.0, %v5026_v0  ;;  %5029 = vpow2.f32 %v4207_v25 }
 0x2fe   :  { %v1096_v30 = vadd.f32 1.0, %v5028_v42  ;;  %v1055_v17 = vpop.f32.mrf.mxu2  ;;  %v1068_v39 = vpop.f32.mrf.mxu3 }
 0x2ff   :  { %5031 = vrcp.f32 %v1077_v50  ;;  %v1089_v11 = vand.u32 2147483648, %v1077_v50  ;;  %v1087_v45 = vand.u32 2147483647, %v1077_v50  ;;  %vm1083_vm6 = vweird.f32 %v1077_v50 }
 0x300   :  { %5033 = vrcp.f32 %v1096_v30  ;;  %v1108_v19 = vand.u32 2147483648, %v1096_v30  ;;  %v1106_v23 = vand.u32 2147483647, %v1096_v30  ;;  %vm1102_vm7 = vweird.f32 %v1096_v30 }
 0x301   :  { %v1090_v62 = vor.u32 1.1754944e-38, %v1089_v11  ;;  %vm1088_vm10 = vcmp.eq.f32.partialorder %v1087_v45, 8.507059e+37 }
 0x302   :  { %v1109_v42 = vor.u32 1.1754944e-38, %v1108_v19  ;;  %vm1107_vm11 = vcmp.eq.f32.partialorder %v1106_v23, 8.507059e+37 }
 0x303   :  { %v5030_v31 = vpop.eup %5029 }
 0x304   :  { %v1116_v5 = vadd.f32 1.0, %v5030_v31 }
 0x305   :  { %v5032_v54 = vpop.eup %5031 }
 0x306   :  { %v5034_v28 = vpop.eup %5033  ;;  %v1079_v27 = vmul.f32 %v5032_v54, %v1077_v50  ;;  %5035 = vrcp.f32 %v1116_v5  ;;  %vm1084_vm4 = vweird.f32 %v5032_v54  ;;  %vm1122_vm13 = vweird.f32 %v1116_v5 }
 0x307   :  { %v1098_v36 = vmul.f32 %v5034_v28, %v1096_v30  ;;  %5037 = vtanh.f32 %v1072_v63  ;;  %vm1103_vm5 = vweird.f32 %v5034_v28  ;;  %vm1085_vm8 = vmor %vm1083_vm6, %vm1084_vm4 }
 0x308   :  { %v1080_v46 = vsub.f32 1.0, %v1079_v27  ;;  %vm1104_vm9 = vmor %vm1102_vm7, %vm1103_vm5 }
 0x309   :  { %v1099_v38 = vsub.f32 1.0, %v1098_v36 }
 0x30a   :  { %v1081_v57 = vmul.f32 %v5032_v54, %v1080_v46 }
 0x30b   :  { %v1100_v58 = vmul.f32 %v5034_v28, %v1099_v38  ;;  %v1128_v38 = vand.u32 2147483648, %v1116_v5 }
 0x30c   :  { %v5036_v29 = vpop.eup %5035  ;;  %v1082_v16 = vadd.f32 %v5032_v54, %v1081_v57 }
 0x30d   :  { %v1101_v25 = vadd.f32 %v5034_v28, %v1100_v58  ;;  %v1118_v0 = vmul.f32 %v5036_v29, %v1116_v5  ;;  %v5038_v39 = vpop.eup %5037  ;;  %vm1123_vm12 = vweird.f32 %v5036_v29  ;;  %v1129_v19 = vor.u32 1.1754944e-38, %v1128_v38 }
 0x30e   :  { %v1086_v17 = vsel %vm1085_vm8, %v5032_v54, %v1082_v16  ;;  %v1126_v54 = vand.u32 2147483647, %v1116_v5  ;;  %vm1124_vm14 = vmor %vm1122_vm13, %vm1123_vm12 }
 0x30f   :  { %v1091_v56 = vsel %vm1088_vm10, %v1090_v62, %v1086_v17  ;;  %v1105_v55 = vsel %vm1104_vm9, %v5034_v28, %v1101_v25  ;;  %v1119_v31 = vsub.f32 1.0, %v1118_v0 }
 0x310   :  { %v1110_v63 = vsel %vm1107_vm11, %v1109_v42, %v1105_v55  ;;  %v1133_v27 = vmul.f32 %v5038_v39, %v1091_v56  ;;  %vm1127_vm15 = vcmp.eq.f32.partialorder %v1126_v54, 8.507059e+37  ;;  %v7246_v56 = vld [vmem:[#allocation15_spill] sm:$0xff] }
 0x311   :  { %v1132_v36 = vmul.f32 %v1110_v63, %v6036_v24  ;;  %v1120_v46 = vmul.f32 %v5036_v29, %v1119_v31  ;;  %v7245_v24 = vld [vmem:[#allocation13_spill] sm:$0xff]  ;;  %v1146_v55 = vunpack.c.h.bf16 %v7246_v56 }
 0x312   :  { %v1143_v5 = vunpack.c.l.bf16 %v7245_v24  ;;  %v1144_v23 = vunpack.c.h.bf16 %v7245_v24 }
 0x313   :  { %v6080_v50 = vadd.f32 %v1133_v27, %v1132_v36  ;;  %v1121_v30 = vadd.f32 %v5036_v29, %v1120_v46 }
 0x315   :  { %5039 = vtanh.f32 %v6080_v50  ;;  %v1125_v11 = vsel %vm1124_vm14, %v5036_v29, %v1121_v30 }
 0x316   :  { %v1130_v57 = vsel %vm1127_vm15, %v1129_v19, %v1125_v11 }
 0x31b   :  { %v5040_v28 = vpop.eup %5039 }
 0x31c   :  { %v1136_v45 = vmul.f32 %v5040_v28, %v1130_v57 }
 0x31e   :  { %v1137_v58 = vpack.c.bf16 %v1136_v45, %v1136_v45 }
 0x320   :  { %1139 = vst [vmem:[#allocation3 + $0xc] sm:$0xf] %v1137_v58  ;;  %1155 = vmatmul.bf16.vlgmr.msrb.gmra.mxu0 %v1137_v58  ;;  %1168 = vmatmul.bf16.vlgmr.msrb.gmra.mxu1 %v1137_v58 }
 0x321   :  { %1181 = vmatmul.bf16.vlgmr.msrb.gmra.mxu2 %v1137_v58  ;;  %1194 = vmatmul.bf16.vlgmr.msrb.gmra.mxu3 %v1137_v58  ;;  %v1145_v58 = vunpack.c.l.bf16 %v7246_v56 }
 0x322   :  { %1405 = vmatpush.bf16.msrb.mxu0 %v5532_v37  ;;  %1418 = vmatpush.bf16.msrb.mxu1 %v5543_v41 }
 0x323   :  { %1431 = vmatpush.bf16.msrb.mxu2 %v5560_v47  ;;  %1444 = vmatpush.bf16.msrb.mxu3 %v5563_v48 }
 0x326   :  { %1406 = vmatpush.bf16.msrb.mxu0 %v5565_v49  ;;  %1419 = vmatpush.bf16.msrb.mxu1 %v5577_v53 }
 0x327   :  { %1432 = vmatpush.bf16.msrb.mxu2 %v5595_v59  ;;  %1445 = vmatpush.bf16.msrb.mxu3 %v5599_v60 }
 0x32a   :  { %1407 = vmatpush.bf16.msrb.mxu0 %v5601_v61  ;;  %1420 = vmatpush.bf16.msrb.mxu1 %v5613_v1 }
 0x32b   :  { %1433 = vmatpush.bf16.msrb.mxu2 %v5631_v7  ;;  %1446 = vmatpush.bf16.msrb.mxu3 %v5635_v8 }
 0x32e   :  { %1408 = vmatpush.bf16.msrb.mxu0 %v5637_v9  ;;  %1421 = vmatpush.bf16.msrb.mxu1 %v5649_v13 }
 0x32f   :  { %1434 = vmatpush.bf16.msrb.mxu2 %v5670_v20  ;;  %1447 = vmatpush.bf16.msrb.mxu3 %v5674_v21 }
 0x332   :  { %1409 = vmatpush.bf16.msrb.mxu0 %v5676_v22  ;;  %1422 = vmatpush.bf16.msrb.mxu1 %v5688_v26 }
 0x333   :  { %1435 = vmatpush.bf16.msrb.mxu2 %v5706_v32  ;;  %1448 = vmatpush.bf16.msrb.mxu3 %v5710_v33 }
 0x336   :  { %1410 = vmatpush.bf16.msrb.mxu0 %v5712_v34  ;;  %1423 = vmatpush.bf16.msrb.mxu1 %v5715_v35 }
 0x337   :  { %1436 = vmatpush.bf16.msrb.mxu2 %v5751_v52  ;;  %1449 = vmatpush.bf16.msrb.mxu3 %v5735_v43 }
 0x33a   :  { %1411 = vmatpush.bf16.msrb.mxu0 %v5737_v44  ;;  %1424 = vmatpush.bf16.msrb.mxu1 %v5749_v51 }
 0x33b   :  { %1437 = vmatpush.bf16.msrb.mxu2 %v5784_v4  ;;  %1450 = vmatpush.bf16.msrb.mxu3 %v5780_v2 }
 0x33e   :  { %1412 = vmatpush.bf16.msrb.mxu0 %v5782_v3  ;;  %1425 = vmatpush.bf16.msrb.mxu1 %v5793_v10 }
 0x33f   :  { %1438 = vmatpush.bf16.msrb.mxu2 %v5802_v14  ;;  %1451 = vmatpush.bf16.msrb.mxu3 %v5806_v15 }
 0x39d   :  { %v1156_v29 = vpop.f32.mrf.mxu0  ;;  %v1169_v16 = vpop.f32.mrf.mxu1 }
 0x39e   :  { %v1157_v62 = vadd.f32 %v1156_v29, %v1143_v5  ;;  %v1170_v25 = vadd.f32 %v1169_v16, %v1144_v23 }
 0x3a0   :  { %v1199_v0 = vadd.f32 %v1157_v62, %v5932_v18  ;;  %v1200_v42 = vadd.f32 %v1170_v25, %v5936_v12 }
 0x3a2   :  { %v4208_v17 = vmul.f32 -1.442695, %v1199_v0  ;;  %v4209_v39 = vmul.f32 -1.442695, %v1200_v42 }
 0x3a4   :  { %5041 = vpow2.f32 %v4208_v17  ;;  %v1182_v31 = vpop.f32.mrf.mxu2  ;;  %v1195_v63 = vpop.f32.mrf.mxu3 }
 0x3a5   :  { %5043 = vpow2.f32 %v4209_v39  ;;  %v1196_v27 = vadd.f32 %v1195_v63, %v1146_v55  ;;  %v1158_v36 = vpop.f32.mrf.mxu0  ;;  %v1171_v46 = vpop.f32.mrf.mxu1  ;;  %v1183_v24 = vadd.f32 %v1182_v31, %v1145_v58 }
 0x3a7   :  { %v1202_v30 = vadd.f32 %v1196_v27, %v5941_v6  ;;  %v1201_v16 = vadd.f32 %v1183_v24, %v7238_v40 }
 0x3a9   :  { %v4210_v38 = vmul.f32 -1.442695, %v1202_v30 }
 0x3aa   :  { %v5042_v54 = vpop.eup %5041 }
 0x3ab   :  { %v5044_v11 = vpop.eup %5043  ;;  %v1206_v19 = vadd.f32 1.0, %v5042_v54  ;;  %5045 = vpow2.f32 %v4210_v38 }
 0x3ac   :  { %v1225_v28 = vadd.f32 1.0, %v5044_v11  ;;  %v1184_v57 = vpop.f32.mrf.mxu2  ;;  %v1197_v45 = vpop.f32.mrf.mxu3 }
 0x3ad   :  { %5047 = vrcp.f32 %v1206_v19  ;;  %v1218_v39 = vand.u32 2147483648, %v1206_v19  ;;  %v1216_v27 = vand.u32 2147483647, %v1206_v19  ;;  %vm1212_vm2 = vweird.f32 %v1206_v19 }
 0x3ae   :  { %5049 = vrcp.f32 %v1225_v28  ;;  %v1237_v55 = vand.u32 2147483648, %v1225_v28  ;;  %v1235_v31 = vand.u32 2147483647, %v1225_v28  ;;  %vm1231_vm3 = vweird.f32 %v1225_v28 }
 0x3af   :  { %v1219_v30 = vor.u32 1.1754944e-38, %v1218_v39  ;;  %vm1217_vm6 = vcmp.eq.f32.partialorder %v1216_v27, 8.507059e+37 }
 0x3b0   :  { %v1238_v11 = vor.u32 1.1754944e-38, %v1237_v55  ;;  %vm1236_vm7 = vcmp.eq.f32.partialorder %v1235_v31, 8.507059e+37 }
 0x3b1   :  { %v5046_v5 = vpop.eup %5045 }
 0x3b2   :  { %v1245_v23 = vadd.f32 1.0, %v5046_v5 }
 0x3b3   :  { %v5048_v29 = vpop.eup %5047 }
 0x3b4   :  { %v5050_v62 = vpop.eup %5049  ;;  %v1208_v25 = vmul.f32 %v5048_v29, %v1206_v19  ;;  %5051 = vrcp.f32 %v1245_v23  ;;  %vm1213_vm0 = vweird.f32 %v5048_v29  ;;  %vm1251_vm9 = vweird.f32 %v1245_v23 }
 0x3b5   :  { %v1227_v0 = vmul.f32 %v5050_v62, %v1225_v28  ;;  %5053 = vtanh.f32 %v1201_v16  ;;  %vm1232_vm1 = vweird.f32 %v5050_v62  ;;  %vm1214_vm4 = vmor %vm1212_vm2, %vm1213_vm0 }
 0x3b6   :  { %v1209_v42 = vsub.f32 1.0, %v1208_v25  ;;  %vm1233_vm5 = vmor %vm1231_vm3, %vm1232_vm1 }
 0x3b7   :  { %v1228_v17 = vsub.f32 1.0, %v1227_v0 }
 0x3b8   :  { %v1210_v63 = vmul.f32 %v5048_v29, %v1209_v42 }
 0x3b9   :  { %v1229_v56 = vmul.f32 %v5050_v62, %v1228_v17  ;;  %v1257_v17 = vand.u32 2147483648, %v1245_v23 }
 0x3ba   :  { %v5052_v36 = vpop.eup %5051  ;;  %v1211_v46 = vadd.f32 %v5048_v29, %v1210_v63 }
 0x3bb   :  { %v1230_v38 = vadd.f32 %v5050_v62, %v1229_v56  ;;  %v1247_v54 = vmul.f32 %v5052_v36, %v1245_v23  ;;  %v5054_v45 = vpop.eup %5053  ;;  %vm1252_vm8 = vweird.f32 %v5052_v36  ;;  %v1258_v55 = vor.u32 1.1754944e-38, %v1257_v17 }
 0x3bc   :  { %v1215_v57 = vsel %vm1214_vm4, %v5048_v29, %v1211_v46  ;;  %v1255_v29 = vand.u32 2147483647, %v1245_v23  ;;  %vm1253_vm10 = vmor %vm1251_vm9, %vm1252_vm8 }
 0x3bd   :  { %v1220_v58 = vsel %vm1217_vm6, %v1219_v30, %v1215_v57  ;;  %v1234_v24 = vsel %vm1233_vm5, %v5050_v62, %v1230_v38  ;;  %v1248_v5 = vsub.f32 1.0, %v1247_v54 }
 0x3be   :  { %v1239_v16 = vsel %vm1236_vm7, %v1238_v11, %v1234_v24  ;;  %v1262_v25 = vmul.f32 %v5054_v45, %v1220_v58  ;;  %vm1256_vm11 = vcmp.eq.f32.partialorder %v1255_v29, 8.507059e+37 }
 0x3bf   :  { %v1261_v0 = vmul.f32 %v1239_v16, %v6080_v50  ;;  %v1249_v42 = vmul.f32 %v5052_v36, %v1248_v5 }
 0x3c1   :  { %v6124_v19 = vadd.f32 %v1262_v25, %v1261_v0  ;;  %v1250_v28 = vadd.f32 %v5052_v36, %v1249_v42 }
 0x3c3   :  { %5055 = vtanh.f32 %v6124_v19  ;;  %v1254_v39 = vsel %vm1253_vm10, %v5052_v36, %v1250_v28 }
 0x3c4   :  { %v1259_v63 = vsel %vm1256_vm11, %v1258_v55, %v1254_v39 }
 0x3c9   :  { %v5056_v62 = vpop.eup %5055 }
 0x3ca   :  { %v1265_v27 = vmul.f32 %v5056_v62, %v1259_v63 }
 0x3cc   :  { %v1266_v56 = vpack.c.bf16 %v1265_v27, %v1265_v27 }
 0x3ce   :  { %1268 = vst [vmem:[#allocation3 + $0x10] sm:$0xf] %v1266_v56  ;;  %1284 = vmatmul.bf16.vlgmr.msra.gmra.mxu0 %v1266_v56  ;;  %1297 = vmatmul.bf16.vlgmr.msra.gmra.mxu1 %v1266_v56 }
 0x3cf   :  { %1310 = vmatmul.bf16.vlgmr.msra.gmra.mxu2 %v1266_v56  ;;  %1323 = vmatmul.bf16.vlgmr.msra.gmra.mxu3 %v1266_v56 }
 0x3d0   :  { %1534 = vmatpush.bf16.msra.mxu0 %v5532_v37  ;;  %1547 = vmatpush.bf16.msra.mxu1 %v5543_v41  ;;  %v7247_v37 = vld [vmem:[#allocation14_spill] sm:$0xff]  ;;  %v7248_v41 = vld [vmem:[#allocation16_spill] sm:$0xff] }
 0x3d1   :  { %1560 = vmatpush.bf16.msra.mxu2 %v5560_v47  ;;  %1573 = vmatpush.bf16.msra.mxu3 %v5563_v48  ;;  %v402_v47 = vpack.c.bf16 %v7248_v41, %v7247_v37 }
 0x3d3   :  { %v1272_v48 = vunpack.c.l.bf16 %v402_v47 }
 0x3d4   :  { %1535 = vmatpush.bf16.msra.mxu0 %v5565_v49  ;;  %1548 = vmatpush.bf16.msra.mxu1 %v5577_v53  ;;  %v1273_v49 = vunpack.c.h.bf16 %v402_v47 }
 0x3d5   :  { %1561 = vmatpush.bf16.msra.mxu2 %v5595_v59  ;;  %1574 = vmatpush.bf16.msra.mxu3 %v5599_v60 }
 0x3d8   :  { %1536 = vmatpush.bf16.msra.mxu0 %v5601_v61  ;;  %1549 = vmatpush.bf16.msra.mxu1 %v5613_v1  ;;  %v7249_v1 = vld [vmem:[#allocation17_spill] sm:$0xff] }
 0x3d9   :  { %1562 = vmatpush.bf16.msra.mxu2 %v5631_v7  ;;  %1575 = vmatpush.bf16.msra.mxu3 %v5635_v8  ;;  %v7250_v7 = vld [vmem:[#allocation18_spill] sm:$0xff] }
 0x3da   :  { %v403_v8 = vpack.c.bf16 %v7250_v7, %v7249_v1 }
 0x3dc   :  { %1537 = vmatpush.bf16.msra.mxu0 %v5637_v9  ;;  %1550 = vmatpush.bf16.msra.mxu1 %v5649_v13 }
 0x3dd   :  { %1563 = vmatpush.bf16.msra.mxu2 %v5670_v20  ;;  %1576 = vmatpush.bf16.msra.mxu3 %v5674_v21 }
 0x3e0   :  { %1538 = vmatpush.bf16.msra.mxu0 %v5676_v22  ;;  %1551 = vmatpush.bf16.msra.mxu1 %v5688_v26  ;;  %v1275_v22 = vunpack.c.h.bf16 %v403_v8 }
 0x3e1   :  { %1564 = vmatpush.bf16.msra.mxu2 %v5706_v32  ;;  %1577 = vmatpush.bf16.msra.mxu3 %v5710_v33 }
 0x3e4   :  { %1539 = vmatpush.bf16.msra.mxu0 %v5712_v34  ;;  %1552 = vmatpush.bf16.msra.mxu1 %v5715_v35 }
 0x3e5   :  { %1565 = vmatpush.bf16.msra.mxu2 %v5751_v52  ;;  %1578 = vmatpush.bf16.msra.mxu3 %v5735_v43 }
 0x3e8   :  { %1540 = vmatpush.bf16.msra.mxu0 %v5737_v44  ;;  %1553 = vmatpush.bf16.msra.mxu1 %v5749_v51 }
 0x3e9   :  { %1566 = vmatpush.bf16.msra.mxu2 %v5784_v4  ;;  %1579 = vmatpush.bf16.msra.mxu3 %v5780_v2 }
 0x3ec   :  { %1541 = vmatpush.bf16.msra.mxu0 %v5782_v3  ;;  %1554 = vmatpush.bf16.msra.mxu1 %v5793_v10 }
 0x3ed   :  { %1567 = vmatpush.bf16.msra.mxu2 %v5802_v14  ;;  %1580 = vmatpush.bf16.msra.mxu3 %v5806_v15  ;;  %v1274_v14 = vunpack.c.l.bf16 %v403_v8 }
 0x44b   :  { %v1285_v53 = vpop.f32.mrf.mxu0  ;;  %v1298_v59 = vpop.f32.mrf.mxu1 }
 0x44c   :  { %v1286_v60 = vadd.f32 %v1285_v53, %v1272_v48  ;;  %v1299_v61 = vadd.f32 %v1298_v59, %v1273_v49 }
 0x44e   :  { %v1328_v9 = vadd.f32 %v1286_v60, %v5932_v18  ;;  %v1329_v13 = vadd.f32 %v1299_v61, %v5936_v12 }
 0x450   :  { %v4211_v20 = vmul.f32 -1.442695, %v1328_v9  ;;  %v4212_v21 = vmul.f32 -1.442695, %v1329_v13 }
 0x452   :  { %5057 = vpow2.f32 %v4211_v20  ;;  %v1311_v26 = vpop.f32.mrf.mxu2  ;;  %v1324_v32 = vpop.f32.mrf.mxu3 }
 0x453   :  { %5059 = vpow2.f32 %v4212_v21  ;;  %v1325_v33 = vadd.f32 %v1324_v32, %v1275_v22  ;;  %v1287_v34 = vpop.f32.mrf.mxu0  ;;  %v1300_v35 = vpop.f32.mrf.mxu1  ;;  %v1312_v15 = vadd.f32 %v1311_v26, %v1274_v14  ;;  %v4350_v26 = vld [vmem:[%s7189_s3 + $0xe0] sm:$0xf]  ;;  %v4874_v32 = vld [vmem:[%s7189_s3 + $0xec] sm:$0xf0] }
 0x455   :  { %v1331_v43 = vadd.f32 %v1325_v33, %v5941_v6  ;;  %v1330_v36 = vadd.f32 %v1312_v15, %v7238_v40  ;;  %v4872_v33 = vld [vmem:[%s7189_s3 + $0xe4] sm:$0xf] }
 0x457   :  { %v4213_v44 = vmul.f32 -1.442695, %v1331_v43  ;;  %v4351_v43 = vor.u32 %v4874_v32, %v4350_v26  ;;  %v4861_v26 = vld [vmem:[%s7189_s3 + $0x8c] sm:$0xf]  ;;  %v4312_v32 = vld [vmem:[%s7189_s3 + $0x98] sm:$0xf0] }
 0x458   :  { %v5058_v51 = vpop.eup %5057 }
 0x459   :  { %v5060_v52 = vpop.eup %5059  ;;  %v1335_v2 = vadd.f32 1.0, %v5058_v51  ;;  %5061 = vpow2.f32 %v4213_v44  ;;  %v4352_v44 = vld [vmem:[%s7189_s3 + $0xf0] sm:$0xf0]  ;;  %v4358_v51 = vld [vmem:[%s7189_s3 + $0xe8] sm:$0xf] }
 0x45a   :  { %v1354_v3 = vadd.f32 1.0, %v5060_v52  ;;  %v1313_v4 = vpop.f32.mrf.mxu2  ;;  %v1326_v10 = vpop.f32.mrf.mxu3  ;;  %v4875_v52 = vld [vmem:[%s7189_s3 + $0xf4] sm:$0xf0] }
 0x45b   :  { %5063 = vrcp.f32 %v1335_v2  ;;  %v1347_v57 = vand.u32 2147483648, %v1335_v2  ;;  %v1345_v24 = vand.u32 2147483647, %v1335_v2  ;;  %vm1341_vm14 = vweird.f32 %v1335_v2  ;;  %v4873_v4 = vld [vmem:[%s7189_s3 + $0xec] sm:$0xf] }
 0x45c   :  { %5065 = vrcp.f32 %v1354_v3  ;;  %v1366_v45 = vand.u32 2147483648, %v1354_v3  ;;  %v1364_v16 = vand.u32 2147483647, %v1354_v3  ;;  %vm1360_vm15 = vweird.f32 %v1354_v3  ;;  %v4360_v10 = vld [vmem:[%s7189_s3 + $0xf8] sm:$0xf0] }
 0x45d   :  { %v1348_v42 = vor.u32 1.1754944e-38, %v1347_v57  ;;  %vm1346_vm2 = vcmp.eq.f32.partialorder %v1345_v24, 8.507059e+37  ;;  %v4871_v24 = vld [vmem:[%s7189_s3 + $0xd4] sm:$0xf0] }
 0x45e   :  { %v1367_v29 = vor.u32 1.1754944e-38, %v1366_v45  ;;  %vm1365_vm3 = vcmp.eq.f32.partialorder %v1364_v16, 8.507059e+37 }
 0x45f   :  { %v5062_v50 = vpop.eup %5061 }
 0x460   :  { %v1374_v23 = vadd.f32 1.0, %v5062_v50  ;;  %v4363_v50 = vor.u32 %v4873_v4, %v4360_v10  ;;  %v4286_v10 = vld [vmem:[%s7189_s3 + $0x60] sm:$0xf] }
 0x461   :  { %v5064_v31 = vpop.eup %5063 }
 0x462   :  { %v5066_v46 = vpop.eup %5065  ;;  %v1337_v30 = vmul.f32 %v5064_v31, %v1335_v2  ;;  %5067 = vrcp.f32 %v1374_v23  ;;  %vm1342_vm12 = vweird.f32 %v5064_v31  ;;  %v1386_v53 = vand.u32 2147483648, %v1374_v23 }
 0x463   :  { %v1356_v38 = vmul.f32 %v5066_v46, %v1354_v3  ;;  %5069 = vtanh.f32 %v1330_v36  ;;  %vm1361_vm13 = vweird.f32 %v5066_v46  ;;  %vm1343_vm0 = vmor %vm1341_vm14, %vm1342_vm12  ;;  %vm1380_vm5 = vweird.f32 %v1374_v23  ;;  %v4868_v36 = vld [vmem:[%s7189_s3 + $0xc4] sm:$0xf] }
 0x464   :  { %v1338_v54 = vsub.f32 1.0, %v1337_v30  ;;  %vm1362_vm1 = vmor %vm1360_vm15, %vm1361_vm13  ;;  %v1384_v59 = vand.u32 2147483647, %v1374_v23  ;;  %v1387_v61 = vor.u32 1.1754944e-38, %v1386_v53  ;;  %v4355_v2 = vor.u32 %v4872_v33, %v4352_v44  ;;  %v4328_v53 = vld [vmem:[%s7189_s3 + $0xb8] sm:$0xf0] }
 0x465   :  { %v1357_v11 = vsub.f32 1.0, %v1356_v38  ;;  %v4359_v3 = vor.u32 %v4875_v52, %v4358_v51  ;;  %v4315_v51 = vor.u32 %v4861_v26, %v4312_v32  ;;  %v4849_v26 = vld [vmem:[%s7189_s3 + $0x2c] sm:$0xf]  ;;  %v4264_v32 = vld [vmem:[%s7189_s3 + $0x38] sm:$0xf0] }
 0x466   :  { %v1339_v58 = vmul.f32 %v5064_v31, %v1338_v54  ;;  %vm1385_vm7 = vcmp.eq.f32.partialorder %v1384_v59, 8.507059e+37  ;;  %v4336_v54 = vld [vmem:[%s7189_s3 + $0xd0] sm:$0xf0] }
 0x467   :  { %v1358_v5 = vmul.f32 %v5066_v46, %v1357_v11  ;;  %v7252_v11 = vld [vmem:[#allocation21_spill] sm:$0xff]  ;;  %v4339_v45 = vor.u32 %v4868_v36, %v4336_v54 }
 0x468   :  { %v5068_v25 = vpop.eup %5067  ;;  %v1340_v0 = vadd.f32 %v5064_v31, %v1339_v58  ;;  %v1404_v57 = vunpack.c.h.bf16 %v7252_v11  ;;  %v4342_v58 = vld [vmem:[%s7189_s3 + $0xc8] sm:$0xf]  ;;  %v1403_v44 = vunpack.c.l.bf16 %v7252_v11 }
 0x469   :  { %v1359_v28 = vadd.f32 %v5066_v46, %v1358_v5  ;;  %v1376_v17 = vmul.f32 %v5068_v25, %v1374_v23  ;;  %v5070_v55 = vpop.eup %5069  ;;  %vm1381_vm4 = vweird.f32 %v5068_v25  ;;  %v4334_v23 = vld [vmem:[%s7189_s3 + $0xc0] sm:$0xf]  ;;  %v4869_v5 = vld [vmem:[%s7189_s3 + $0xcc] sm:$0xf] }
 0x46a   :  { %v1344_v39 = vsel %vm1343_vm0, %v5064_v31, %v1340_v0  ;;  %vm1382_vm6 = vmor %vm1380_vm5, %vm1381_vm4  ;;  %v4870_v31 = vld [vmem:[%s7189_s3 + $0xcc] sm:$0xf0]  ;;  %v4343_v0 = vor.u32 %v4871_v24, %v4342_v58  ;;  %v4270_v58 = vld [vmem:[%s7189_s3 + $0x40] sm:$0xf] }
 0x46b   :  { %v1349_v62 = vsel %vm1346_vm2, %v1348_v42, %v1344_v39  ;;  %v1363_v63 = vsel %vm1362_vm1, %v5066_v46, %v1359_v28  ;;  %v1377_v27 = vsub.f32 1.0, %v1376_v17  ;;  %v4335_v38 = vor.u32 %v4870_v31, %v4334_v23  ;;  %v4344_v42 = vld [vmem:[%s7189_s3 + $0xd8] sm:$0xf0]  ;;  %v4318_v28 = vld [vmem:[%s7189_s3 + $0xa0] sm:$0xf] }
 0x46c   :  { %v1368_v56 = vsel %vm1365_vm3, %v1367_v29, %v1363_v63  ;;  %v1391_v37 = vmul.f32 %v5070_v55, %v1349_v62  ;;  %v4866_v17 = vld [vmem:[%s7189_s3 + $0xac] sm:$0xf0]  ;;  %v4347_v62 = vor.u32 %v4869_v5, %v4344_v42  ;;  %v4864_v63 = vld [vmem:[%s7189_s3 + $0xa4] sm:$0xf]  ;;  %v4288_v23 = vld [vmem:[%s7189_s3 + $0x70] sm:$0xf0] }
 0x46d   :  { %v1390_v41 = vmul.f32 %v1368_v56, %v6124_v19  ;;  %v1378_v47 = vmul.f32 %v5068_v25, %v1377_v27  ;;  %v7251_v19 = vld [vmem:[#allocation19_spill] sm:$0xff]  ;;  %v4320_v27 = vld [vmem:[%s7189_s3 + $0xb0] sm:$0xf0]  ;;  %v4326_v56 = vld [vmem:[%s7189_s3 + $0xa8] sm:$0xf] }
 0x46e   :  { %v1401_v13 = vunpack.c.l.bf16 %v7251_v19  ;;  %v1402_v20 = vunpack.c.h.bf16 %v7251_v19  ;;  %v4304_v19 = vld [vmem:[%s7189_s3 + $0x90] sm:$0xf0] }
 0x46f   :  { %v6168_v48 = vadd.f32 %v1391_v37, %v1390_v41  ;;  %v1379_v49 = vadd.f32 %v5068_v25, %v1378_v47  ;;  %v4319_v37 = vor.u32 %v4866_v17, %v4318_v28  ;;  %v4323_v41 = vor.u32 %v4864_v63, %v4320_v27  ;;  %v4867_v47 = vld [vmem:[%s7189_s3 + $0xb4] sm:$0xf0]  ;;  %v4272_v28 = vld [vmem:[%s7189_s3 + $0x50] sm:$0xf0]  ;;  %v4278_v17 = vld [vmem:[%s7189_s3 + $0x48] sm:$0xf] }
 0x470   :  { %v4280_v63 = vld [vmem:[%s7189_s3 + $0x58] sm:$0xf0]  ;;  %v4254_v27 = vld [vmem:[%s7189_s3 + $0x20] sm:$0xf] }
 0x471   :  { %5071 = vtanh.f32 %v6168_v48  ;;  %v1383_v60 = vsel %vm1382_vm6, %v5068_v25, %v1379_v49  ;;  %v4865_v49 = vld [vmem:[%s7189_s3 + $0xac] sm:$0xf] }
 0x472   :  { %v1388_v7 = vsel %vm1385_vm7, %v1387_v61, %v1383_v60  ;;  %v4327_v60 = vor.u32 %v4867_v47, %v4326_v56  ;;  %v4331_v61 = vor.u32 %v4865_v49, %v4328_v53  ;;  %v4850_v47 = vld [vmem:[%s7189_s3 + $0x2c] sm:$0xf0] }
 0x477   :  { %v5072_v1 = vpop.eup %5071 }
 0x478   :  { %v1394_v8 = vmul.f32 %v5072_v1, %v1388_v7  ;;  %v4302_v1 = vld [vmem:[%s7189_s3 + $0x80] sm:$0xf]  ;;  %v4862_v7 = vld [vmem:[%s7189_s3 + $0x8c] sm:$0xf0] }
 0x47a   :  { %v1395_v9 = vpack.c.bf16 %v1394_v8, %v1394_v8  ;;  %v4860_v8 = vld [vmem:[%s7189_s3 + $0x84] sm:$0xf] }
 0x47c   :  { %1397 = vst [vmem:[#allocation3 + $0x14] sm:$0xf] %v1395_v9  ;;  %1413 = vmatmul.bf16.vlgmr.msrb.gmra.mxu0 %v1395_v9  ;;  %1426 = vmatmul.bf16.vlgmr.msrb.gmra.mxu1 %v1395_v9 }
 0x47d   :  { %1439 = vmatmul.bf16.vlgmr.msrb.gmra.mxu2 %v1395_v9  ;;  %1452 = vmatmul.bf16.vlgmr.msrb.gmra.mxu3 %v1395_v9  ;;  %v4303_v9 = vor.u32 %v4862_v7, %v4302_v1  ;;  %v4256_v1 = vld [vmem:[%s7189_s3 + $0x30] sm:$0xf0] }
 0x47e   :  { %1880 = vmatpush.bf16.msrb.mxu0 %v4351_v43  ;;  %1909 = vmatpush.bf16.msrb.mxu1 %v4355_v2 }
 0x47f   :  { %1938 = vmatpush.bf16.msrb.mxu2 %v4359_v3  ;;  %1967 = vmatpush.bf16.msrb.mxu3 %v4363_v50  ;;  %v4856_v50 = vld [vmem:[%s7189_s3 + $0x64] sm:$0xf] }
 0x480   :  { %v4291_v36 = vor.u32 %v4856_v50, %v4288_v23  ;;  %v4847_v50 = vld [vmem:[%s7189_s3 + $0x14] sm:$0xf0] }
 0x482   :  { %1881 = vmatpush.bf16.msrb.mxu0 %v4335_v38  ;;  %1910 = vmatpush.bf16.msrb.mxu1 %v4339_v45  ;;  %v4296_v45 = vld [vmem:[%s7189_s3 + $0x78] sm:$0xf0] }
 0x483   :  { %1939 = vmatpush.bf16.msrb.mxu2 %v4343_v0  ;;  %1968 = vmatpush.bf16.msrb.mxu3 %v4347_v62  ;;  %v4853_v62 = vld [vmem:[%s7189_s3 + $0x4c] sm:$0xf] }
 0x486   :  { %1882 = vmatpush.bf16.msrb.mxu0 %v4319_v37  ;;  %1911 = vmatpush.bf16.msrb.mxu1 %v4323_v41 }
 0x487   :  { %1940 = vmatpush.bf16.msrb.mxu2 %v4327_v60  ;;  %1969 = vmatpush.bf16.msrb.mxu3 %v4331_v61  ;;  %v4283_v60 = vor.u32 %v4853_v62, %v4280_v63  ;;  %v4848_v61 = vld [vmem:[%s7189_s3 + $0x24] sm:$0xf] }
 0x48a   :  { %1883 = vmatpush.bf16.msrb.mxu0 %v4303_v9 }
 0x48b   :  { %1970 = vmatpush.bf16.msrb.mxu3 %v4315_v51  ;;  %v4846_v51 = vld [vmem:[%s7189_s3 + $0xc] sm:$0xf0] }
 0x4f9   :  { %v1414_v21 = vpop.f32.mrf.mxu0  ;;  %v1427_v22 = vpop.f32.mrf.mxu1 }
 0x4fa   :  { %v1415_v34 = vadd.f32 %v1414_v21, %v1401_v13  ;;  %v1428_v35 = vadd.f32 %v1427_v22, %v1402_v20  ;;  %v4310_v13 = vld [vmem:[%s7189_s3 + $0x88] sm:$0xf]  ;;  %v4863_v20 = vld [vmem:[%s7189_s3 + $0x94] sm:$0xf0]  ;;  %v4307_v22 = vor.u32 %v4860_v8, %v4304_v19  ;;  %v4255_v19 = vor.u32 %v4850_v47, %v4254_v27 }
 0x4fb   :  { %v7255_v47 = vld [vmem:[#allocation20_spill] sm:$0xff] }
 0x4fc   :  { %v1457_v14 = vadd.f32 %v1415_v34, %v5932_v18  ;;  %v1458_v15 = vadd.f32 %v1428_v35, %v5936_v12  ;;  %v4311_v34 = vor.u32 %v4863_v20, %v4310_v13  ;;  %1912 = vmatpush.bf16.msrb.mxu1 %v4307_v22  ;;  %v4262_v13 = vld [vmem:[%s7189_s3 + $0x28] sm:$0xf]  ;;  %v4851_v22 = vld [vmem:[%s7189_s3 + $0x34] sm:$0xf0] }
 0x4fe   :  { %v4214_v46 = vmul.f32 -1.442695, %v1457_v14  ;;  %v4215_v30 = vmul.f32 -1.442695, %v1458_v15  ;;  %1941 = vmatpush.bf16.msrb.mxu2 %v4311_v34  ;;  %v4858_v14 = vld [vmem:[%s7189_s3 + $0x6c] sm:$0xf0]  ;;  %v4263_v34 = vor.u32 %v4851_v22, %v4262_v13 }
 0x4ff   :  { %v4287_v15 = vor.u32 %v4858_v14, %v4286_v10  ;;  %v4240_v14 = vld [vmem:[%s7189_s3 + $0x10] sm:$0xf0] }
 0x500   :  { %5073 = vpow2.f32 %v4214_v46  ;;  %v1440_v16 = vpop.f32.mrf.mxu2  ;;  %v1453_v25 = vpop.f32.mrf.mxu3  ;;  %v4294_v46 = vld [vmem:[%s7189_s3 + $0x68] sm:$0xf]  ;;  %1913 = vmatpush.bf16.msrb.mxu1 %v4291_v36 }
 0x501   :  { %5075 = vpow2.f32 %v4215_v30  ;;  %v1454_v29 = vadd.f32 %v1453_v25, %v1404_v57  ;;  %v1416_v39 = vpop.f32.mrf.mxu0  ;;  %v1429_v55 = vpop.f32.mrf.mxu1  ;;  %v1441_v4 = vadd.f32 %v1440_v16, %v1403_v44  ;;  %v4859_v30 = vld [vmem:[%s7189_s3 + $0x74] sm:$0xf0]  ;;  %1884 = vmatpush.bf16.msrb.mxu0 %v4287_v15  ;;  %v4857_v57 = vld [vmem:[%s7189_s3 + $0x6c] sm:$0xf]  ;;  %v4854_v16 = vld [vmem:[%s7189_s3 + $0x4c] sm:$0xf0] }
 0x502   :  { %v4295_v11 = vor.u32 %v4859_v30, %v4294_v46  ;;  %v4299_v5 = vor.u32 %v4857_v57, %v4296_v45  ;;  %v4852_v25 = vld [vmem:[%s7189_s3 + $0x44] sm:$0xf]  ;;  %v4271_v42 = vor.u32 %v4854_v16, %v4270_v58  ;;  %v4238_v44 = vld [vmem:[%s7189_s3] sm:$0xf]  ;;  %v4246_v15 = vld [vmem:[%s7189_s3 + $0x8] sm:$0xf] }
 0x503   :  { %v1460_v59 = vadd.f32 %v1454_v29, %v5941_v6  ;;  %v1459_v54 = vadd.f32 %v1441_v4, %v7238_v40  ;;  %v4855_v29 = vld [vmem:[%s7189_s3 + $0x54] sm:$0xf0]  ;;  %v4275_v53 = vor.u32 %v4852_v25, %v4272_v28  ;;  %v4239_v10 = vor.u32 %v4846_v51, %v4238_v44  ;;  %v4845_v30 = vld [vmem:[%s7189_s3 + $0xc] sm:$0xf] }
 0x504   :  { %1942 = vmatpush.bf16.msrb.mxu2 %v4295_v11  ;;  %1971 = vmatpush.bf16.msrb.mxu3 %v4299_v5  ;;  %v4247_v57 = vor.u32 %v4847_v50, %v4246_v15  ;;  %v4905_v15 = vld [vmem:[#allocation4 + $0xec] sm:$0xf] }
 0x505   :  { %v4216_v21 = vmul.f32 -1.442695, %v1460_v59  ;;  %1885 = vmatpush.bf16.msrb.mxu0 %v4271_v42  ;;  %v4279_v59 = vor.u32 %v4855_v29, %v4278_v17  ;;  %1914 = vmatpush.bf16.msrb.mxu1 %v4275_v53 }
 0x506   :  { %v5074_v33 = vpop.eup %5073 }
 0x507   :  { %v5076_v35 = vpop.eup %5075  ;;  %v6273_v43 = vadd.f32 1.0, %v5074_v33  ;;  %5077 = vpow2.f32 %v4216_v21  ;;  %v4259_v21 = vor.u32 %v4848_v61, %v4256_v1 }
 0x508   :  { %v6276_v52 = vadd.f32 1.0, %v5076_v35  ;;  %v1442_v2 = vpop.f32.mrf.mxu2  ;;  %v1455_v3 = vpop.f32.mrf.mxu3  ;;  %1943 = vmatpush.bf16.msrb.mxu2 %v4279_v59  ;;  %1972 = vmatpush.bf16.msrb.mxu3 %v4283_v60  ;;  %v4267_v35 = vor.u32 %v4849_v26, %v4264_v32 }
 0x509   :  { %5079 = vrcp.f32 %v6273_v43  ;;  %v1474_v31 = vand.u32 2147483647, %v6273_v43  ;;  %v1476_v41 = vand.u32 2147483648, %v6273_v43  ;;  %1886 = vmatpush.bf16.msrb.mxu0 %v4255_v19  ;;  %v4844_v2 = vld [vmem:[%s7189_s3 + $0x4] sm:$0xf]  ;;  %vm1470_vm12 = vweird.f32 %v6273_v43  ;;  %1915 = vmatpush.bf16.msrb.mxu1 %v4259_v21  ;;  %v7258_v19 = vld [vmem:[#allocation24_spill] sm:$0xff] }
 0x50a   :  { %5081 = vrcp.f32 %v6276_v52  ;;  %v1495_v37 = vand.u32 2147483648, %v6276_v52  ;;  %v1493_v9 = vand.u32 2147483647, %v6276_v52  ;;  %vm1489_vm11 = vweird.f32 %v6276_v52 }
 0x50b   :  { %vm6355_vm8 = vcmp.eq.f32.partialorder %v1474_v31, 8.507059e+37  ;;  %v1477_v36 = vor.u32 1.1754944e-38, %v1476_v41  ;;  %v4243_v11 = vor.u32 %v4844_v2, %v4240_v14  ;;  %v4841_v41 = vld [vmem:[#allocation3 + $0x8] sm:$0xff]  ;;  %v4478_v2 = vld [vmem:[#allocation4 + $0xe0] sm:$0xf] }
 0x50c   :  { %v1496_v31 = vor.u32 1.1754944e-38, %v1495_v37  ;;  %vm1494_vm15 = vcmp.eq.f32.partialorder %v1493_v9, 8.507059e+37  ;;  %1944 = vmatpush.bf16.msrb.mxu2 %v4263_v34  ;;  %1973 = vmatpush.bf16.msrb.mxu3 %v4267_v35  ;;  %v4840_v37 = vld [vmem:[#allocation3] sm:$0xff] }
 0x50d   :  { %v5078_v38 = vpop.eup %5077  ;;  %1887 = vmatpush.bf16.msrb.mxu0 %v4239_v10  ;;  %1916 = vmatpush.bf16.msrb.mxu1 %v4243_v11  ;;  %v7257_v9 = vld [vmem:[#allocation23_spill] sm:$0xff] }
 0x50e   :  { %v6309_v24 = vadd.f32 1.0, %v5078_v38  ;;  %v4248_v38 = vld [vmem:[%s7189_s3 + $0x18] sm:$0xf0]  ;;  %v407_v13 = vpack.c.bf16 %v7258_v19, %v7257_v9 }
 0x50f   :  { %v6317_v0 = vpop.eup %5079  ;;  %v4251_v16 = vor.u32 %v4845_v30, %v4248_v38  ;;  %v4902_v38 = vld [vmem:[#allocation4 + $0xcc] sm:$0xf0] }
 0x510   :  { %v6328_v39 = vpop.eup %5081  ;;  %v1466_v55 = vmul.f32 %v6317_v0, %v6273_v43  ;;  %5083 = vrcp.f32 %v6309_v24  ;;  %vm1471_vm9 = vweird.f32 %v6317_v0  ;;  %1945 = vmatpush.bf16.msrb.mxu2 %v4247_v57  ;;  %v1515_v29 = vand.u32 2147483648, %v6309_v24 }
 0x511   :  { %v1485_v56 = vmul.f32 %v6328_v39, %v6276_v52  ;;  %5085 = vtanh.f32 %v1459_v54  ;;  %vm1490_vm10 = vweird.f32 %v6328_v39  ;;  %vm1472_vm13 = vmor %vm1470_vm12, %vm1471_vm9  ;;  %1974 = vmatpush.bf16.msrb.mxu3 %v4251_v16  ;;  %vm1509_vm1 = vweird.f32 %v6309_v24 }
 0x512   :  { %v1467_v49 = vsub.f32 1.0, %v1466_v55  ;;  %vm1491_vm14 = vmor %vm1489_vm11, %vm1490_vm10  ;;  %v1516_v62 = vor.u32 1.1754944e-38, %v1515_v29  ;;  %v1533_v32 = vunpack.c.h.bf16 %v407_v13 }
 0x513   :  { %v1486_v7 = vsub.f32 1.0, %v1485_v56 }
 0x514   :  { %v1468_v20 = vmul.f32 %v6317_v0, %v1467_v49  ;;  %v7256_v49 = vld [vmem:[#allocation22_spill] sm:$0xff] }
 0x515   :  { %v1487_v33 = vmul.f32 %v6328_v39, %v1486_v7  ;;  %v406_v53 = vpack.c.bf16 %v7256_v49, %v7255_v47  ;;  %v4448_v47 = vld [vmem:[#allocation4 + $0xb0] sm:$0xf0]  ;;  %v4897_v49 = vld [vmem:[#allocation4 + $0xac] sm:$0xf] }
 0x516   :  { %v5084_v3 = vpop.eup %5083  ;;  %v1469_v4 = vadd.f32 %v6317_v0, %v1468_v20 }
 0x517   :  { %v5086_v23 = vpop.eup %5085  ;;  %v1488_v43 = vadd.f32 %v6328_v39, %v1487_v33  ;;  %v1505_v46 = vmul.f32 %v5084_v3, %v6309_v24  ;;  %vm1510_vm0 = vweird.f32 %v5084_v3  ;;  %v1530_v59 = vunpack.c.l.bf16 %v406_v53 }
 0x518   :  { %v1473_v54 = vsel %vm1472_vm13, %v6317_v0, %v1469_v4  ;;  %vm1511_vm2 = vmor %vm1509_vm1, %vm1510_vm0  ;;  %v1531_v60 = vunpack.c.h.bf16 %v406_v53  ;;  %v4904_v4 = vld [vmem:[#allocation4 + $0xe4] sm:$0xf] }
 0x519   :  { %v1478_v45 = vsel %vm6355_vm8, %v1477_v36, %v1473_v54  ;;  %v1492_v58 = vsel %vm1491_vm14, %v6328_v39, %v1488_v43  ;;  %v1506_v5 = vsub.f32 1.0, %v1505_v46  ;;  %v1513_v39 = vand.u32 2147483647, %v6309_v24  ;;  %v4842_v24 = vld [vmem:[#allocation3 + $0x10] sm:$0xff]  ;;  %v4907_v36 = vld [vmem:[#allocation4 + $0xf4] sm:$0xf0] }
 0x51a   :  { %v1497_v25 = vsel %vm1494_vm15, %v1496_v31, %v1492_v58  ;;  %v1520_v42 = vmul.f32 %v5086_v23, %v1478_v45  ;;  %v4486_v31 = vld [vmem:[#allocation4 + $0xe8] sm:$0xf]  ;;  %v4900_v54 = vld [vmem:[#allocation4 + $0xc4] sm:$0xf]  ;;  %v1532_v45 = vunpack.c.l.bf16 %v407_v13 }
 0x51b   :  { %v1519_v52 = vmul.f32 %v1497_v25, %v6168_v48  ;;  %v1507_v28 = vmul.f32 %v5084_v3, %v1506_v5  ;;  %vm1514_vm3 = vcmp.eq.f32.partialorder %v1513_v39, 8.507059e+37  ;;  %v6436_v46 = vor.u32 %v4907_v36, %v4486_v31  ;;  %v4464_v5 = vld [vmem:[#allocation4 + $0xd0] sm:$0xf0]  ;;  %v4890_v31 = vld [vmem:[#allocation4 + $0x6c] sm:$0xf0] }
 0x51c   :  { %v4888_v36 = vld [vmem:[#allocation4 + $0x64] sm:$0xf] }
 0x51d   :  { %v6416_v0 = vadd.f32 %v1520_v42, %v1519_v52  ;;  %v1508_v17 = vadd.f32 %v5084_v3, %v1507_v28  ;;  %v6447_v52 = vor.u32 %v4900_v54, %v4464_v5  ;;  %v4901_v28 = vld [vmem:[#allocation4 + $0xcc] sm:$0xf]  ;;  %v4416_v54 = vld [vmem:[#allocation4 + $0x70] sm:$0xf0] }
 0x51f   :  { %5087 = vtanh.f32 %v6416_v0  ;;  %v1512_v55 = vsel %vm1511_vm2, %v5084_v3, %v1508_v17  ;;  %v4906_v3 = vld [vmem:[#allocation4 + $0xec] sm:$0xf0]  ;;  %v4472_v17 = vld [vmem:[#allocation4 + $0xd8] sm:$0xf0] }
 0x520   :  { %v1517_v63 = vsel %vm1514_vm3, %v1516_v62, %v1512_v55  ;;  %v6429_v14 = vor.u32 %v4906_v3, %v4478_v2  ;;  %v4470_v62 = vld [vmem:[#allocation4 + $0xc8] sm:$0xf] }
 0x521   :  { %v4454_v3 = vld [vmem:[#allocation4 + $0xa8] sm:$0xf] }
 0x525   :  { %v5088_v48 = vpop.eup %5087 }
 0x526   :  { %v1523_v27 = vmul.f32 %v5088_v48, %v1517_v63  ;;  %v4903_v48 = vld [vmem:[#allocation4 + $0xd4] sm:$0xf0]  ;;  %v4446_v63 = vld [vmem:[#allocation4 + $0xa0] sm:$0xf] }
 0x527   :  { %v6462_v53 = vor.u32 %v4903_v48, %v4470_v62  ;;  %v6521_v48 = vor.u32 %v4888_v36, %v4416_v54 }
 0x528   :  { %v1524_v56 = vpack.c.bf16 %v1523_v27, %v1523_v27  ;;  %v6457_v27 = vor.u32 %v4901_v28, %v4472_v17  ;;  %v4424_v17 = vld [vmem:[#allocation4 + $0x78] sm:$0xf0] }
 0x52a   :  { %1526 = vst [vmem:[#allocation3 + $0x18] sm:$0xf] %v1524_v56  ;;  %1542 = vmatmul.bf16.vlgmr.msra.gmra.mxu0 %v1524_v56  ;;  %1555 = vmatmul.bf16.vlgmr.msra.gmra.mxu1 %v1524_v56 }
 0x52b   :  { %1568 = vmatmul.bf16.vlgmr.msra.gmra.mxu2 %v1524_v56  ;;  %1581 = vmatmul.bf16.vlgmr.msra.gmra.mxu3 %v1524_v56  ;;  %v4898_v56 = vld [vmem:[#allocation4 + $0xac] sm:$0xf0] }
 0x52c   :  { %2227 = vmatpush.bf16.msra.mxu0 %v6429_v14  ;;  %2253 = vmatpush.bf16.msra.mxu2 %v6436_v46 }
 0x530   :  { %2254 = vmatpush.bf16.msra.mxu2 %v6462_v53 }
 0x53a   :  { %1888 = vmatmul.bf16.vlgmr.msrb.gmra.mxu0 %v4840_v37  ;;  %1917 = vmatmul.bf16.vlgmr.msrb.gmra.mxu1 %v4840_v37 }
 0x53b   :  { %1946 = vmatmul.bf16.vlgmr.msrb.gmra.mxu2 %v4840_v37  ;;  %1975 = vmatmul.bf16.vlgmr.msrb.gmra.mxu3 %v4840_v37  ;;  %v4896_v37 = vld [vmem:[#allocation4 + $0xa4] sm:$0xf] }
 0x54a   :  { %1893 = vmatmul.bf16.gmra.mxu0 %v4841_v41  ;;  %1922 = vmatmul.bf16.gmra.mxu1 %v4841_v41 }
 0x54b   :  { %1951 = vmatmul.bf16.gmra.mxu2 %v4841_v41  ;;  %1980 = vmatmul.bf16.gmra.mxu3 %v4841_v41 }
 0x55a   :  { %1898 = vmatmul.bf16.gmra.mxu0 %v4842_v24  ;;  %1927 = vmatmul.bf16.gmra.mxu1 %v4842_v24 }
 0x55b   :  { %1956 = vmatmul.bf16.gmra.mxu2 %v4842_v24  ;;  %1985 = vmatmul.bf16.gmra.mxu3 %v4842_v24  ;;  %v6460_v24 = vor.u32 %v4898_v56, %v4446_v63  ;;  %v4895_v63 = vld [vmem:[#allocation4 + $0x94] sm:$0xf0]  ;;  %v4398_v56 = vld [vmem:[#allocation4 + $0x40] sm:$0xf] }
 0x5a7   :  { %v1543_v61 = vpop.f32.mrf.mxu0  ;;  %v1556_v1 = vpop.f32.mrf.mxu1 }
 0x5a8   :  { %v1544_v7 = vadd.f32 %v1543_v61, %v1530_v59  ;;  %v1557_v8 = vadd.f32 %v1556_v1, %v1531_v60  ;;  %v6466_v61 = vor.u32 %v4896_v37, %v4448_v47  ;;  %v4456_v1 = vld [vmem:[#allocation4 + $0xb8] sm:$0xf0] }
 0x5a9   :  { %v6471_v19 = vor.u32 %v4897_v49, %v4456_v1  ;;  %v4886_v49 = vld [vmem:[#allocation4 + $0x4c] sm:$0xf0] }
 0x5aa   :  { %v1586_v20 = vadd.f32 %v1544_v7, %v5932_v18  ;;  %v1587_v21 = vadd.f32 %v1557_v8, %v5936_v12  ;;  %v4480_v18 = vld [vmem:[#allocation4 + $0xf0] sm:$0xf0]  ;;  %v4488_v12 = vld [vmem:[#allocation4 + $0xf8] sm:$0xf0]  ;;  %v4430_v7 = vld [vmem:[#allocation4 + $0x80] sm:$0xf] }
 0x5ab   :  { %v6431_v50 = vor.u32 %v4904_v4, %v4480_v18  ;;  %v6433_v23 = vor.u32 %v4905_v15, %v4488_v12  ;;  %v4894_v8 = vld [vmem:[#allocation4 + $0x8c] sm:$0xf0]  ;;  %v4899_v4 = vld [vmem:[#allocation4 + $0xb4] sm:$0xf0]  ;;  %v4414_v12 = vld [vmem:[#allocation4 + $0x60] sm:$0xf] }
 0x5ac   :  { %v4217_v22 = vmul.f32 -1.442695, %v1586_v20  ;;  %v4218_v26 = vmul.f32 -1.442695, %v1587_v21  ;;  %v6474_v13 = vor.u32 %v4894_v8, %v4430_v7  ;;  %v4892_v20 = vld [vmem:[#allocation4 + $0x84] sm:$0xf]  ;;  %v6516_v28 = vor.u32 %v4899_v4, %v4454_v3 }
 0x5ad   :  { %2240 = vmatpush.bf16.msra.mxu1 %v6431_v50  ;;  %2266 = vmatpush.bf16.msra.mxu3 %v6433_v23  ;;  %v4432_v21 = vld [vmem:[#allocation4 + $0x90] sm:$0xf0]  ;;  %v6519_v62 = vor.u32 %v4890_v31, %v4414_v12  ;;  %v6535_v8 = vor.u32 %v4886_v49, %v4398_v56  ;;  %v4382_v3 = vld [vmem:[#allocation4 + $0x20] sm:$0xf]  ;;  %v4882_v4 = vld [vmem:[#allocation4 + $0x2c] sm:$0xf0] }
 0x5ae   :  { %5089 = vpow2.f32 %v4217_v22  ;;  %v1569_v33 = vpop.f32.mrf.mxu2  ;;  %v1582_v34 = vpop.f32.mrf.mxu3  ;;  %2255 = vmatpush.bf16.msra.mxu2 %v6516_v28 }
 0x5af   :  { %5091 = vpow2.f32 %v4218_v26  ;;  %v1583_v35 = vadd.f32 %v1582_v34, %v1533_v32  ;;  %v1545_v44 = vpop.f32.mrf.mxu0  ;;  %v1558_v51 = vpop.f32.mrf.mxu1  ;;  %v1570_v29 = vadd.f32 %v1569_v33, %v1532_v45  ;;  %v6480_v26 = vor.u32 %v4892_v20, %v4432_v21  ;;  %v4893_v32 = vld [vmem:[#allocation4 + $0x8c] sm:$0xf]  ;;  %v4440_v33 = vld [vmem:[#allocation4 + $0x98] sm:$0xf0] }
 0x5b0   :  { %v4885_v20 = vld [vmem:[#allocation4 + $0x4c] sm:$0xf]  ;;  %v4408_v21 = vld [vmem:[#allocation4 + $0x58] sm:$0xf0] }
 0x5b1   :  { %v1589_v10 = vadd.f32 %v1583_v35, %v5941_v6  ;;  %v4462_v6 = vld [vmem:[#allocation4 + $0xc0] sm:$0xf]  ;;  %2241 = vmatpush.bf16.msra.mxu1 %v6447_v52  ;;  %v1588_v60 = vadd.f32 %v1570_v29, %v7238_v40  ;;  %2267 = vmatpush.bf16.msra.mxu3 %v6457_v27  ;;  %v6559_v54 = vor.u32 %v4885_v20, %v4408_v21  ;;  %v4878_v20 = vld [vmem:[#allocation4 + $0xc] sm:$0xf0]  ;;  %v4876_v21 = vld [vmem:[#allocation4 + $0x4] sm:$0xf] }
 0x5b2   :  { %v6442_v58 = vor.u32 %v4902_v38, %v4462_v6  ;;  %v6501_v38 = vor.u32 %v4893_v32, %v4440_v33 }
 0x5b3   :  { %v4219_v43 = vmul.f32 -1.442695, %v1589_v10 }
 0x5b4   :  { %v5090_v30 = vpop.eup %5089  ;;  %2228 = vmatpush.bf16.msra.mxu0 %v6442_v58 }
 0x5b5   :  { %v5092_v11 = vpop.eup %5091  ;;  %v6440_v57 = vadd.f32 1.0, %v5090_v30  ;;  %5093 = vpow2.f32 %v4219_v43  ;;  %2242 = vmatpush.bf16.msra.mxu1 %v6466_v61  ;;  %2268 = vmatpush.bf16.msra.mxu3 %v6471_v19 }
 0x5b6   :  { %v6445_v16 = vadd.f32 1.0, %v5092_v11  ;;  %v1571_v25 = vpop.f32.mrf.mxu2  ;;  %v1584_v42 = vpop.f32.mrf.mxu3  ;;  %v4889_v11 = vld [vmem:[#allocation4 + $0x6c] sm:$0xf] }
 0x5b7   :  { %5095 = vrcp.f32 %v6440_v57  ;;  %v6450_v39 = vpop.f32.mrf.mxu0  ;;  %v6452_v55 = vpop.f32.mrf.mxu1  ;;  %v1603_v41 = vand.u32 2147483647, %v6440_v57  ;;  %v1605_v22 = vand.u32 2147483648, %v6440_v57  ;;  %vm1599_vm5 = vweird.f32 %v6440_v57 }
 0x5b8   :  { %5097 = vrcp.f32 %v6445_v16  ;;  %2229 = vmatpush.bf16.msra.mxu0 %v6460_v24  ;;  %v1622_v44 = vand.u32 2147483647, %v6445_v16  ;;  %v1624_v30 = vand.u32 2147483648, %v6445_v16  ;;  %vm1618_vm9 = vweird.f32 %v6445_v16 }
 0x5b9   :  { %vm6511_vm7 = vcmp.eq.f32.partialorder %v1603_v41, 8.507059e+37  ;;  %v1606_v42 = vor.u32 1.1754944e-38, %v1605_v22  ;;  %2243 = vmatpush.bf16.msra.mxu1 %v6480_v26  ;;  %2269 = vmatpush.bf16.msra.mxu3 %v6501_v38  ;;  %v6527_v41 = vor.u32 %v4889_v11, %v4424_v17  ;;  %v4422_v22 = vld [vmem:[#allocation4 + $0x68] sm:$0xf]  ;;  %v4880_v11 = vld [vmem:[#allocation4 + $0x24] sm:$0xf]  ;;  %v6573_v25 = vor.u32 %v4882_v4, %v4382_v3 }
 0x5ba   :  { %v1625_v12 = vor.u32 1.1754944e-38, %v1624_v30  ;;  %vm1623_vm11 = vcmp.eq.f32.partialorder %v1622_v44, 8.507059e+37  ;;  %v4406_v44 = vld [vmem:[#allocation4 + $0x48] sm:$0xf]  ;;  %v4883_v4 = vld [vmem:[#allocation4 + $0x34] sm:$0xf0] }
 0x5bb   :  { %v5094_v59 = vpop.eup %5093 }
 0x5bc   :  { %v6468_v9 = vadd.f32 1.0, %v5094_v59  ;;  %2230 = vmatpush.bf16.msra.mxu0 %v6474_v13  ;;  %v4884_v59 = vld [vmem:[#allocation4 + $0x44] sm:$0xf] }
 0x5bd   :  { %v6476_v40 = vpop.eup %5095  ;;  %2244 = vmatpush.bf16.msra.mxu1 %v6521_v48  ;;  %2270 = vmatpush.bf16.msra.mxu3 %v6527_v41 }
 0x5be   :  { %v6482_v34 = vpop.eup %5097  ;;  %v1595_v35 = vmul.f32 %v6476_v40, %v6440_v57  ;;  %vm1600_vm4 = vweird.f32 %v6476_v40  ;;  %5099 = vrcp.f32 %v6468_v9  ;;  %v1947_v51 = vpop.f32.mrf.mxu2  ;;  %v4438_v57 = vld [vmem:[#allocation4 + $0x88] sm:$0xf]  ;;  %vm1638_vm13 = vweird.f32 %v6468_v9 }
 0x5bf   :  { %v1976_v2 = vpop.f32.mrf.mxu3  ;;  %v1614_v10 = vmul.f32 %v6482_v34, %v6445_v16  ;;  %5101 = vtanh.f32 %v1588_v60  ;;  %v6492_v18 = vpop.f32.mrf.mxu0  ;;  %vm6507_vm6 = vmor %vm1599_vm5, %vm1600_vm4  ;;  %vm1619_vm8 = vweird.f32 %v6482_v34  ;;  %v6529_v47 = vor.u32 %v4895_v63, %v4438_v57  ;;  %v4400_v60 = vld [vmem:[#allocation4 + $0x50] sm:$0xf0] }
 0x5c0   :  { %v6494_v15 = vpop.f32.mrf.mxu1  ;;  %v1596_v43 = vsub.f32 1.0, %v1595_v35  ;;  %v6498_v6 = vpack.c.bf16 %v1976_v2, %v1947_v51  ;;  %2231 = vmatpush.bf16.msra.mxu0 %v6519_v62  ;;  %v6542_v51 = vor.u32 %v4884_v59, %v4400_v60  ;;  %v4891_v2 = vld [vmem:[#allocation4 + $0x74] sm:$0xf0]  ;;  %vm6546_vm10 = vmor %vm1618_vm9, %vm1619_vm8 }
 0x5c1   :  { %v1615_v45 = vsub.f32 1.0, %v1614_v10  ;;  %2256 = vmatpush.bf16.msra.mxu2 %v6529_v47  ;;  %v6568_v16 = vor.u32 %v4891_v2, %v4422_v22  ;;  %v4368_v22 = vld [vmem:[#allocation4 + $0x10] sm:$0xf0]  ;;  %2271 = vmatpush.bf16.msra.mxu3 %v6559_v54  ;;  %v4877_v10 = vld [vmem:[#allocation4 + $0xc] sm:$0xf] }
 0x5c2   :  { %v1597_v29 = vmul.f32 %v6476_v40, %v1596_v43  ;;  %2245 = vmatpush.bf16.msra.mxu1 %v6542_v51 }
 0x5c3   :  { %v1616_v37 = vmul.f32 %v6482_v34, %v1615_v45  ;;  %v4384_v45 = vld [vmem:[#allocation4 + $0x30] sm:$0xf0] }
 0x5c4   :  { %v6531_v1 = vpop.eup %5099  ;;  %v1598_v7 = vadd.f32 %v6476_v40, %v1597_v29  ;;  %2232 = vmatpush.bf16.msra.mxu0 %v6535_v8  ;;  %v6578_v60 = vor.u32 %v4880_v11, %v4384_v45  ;;  %v6593_v11 = vor.u32 %v4876_v21, %v4368_v22  ;;  %v1642_v45 = vand.u32 2147483647, %v6468_v9 }
 0x5c5   :  { %v5102_v32 = vpop.eup %5101  ;;  %v1617_v33 = vadd.f32 %v6482_v34, %v1616_v37  ;;  %v1634_v35 = vmul.f32 %v6531_v1, %v6468_v9  ;;  %v4392_v37 = vld [vmem:[#allocation4 + $0x38] sm:$0xf0]  ;;  %2257 = vmatpush.bf16.msra.mxu2 %v6568_v16  ;;  %vm1639_vm12 = vweird.f32 %v6531_v1 }
 0x5c6   :  { %v1602_v31 = vsel %vm6507_vm6, %v6476_v40, %v1598_v7  ;;  %v6555_v36 = vpop.f32.mrf.mxu2  ;;  %v4366_v7 = vld [vmem:[#allocation4] sm:$0xf]  ;;  %2246 = vmatpush.bf16.msra.mxu1 %v6578_v60  ;;  %vm6597_vm14 = vmor %vm1638_vm13, %vm1639_vm12  ;;  %vm1643_vm15 = vcmp.eq.f32.partialorder %v1642_v45, 8.507059e+37  ;;  %v7275_v45 = vmov 0  }
 0x5c7   :  { %v6557_v43 = vpop.f32.mrf.mxu3  ;;  %v1607_v17 = vsel %vm6511_vm7, %v1606_v42, %v1602_v31  ;;  %v1621_v30 = vsel %vm6546_vm10, %v6482_v34, %v1617_v33  ;;  %v1635_v5 = vsub.f32 1.0, %v1634_v35  ;;  %v1894_v40 = vpop.f32.mrf.mxu0  ;;  %v4887_v42 = vld [vmem:[#allocation4 + $0x54] sm:$0xf0]  ;;  %v4881_v34 = vld [vmem:[#allocation4 + $0x2c] sm:$0xf]  ;;  %v6589_v3 = vor.u32 %v4878_v20, %v4366_v7 }
 0x5c8   :  { %v1923_v29 = vpop.f32.mrf.mxu1  ;;  %v1626_v57 = vsel %vm1623_vm11, %v1625_v12, %v1621_v30  ;;  %v1649_v63 = vmul.f32 %v5102_v32, %v1607_v17  ;;  %v6582_v33 = vor.u32 %v4887_v42, %v4406_v44  ;;  %v6584_v35 = vor.u32 %v4881_v34, %v4392_v37  ;;  %2233 = vmatpush.bf16.msra.mxu0 %v6573_v25  ;;  %v4376_v12 = vld [vmem:[#allocation4 + $0x18] sm:$0xf0]  ;;  %v4374_v42 = vld [vmem:[#allocation4 + $0x8] sm:$0xf]  ;;  %v4879_v34 = vld [vmem:[#allocation4 + $0x14] sm:$0xf0] }
 0x5c9   :  { %v6570_v56 = vpack.c.bf16 %v1923_v29, %v1894_v40  ;;  %v1648_v49 = vmul.f32 %v1626_v57, %v6416_v0  ;;  %v1636_v59 = vmul.f32 %v6531_v1, %v1635_v5  ;;  %v4390_v0 = vld [vmem:[#allocation4 + $0x28] sm:$0xf]  ;;  %v1644_v31 = vand.u32 2147483648, %v6468_v9 }
 0x5ca   :  { %2258 = vmatpush.bf16.msra.mxu2 %v6582_v33  ;;  %2272 = vmatpush.bf16.msra.mxu3 %v6584_v35  ;;  %v6609_v57 = vor.u32 %v4883_v4, %v4390_v0  ;;  %v6621_v7 = vor.u32 %v4879_v34, %v4374_v42 }
 0x5cb   :  { %7265 = vst [vmem:[#allocation25_spill] sm:$0xff] %v6570_v56  ;;  %v1650_v32 = vadd.f32 %v1649_v63, %v1648_v49  ;;  %v1637_v2 = vadd.f32 %v6531_v1, %v1636_v59  ;;  %v6611_v63 = vor.u32 %v4877_v10, %v4376_v12  ;;  %v1645_v37 = vor.u32 1.1754944e-38, %v1644_v31  ;;  %2247 = vmatpush.bf16.msra.mxu1 %v6593_v11 }
 0x5cc   :  { %2234 = vmatpush.bf16.msra.mxu0 %v6589_v3 }
 0x5cd   :  { %5103 = vtanh.f32 %v1650_v32  ;;  %v1641_v9 = vsel %vm6597_vm14, %v6531_v1, %v1637_v2 }
 0x5ce   :  { %v1952_v17 = vpop.f32.mrf.mxu2  ;;  %v1646_v59 = vsel %vm1643_vm15, %v1645_v37, %v1641_v9  ;;  %2259 = vmatpush.bf16.msra.mxu2 %v6609_v57  ;;  %2273 = vmatpush.bf16.msra.mxu3 %v6611_v63 }
 0x5cf   :  { %v1981_v30 = vpop.f32.mrf.mxu3  ;;  %v6603_v29 = vpop.f32.mrf.mxu0  ;;  %2378 = vmatpush.bf16.msrb.mxu1 %v6431_v50 }
 0x5d0   :  { %v6601_v40 = vpack.c.bf16 %v1981_v30, %v1952_v17  ;;  %7269 = vst [vmem:[#allocation9_spill] sm:$0xff] %v6603_v29  ;;  %v6605_v44 = vpop.f32.mrf.mxu1  ;;  %2365 = vmatpush.bf16.msrb.mxu0 %v6429_v14 }
 0x5d1   :  { %7270 = vst [vmem:[#allocation8_spill] sm:$0xff] %v6605_v44 }
 0x5d2   :  { %7268 = vst [vmem:[#allocation7_spill] sm:$0xff] %v6601_v40  ;;  %2404 = vmatpush.bf16.msrb.mxu3 %v6433_v23  ;;  %2260 = vmatpush.bf16.msra.mxu2 %v6621_v7 }
 0x5d3   :  { %v5104_v49 = vpop.eup %5103  ;;  %2379 = vmatpush.bf16.msrb.mxu1 %v6447_v52 }
 0x5d4   :  { %v1652_v1 = vmul.f32 %v5104_v49, %v1646_v59  ;;  %2366 = vmatpush.bf16.msrb.mxu0 %v6442_v58 }
 0x5d6   :  { %v1653_v20 = vpack.c.bf16 %v1652_v1, %v1652_v1  ;;  %v6626_v21 = vpop.f32.mrf.mxu2  ;;  %2391 = vmatpush.bf16.msrb.mxu2 %v6436_v46  ;;  %2405 = vmatpush.bf16.msrb.mxu3 %v6457_v27 }
 0x5d7   :  { %7271 = vst [vmem:[#allocation10_spill] sm:$0xff] %v6626_v21  ;;  %v6628_v22 = vpop.f32.mrf.mxu3  ;;  %v1899_v32 = vpop.f32.mrf.mxu0  ;;  %2380 = vmatpush.bf16.msrb.mxu1 %v6466_v61 }
 0x5d8   :  { %7272 = vst [vmem:[#allocation11_spill] sm:$0xff] %v6628_v22  ;;  %v1928_v0 = vpop.f32.mrf.mxu1  ;;  %2367 = vmatpush.bf16.msrb.mxu0 %v6460_v24 }
 0x5d9   :  { %1655 = vst [vmem:[#allocation3 + $0x1c] sm:$0xf] %v1653_v20  ;;  %v6632_v2 = vpack.c.bf16 %v1928_v0, %v1899_v32 }
 0x5da   :  { %2392 = vmatpush.bf16.msrb.mxu2 %v6462_v53  ;;  %2406 = vmatpush.bf16.msrb.mxu3 %v6471_v19 }
 0x5db   :  { %7273 = vst [vmem:[#allocation12_spill] sm:$0xff] %v6632_v2  ;;  %2381 = vmatpush.bf16.msrb.mxu1 %v6480_v26  ;;  %v2065_v2 = vunpack.c.l.bf16 %v6498_v6 }
 0x5dc   :  { %2368 = vmatpush.bf16.msrb.mxu0 %v6474_v13 }
 0x5de   :  { %v1957_v4 = vpop.f32.mrf.mxu2  ;;  %2393 = vmatpush.bf16.msrb.mxu2 %v6516_v28  ;;  %2407 = vmatpush.bf16.msrb.mxu3 %v6501_v38 }
 0x5df   :  { %v1986_v10 = vpop.f32.mrf.mxu3  ;;  %2382 = vmatpush.bf16.msrb.mxu1 %v6521_v48  ;;  %v6699_v17 = vpop.f32.mrf.mxu0 }
 0x5e0   :  { %v6642_v12 = vpack.c.bf16 %v1986_v10, %v1957_v4  ;;  %v4843_v31 = vld [vmem:[#allocation3 + $0x18] sm:$0xff]  ;;  %2369 = vmatpush.bf16.msrb.mxu0 %v6519_v62  ;;  %7276 = vst [vmem:[#allocation15_spill] sm:$0xff] %v6699_v17  ;;  %v6701_v30 = vpop.f32.mrf.mxu1  ;;  %v1996_v4 = vpack.c.bf16 %v6452_v55, %v6450_v39  ;;  %v2060_v10 = vld [vmem:[%s7193_s7] sm:$0xf] }
 0x5e1   :  { %1903 = vmatmul.bf16.gmra.mxu0 %v4843_v31  ;;  %1932 = vmatmul.bf16.gmra.mxu1 %v4843_v31  ;;  %7277 = vst [vmem:[#allocation14_spill] sm:$0xff] %v6701_v30  ;;  %v2066_v30 = vunpack.c.h.bf16 %v6498_v6  ;;  %v6727_v17 = vperm.slane %v2060_v10, 3  ;;  %v6731_v22 = vperm.slane %v2060_v10, 2 }
 0x5e2   :  { %7274 = vst [vmem:[#allocation13_spill] sm:$0xff] %v6642_v12  ;;  %1961 = vmatmul.bf16.gmra.mxu2 %v4843_v31  ;;  %1990 = vmatmul.bf16.gmra.mxu3 %v4843_v31 }
 0x5e3   :  { %2394 = vmatpush.bf16.msrb.mxu2 %v6529_v47  ;;  %2408 = vmatpush.bf16.msrb.mxu3 %v6527_v41  ;;  %7284 = vst [vmem:[#allocation22_spill] sm:$0xff] %v6727_v17 }
 0x5e4   :  { %2370 = vmatpush.bf16.msrb.mxu0 %v6535_v8  ;;  %2383 = vmatpush.bf16.msrb.mxu1 %v6542_v51  ;;  %7285 = vst [vmem:[#allocation23_spill] sm:$0xff] %v6731_v22 }
 0x5e6   :  { %v6703_v5 = vpop.f32.mrf.mxu2 }
 0x5e7   :  { %2395 = vmatpush.bf16.msrb.mxu2 %v6568_v16  ;;  %2409 = vmatpush.bf16.msrb.mxu3 %v6559_v54  ;;  %7278 = vst [vmem:[#allocation16_spill] sm:$0xff] %v6703_v5  ;;  %v6705_v9 = vpop.f32.mrf.mxu3 }
 0x5e8   :  { %2371 = vmatpush.bf16.msrb.mxu0 %v6573_v25  ;;  %2384 = vmatpush.bf16.msrb.mxu1 %v6578_v60  ;;  %7279 = vst [vmem:[#allocation17_spill] sm:$0xff] %v6705_v9  ;;  %v2063_v9 = vunpack.c.l.bf16 %v1996_v4 }
 0x5eb   :  { %2396 = vmatpush.bf16.msrb.mxu2 %v6582_v33  ;;  %2410 = vmatpush.bf16.msrb.mxu3 %v6584_v35 }
 0x5ec   :  { %2372 = vmatpush.bf16.msrb.mxu0 %v6589_v3  ;;  %2385 = vmatpush.bf16.msrb.mxu1 %v6593_v11 }
 0x5ef   :  { %2397 = vmatpush.bf16.msrb.mxu2 %v6609_v57  ;;  %2411 = vmatpush.bf16.msrb.mxu3 %v6611_v63 }
 0x5f1   :  { %2235 = vmatmul.bf16.vlgmr.msra.gmra.mxu0 %v7275_v45  ;;  %2248 = vmatmul.bf16.vlgmr.msra.gmra.mxu1 %v7275_v45 }
 0x5f2   :  { %2261 = vmatmul.bf16.vlgmr.msra.gmra.mxu2 %v7275_v45  ;;  %2274 = vmatmul.bf16.vlgmr.msra.gmra.mxu3 %v7275_v45 }
 0x5f3   :  { %2494 = vmatpush.bf16.msra.mxu0 %v6429_v14  ;;  %2507 = vmatpush.bf16.msra.mxu1 %v6431_v50 }
 0x5f4   :  { %2398 = vmatpush.bf16.msrb.mxu2 %v6621_v7  ;;  %2533 = vmatpush.bf16.msra.mxu3 %v6433_v23 }
 0x5f7   :  { %2495 = vmatpush.bf16.msra.mxu0 %v6442_v58  ;;  %2508 = vmatpush.bf16.msra.mxu1 %v6447_v52 }
 0x5f8   :  { %2520 = vmatpush.bf16.msra.mxu2 %v6436_v46  ;;  %2534 = vmatpush.bf16.msra.mxu3 %v6457_v27 }
 0x5fb   :  { %2496 = vmatpush.bf16.msra.mxu0 %v6460_v24  ;;  %2509 = vmatpush.bf16.msra.mxu1 %v6466_v61 }
 0x5fc   :  { %2521 = vmatpush.bf16.msra.mxu2 %v6462_v53  ;;  %2535 = vmatpush.bf16.msra.mxu3 %v6471_v19 }
 0x5ff   :  { %2497 = vmatpush.bf16.msra.mxu0 %v6474_v13  ;;  %2510 = vmatpush.bf16.msra.mxu1 %v6480_v26 }
 0x600   :  { %2522 = vmatpush.bf16.msra.mxu2 %v6516_v28  ;;  %2536 = vmatpush.bf16.msra.mxu3 %v6501_v38 }
 0x603   :  { %2498 = vmatpush.bf16.msra.mxu0 %v6519_v62  ;;  %2511 = vmatpush.bf16.msra.mxu1 %v6521_v48 }
 0x604   :  { %2523 = vmatpush.bf16.msra.mxu2 %v6529_v47  ;;  %2537 = vmatpush.bf16.msra.mxu3 %v6527_v41 }
 0x607   :  { %2499 = vmatpush.bf16.msra.mxu0 %v6535_v8  ;;  %2512 = vmatpush.bf16.msra.mxu1 %v6542_v51 }
 0x608   :  { %2524 = vmatpush.bf16.msra.mxu2 %v6568_v16  ;;  %2538 = vmatpush.bf16.msra.mxu3 %v6559_v54 }
 0x60b   :  { %2500 = vmatpush.bf16.msra.mxu0 %v6573_v25  ;;  %2513 = vmatpush.bf16.msra.mxu1 %v6578_v60 }
 0x60c   :  { %2525 = vmatpush.bf16.msra.mxu2 %v6582_v33  ;;  %2539 = vmatpush.bf16.msra.mxu3 %v6584_v35 }
 0x60f   :  { %2501 = vmatpush.bf16.msra.mxu0 %v6589_v3  ;;  %2514 = vmatpush.bf16.msra.mxu1 %v6593_v11 }
 0x610   :  { %2526 = vmatpush.bf16.msra.mxu2 %v6609_v57  ;;  %2540 = vmatpush.bf16.msra.mxu3 %v6611_v63 }
 0x614   :  { %2527 = vmatpush.bf16.msra.mxu2 %v6621_v7 }
 0x65e   :  { %v1904_v42 = vpop.f32.mrf.mxu0  ;;  %v1933_v34 = vpop.f32.mrf.mxu1 }
 0x65f   :  { %v6707_v37 = vpack.c.bf16 %v1933_v34, %v1904_v42  ;;  %v6718_v42 = vperm.slane %v2060_v10, 0  ;;  %v2064_v34 = vunpack.c.h.bf16 %v1996_v4 }
 0x661   :  { %7280 = vst [vmem:[#allocation18_spill] sm:$0xff] %v6707_v37  ;;  %v6720_v37 = vperm.slane %v2060_v10, 1 }
 0x665   :  { %v1962_v49 = vpop.f32.mrf.mxu2  ;;  %v1991_v59 = vpop.f32.mrf.mxu3 }
 0x666   :  { %v6709_v1 = vpack.c.bf16 %v1991_v59, %v1962_v49  ;;  %v1906_v20 = vpop.f32.mrf.mxu0  ;;  %v1935_v32 = vpop.f32.mrf.mxu1 }
 0x667   :  { %v6711_v0 = vpack.c.bf16 %v1935_v32, %v1906_v20 }
 0x668   :  { %7281 = vst [vmem:[#allocation19_spill] sm:$0xff] %v6709_v1 }
 0x669   :  { %7282 = vst [vmem:[#allocation21_spill] sm:$0xff] %v6711_v0 }
 0x66d   :  { %v1964_v31 = vpop.f32.mrf.mxu2  ;;  %v1993_v45 = vpop.f32.mrf.mxu3 }
 0x66e   :  { %v6722_v49 = vpack.c.bf16 %v1993_v45, %v1964_v31  ;;  %v2236_v59 = vpop.f32.mrf.mxu0  ;;  %v2249_v20 = vpop.f32.mrf.mxu1 }
 0x66f   :  { %v2237_v32 = vadd.f32 %v2236_v59, %v2063_v9  ;;  %v2250_v0 = vadd.f32 %v2249_v20, %v2064_v34 }
 0x670   :  { %7283 = vst [vmem:[#allocation20_spill] sm:$0xff] %v6722_v49 }
 0x671   :  { %v2288_v39 = vadd.f32 %v6718_v42, %v2237_v32  ;;  %v2289_v55 = vadd.f32 %v6720_v37, %v2250_v0 }
 0x673   :  { %v4492_v1 = vmul.f32 -1.442695, %v2288_v39  ;;  %v4493_v5 = vmul.f32 -1.442695, %v2289_v55 }
 0x675   :  { %5105 = vpow2.f32 %v4492_v1  ;;  %v2262_v4 = vpop.f32.mrf.mxu2  ;;  %v2275_v12 = vpop.f32.mrf.mxu3 }
 0x676   :  { %5107 = vpow2.f32 %v4493_v5  ;;  %v2276_v31 = vadd.f32 %v2275_v12, %v2066_v30  ;;  %v2238_v45 = vpop.f32.mrf.mxu0  ;;  %v2251_v49 = vpop.f32.mrf.mxu1  ;;  %v2263_v1 = vadd.f32 %v2262_v4, %v2065_v2 }
 0x678   :  { %v2291_v9 = vadd.f32 %v6727_v17, %v2276_v31  ;;  %v2290_v49 = vadd.f32 %v6731_v22, %v2263_v1 }
 0x67a   :  { %v4494_v34 = vmul.f32 -1.442695, %v2291_v9 }
 0x67b   :  { %v5106_v59 = vpop.eup %5105 }
 0x67c   :  { %v5108_v20 = vpop.eup %5107  ;;  %v2295_v32 = vadd.f32 1.0, %v5106_v59  ;;  %5109 = vpow2.f32 %v4494_v34 }
 0x67d   :  { %v2314_v0 = vadd.f32 1.0, %v5108_v20  ;;  %v2277_v39 = vpop.f32.mrf.mxu3  ;;  %v2264_v55 = vpop.f32.mrf.mxu2 }
 0x67e   :  { %5111 = vrcp.f32 %v2295_v32  ;;  %v2307_v20 = vand.u32 2147483648, %v2295_v32  ;;  %v2305_v6 = vand.u32 2147483647, %v2295_v32  ;;  %vm2301_vm2 = vweird.f32 %v2295_v32 }
 0x67f   :  { %5113 = vrcp.f32 %v2314_v0  ;;  %v2326_v39 = vand.u32 2147483648, %v2314_v0  ;;  %v2324_v10 = vand.u32 2147483647, %v2314_v0  ;;  %vm2320_vm3 = vweird.f32 %v2314_v0 }
 0x680   :  { %v2308_v1 = vor.u32 1.1754944e-38, %v2307_v20  ;;  %vm2306_vm5 = vcmp.eq.f32.partialorder %v2305_v6, 8.507059e+37 }
 0x681   :  { %v2327_v29 = vor.u32 1.1754944e-38, %v2326_v39  ;;  %vm2325_vm7 = vcmp.eq.f32.partialorder %v2324_v10, 8.507059e+37 }
 0x682   :  { %v5110_v12 = vpop.eup %5109 }
 0x683   :  { %v2334_v30 = vadd.f32 1.0, %v5110_v12 }
 0x684   :  { %v5112_v5 = vpop.eup %5111 }
 0x685   :  { %v5114_v31 = vpop.eup %5113  ;;  %v2297_v45 = vmul.f32 %v5112_v5, %v2295_v32  ;;  %5115 = vrcp.f32 %v2334_v30  ;;  %vm2302_vm0 = vweird.f32 %v5112_v5  ;;  %vm2340_vm9 = vweird.f32 %v2334_v30 }
 0x686   :  { %v2316_v9 = vmul.f32 %v5114_v31, %v2314_v0  ;;  %5117 = vtanh.f32 %v2290_v49  ;;  %vm2321_vm1 = vweird.f32 %v5114_v31  ;;  %vm2303_vm4 = vmor %vm2301_vm2, %vm2302_vm0  ;;  %v2346_v0 = vand.u32 2147483648, %v2334_v30 }
 0x687   :  { %v2298_v34 = vsub.f32 1.0, %v2297_v45  ;;  %vm2322_vm6 = vmor %vm2320_vm3, %vm2321_vm1 }
 0x688   :  { %v2317_v59 = vsub.f32 1.0, %v2316_v9  ;;  %v2347_v39 = vor.u32 1.1754944e-38, %v2346_v0 }
 0x689   :  { %v2299_v55 = vmul.f32 %v5112_v5, %v2298_v34 }
 0x68a   :  { %v2318_v2 = vmul.f32 %v5114_v31, %v2317_v59 }
 0x68b   :  { %v5116_v4 = vpop.eup %5115  ;;  %v2300_v12 = vadd.f32 %v5112_v5, %v2299_v55 }
 0x68c   :  { %v2319_v21 = vadd.f32 %v5114_v31, %v2318_v2  ;;  %v2336_v44 = vmul.f32 %v5116_v4, %v2334_v30  ;;  %v5118_v49 = vpop.eup %5117  ;;  %vm2341_vm8 = vweird.f32 %v5116_v4 }
 0x68d   :  { %v2304_v45 = vsel %vm2303_vm4, %v5112_v5, %v2300_v12  ;;  %v2344_v5 = vand.u32 2147483647, %v2334_v30  ;;  %vm2342_vm10 = vmor %vm2340_vm9, %vm2341_vm8  ;;  %v1999_v12 = vpack.c.bf16 %v6557_v43, %v6555_v36 }
 0x68e   :  { %v2309_v9 = vsel %vm2306_vm5, %v2308_v1, %v2304_v45  ;;  %v2323_v34 = vsel %vm2322_vm6, %v5114_v31, %v2319_v21  ;;  %v2337_v40 = vsub.f32 1.0, %v2336_v44 }
 0x68f   :  { %v2328_v59 = vsel %vm2325_vm7, %v2327_v29, %v2323_v34  ;;  %v2351_v56 = vmul.f32 %v5118_v49, %v2309_v9  ;;  %vm2345_vm11 = vcmp.eq.f32.partialorder %v2344_v5, 8.507059e+37  ;;  %v2364_v34 = vunpack.c.h.bf16 %v1999_v12  ;;  %v7286_v5 = vld [vmem:[#allocation22_spill] sm:$0xff] }
 0x690   :  { %v2350_v22 = vmul.f32 0.0, %v2328_v59  ;;  %v2338_v17 = vmul.f32 %v5116_v4, %v2337_v40 }
 0x692   :  { %v6734_v55 = vadd.f32 %v2351_v56, %v2350_v22  ;;  %v2339_v32 = vadd.f32 %v5116_v4, %v2338_v17  ;;  %v1998_v56 = vpack.c.bf16 %v6494_v15, %v6492_v18 }
 0x694   :  { %5119 = vtanh.f32 %v6734_v55  ;;  %v2343_v20 = vsel %vm2342_vm10, %v5116_v4, %v2339_v32  ;;  %v2361_v40 = vunpack.c.l.bf16 %v1998_v56  ;;  %v2362_v22 = vunpack.c.h.bf16 %v1998_v56 }
 0x695   :  { %v2348_v31 = vsel %vm2345_vm11, %v2347_v39, %v2343_v20 }
 0x69a   :  { %v5120_v21 = vpop.eup %5119 }
 0x69b   :  { %v2354_v44 = vmul.f32 %v5120_v21, %v2348_v31 }
 0x69d   :  { %v2355_v29 = vmax.f32 %v2354_v44, 0.0  ;;  %v2358_v6 = vpack.c.bf16 %v2354_v44, %v2354_v44 }
 0x69f   :  { %v2356_v2 = vpack.c.bf16 %v2355_v29, %v2355_v29  ;;  %2373 = vmatmul.bf16.vlgmr.msrb.gmra.mxu0 %v2358_v6  ;;  %2386 = vmatmul.bf16.vlgmr.msrb.gmra.mxu1 %v2358_v6 }
 0x6a0   :  { %2399 = vmatmul.bf16.vlgmr.msrb.gmra.mxu2 %v2358_v6  ;;  %2412 = vmatmul.bf16.vlgmr.msrb.gmra.mxu3 %v2358_v6  ;;  %v2363_v6 = vunpack.c.l.bf16 %v1999_v12 }
 0x6a1   :  { %2357 = vst [vmem:[#allocation3] sm:$0xf] %v2356_v2  ;;  %2623 = vmatpush.bf16.msrb.mxu0 %v6429_v14  ;;  %2636 = vmatpush.bf16.msrb.mxu1 %v6431_v50 }
 0x6a2   :  { %2649 = vmatpush.bf16.msrb.mxu2 %v6436_v46  ;;  %2662 = vmatpush.bf16.msrb.mxu3 %v6433_v23 }
 0x6a5   :  { %2624 = vmatpush.bf16.msrb.mxu0 %v6442_v58  ;;  %2637 = vmatpush.bf16.msrb.mxu1 %v6447_v52 }
 0x6a6   :  { %2650 = vmatpush.bf16.msrb.mxu2 %v6462_v53  ;;  %2663 = vmatpush.bf16.msrb.mxu3 %v6457_v27 }
 0x6a9   :  { %2625 = vmatpush.bf16.msrb.mxu0 %v6460_v24  ;;  %2638 = vmatpush.bf16.msrb.mxu1 %v6466_v61 }
 0x6aa   :  { %2651 = vmatpush.bf16.msrb.mxu2 %v6516_v28  ;;  %2664 = vmatpush.bf16.msrb.mxu3 %v6471_v19 }
 0x6ad   :  { %2626 = vmatpush.bf16.msrb.mxu0 %v6474_v13  ;;  %2639 = vmatpush.bf16.msrb.mxu1 %v6480_v26 }
 0x6ae   :  { %2652 = vmatpush.bf16.msrb.mxu2 %v6529_v47  ;;  %2665 = vmatpush.bf16.msrb.mxu3 %v6501_v38 }
 0x6b1   :  { %2627 = vmatpush.bf16.msrb.mxu0 %v6519_v62  ;;  %2640 = vmatpush.bf16.msrb.mxu1 %v6521_v48 }
 0x6b2   :  { %2653 = vmatpush.bf16.msrb.mxu2 %v6568_v16  ;;  %2666 = vmatpush.bf16.msrb.mxu3 %v6527_v41 }
 0x6b5   :  { %2628 = vmatpush.bf16.msrb.mxu0 %v6535_v8  ;;  %2641 = vmatpush.bf16.msrb.mxu1 %v6542_v51 }
 0x6b6   :  { %2654 = vmatpush.bf16.msrb.mxu2 %v6582_v33  ;;  %2667 = vmatpush.bf16.msrb.mxu3 %v6559_v54 }
 0x6b9   :  { %2629 = vmatpush.bf16.msrb.mxu0 %v6573_v25  ;;  %2642 = vmatpush.bf16.msrb.mxu1 %v6578_v60 }
 0x6ba   :  { %2655 = vmatpush.bf16.msrb.mxu2 %v6609_v57  ;;  %2668 = vmatpush.bf16.msrb.mxu3 %v6584_v35 }
 0x6bd   :  { %2630 = vmatpush.bf16.msrb.mxu0 %v6589_v3  ;;  %2643 = vmatpush.bf16.msrb.mxu1 %v6593_v11 }
 0x6be   :  { %2656 = vmatpush.bf16.msrb.mxu2 %v6621_v7  ;;  %2669 = vmatpush.bf16.msrb.mxu3 %v6611_v63 }
 0x71c   :  { %v2374_v17 = vpop.f32.mrf.mxu0  ;;  %v2387_v30 = vpop.f32.mrf.mxu1 }
 0x71d   :  { %v2375_v10 = vadd.f32 %v2374_v17, %v2361_v40  ;;  %v2388_v4 = vadd.f32 %v2387_v30, %v2362_v22  ;;  %v7287_v17 = vld [vmem:[#allocation23_spill] sm:$0xff] }
 0x71f   :  { %v2417_v1 = vadd.f32 %v2375_v10, %v6718_v42  ;;  %v2418_v45 = vadd.f32 %v2388_v4, %v6720_v37 }
 0x721   :  { %v4495_v49 = vmul.f32 -1.442695, %v2417_v1  ;;  %v4496_v9 = vmul.f32 -1.442695, %v2418_v45 }
 0x723   :  { %5121 = vpow2.f32 %v4495_v49  ;;  %v2400_v59 = vpop.f32.mrf.mxu2  ;;  %v2413_v32 = vpop.f32.mrf.mxu3 }
 0x724   :  { %5123 = vpow2.f32 %v4496_v9  ;;  %v2414_v18 = vadd.f32 %v2413_v32, %v2364_v34  ;;  %v2376_v15 = vpop.f32.mrf.mxu0  ;;  %v2389_v0 = vpop.f32.mrf.mxu1  ;;  %v2401_v2 = vadd.f32 %v2400_v59, %v2363_v6 }
 0x726   :  { %v2420_v20 = vadd.f32 %v2414_v18, %v7286_v5  ;;  %v2419_v30 = vadd.f32 %v2401_v2, %v7287_v17 }
 0x728   :  { %v4497_v39 = vmul.f32 -1.442695, %v2420_v20 }
 0x729   :  { %v5122_v21 = vpop.eup %5121 }
 0x72a   :  { %v5124_v31 = vpop.eup %5123  ;;  %v2424_v36 = vadd.f32 1.0, %v5122_v21  ;;  %5125 = vpow2.f32 %v4497_v39 }
 0x72b   :  { %v2443_v43 = vadd.f32 1.0, %v5124_v31  ;;  %v2402_v44 = vpop.f32.mrf.mxu2  ;;  %v2415_v29 = vpop.f32.mrf.mxu3 }
 0x72c   :  { %5127 = vrcp.f32 %v2424_v36  ;;  %v2436_v9 = vand.u32 2147483648, %v2424_v36  ;;  %v2434_v18 = vand.u32 2147483647, %v2424_v36  ;;  %vm2430_vm14 = vweird.f32 %v2424_v36 }
 0x72d   :  { %5129 = vrcp.f32 %v2443_v43  ;;  %v2455_v34 = vand.u32 2147483648, %v2443_v43  ;;  %v2453_v59 = vand.u32 2147483647, %v2443_v43  ;;  %vm2449_vm15 = vweird.f32 %v2443_v43 }
 0x72e   :  { %v2437_v20 = vor.u32 1.1754944e-38, %v2436_v9  ;;  %vm2435_vm2 = vcmp.eq.f32.partialorder %v2434_v18, 8.507059e+37 }
 0x72f   :  { %v2456_v31 = vor.u32 1.1754944e-38, %v2455_v34  ;;  %vm2454_vm3 = vcmp.eq.f32.partialorder %v2453_v59, 8.507059e+37 }
 0x730   :  { %v5126_v56 = vpop.eup %5125 }
 0x731   :  { %v2463_v40 = vadd.f32 1.0, %v5126_v56 }
 0x732   :  { %v5128_v22 = vpop.eup %5127 }
 0x733   :  { %v5130_v10 = vpop.eup %5129  ;;  %v2426_v4 = vmul.f32 %v5128_v22, %v2424_v36  ;;  %5131 = vrcp.f32 %v2463_v40  ;;  %vm2431_vm12 = vweird.f32 %v5128_v22  ;;  %vm2469_vm5 = vweird.f32 %v2463_v40 }
 0x734   :  { %v2445_v1 = vmul.f32 %v5130_v10, %v2443_v43  ;;  %5133 = vtanh.f32 %v2419_v30  ;;  %vm2450_vm13 = vweird.f32 %v5130_v10  ;;  %vm2432_vm0 = vmor %vm2430_vm14, %vm2431_vm12 }
 0x735   :  { %v2427_v45 = vsub.f32 1.0, %v2426_v4  ;;  %vm2451_vm1 = vmor %vm2449_vm15, %vm2450_vm13 }
 0x736   :  { %v2446_v49 = vsub.f32 1.0, %v2445_v1 }
 0x737   :  { %v2428_v32 = vmul.f32 %v5128_v22, %v2427_v45 }
 0x738   :  { %v2447_v12 = vmul.f32 %v5130_v10, %v2446_v49  ;;  %v2475_v49 = vand.u32 2147483648, %v2463_v40 }
 0x739   :  { %v5132_v15 = vpop.eup %5131  ;;  %v2429_v0 = vadd.f32 %v5128_v22, %v2428_v32 }
 0x73a   :  { %v2448_v39 = vadd.f32 %v5130_v10, %v2447_v12  ;;  %v2465_v21 = vmul.f32 %v5132_v15, %v2463_v40  ;;  %v5134_v29 = vpop.eup %5133  ;;  %vm2470_vm4 = vweird.f32 %v5132_v15  ;;  %v2476_v34 = vor.u32 1.1754944e-38, %v2475_v49 }
 0x73b   :  { %v2433_v44 = vsel %vm2432_vm0, %v5128_v22, %v2429_v0  ;;  %v2473_v22 = vand.u32 2147483647, %v2463_v40  ;;  %vm2471_vm6 = vmor %vm2469_vm5, %vm2470_vm4  ;;  %v7288_v40 = vld [vmem:[#allocation25_spill] sm:$0xff] }
 0x73c   :  { %v2438_v6 = vsel %vm2435_vm2, %v2437_v20, %v2433_v44  ;;  %v2452_v2 = vsel %vm2451_vm1, %v5130_v10, %v2448_v39  ;;  %v2466_v56 = vsub.f32 1.0, %v2465_v21  ;;  %v2491_v0 = vunpack.c.h.bf16 %v7288_v40 }
 0x73d   :  { %v2457_v30 = vsel %vm2454_vm3, %v2456_v31, %v2452_v2  ;;  %v2480_v4 = vmul.f32 %v5134_v29, %v2438_v6  ;;  %vm2474_vm7 = vcmp.eq.f32.partialorder %v2473_v22, 8.507059e+37 }
 0x73e   :  { %v2479_v1 = vmul.f32 %v2457_v30, %v6734_v55  ;;  %v2467_v45 = vmul.f32 %v5132_v15, %v2466_v56  ;;  %v7289_v56 = vld [vmem:[#allocation7_spill] sm:$0xff] }
 0x73f   :  { %v2493_v30 = vunpack.c.h.bf16 %v7289_v56 }
 0x740   :  { %v6778_v36 = vadd.f32 %v2480_v4, %v2479_v1  ;;  %v2468_v43 = vadd.f32 %v5132_v15, %v2467_v45 }
 0x742   :  { %5135 = vtanh.f32 %v6778_v36  ;;  %v2472_v9 = vsel %vm2471_vm6, %v5132_v15, %v2468_v43  ;;  %v2490_v15 = vunpack.c.l.bf16 %v7288_v40 }
 0x743   :  { %v2477_v32 = vsel %vm2474_vm7, %v2476_v34, %v2472_v9 }
 0x748   :  { %v5136_v10 = vpop.eup %5135 }
 0x749   :  { %v2483_v18 = vmul.f32 %v5136_v10, %v2477_v32 }
 0x74b   :  { %v2484_v12 = vmax.f32 %v2483_v18, 0.0  ;;  %v2487_v59 = vpack.c.bf16 %v2483_v18, %v2483_v18 }
 0x74d   :  { %v2485_v55 = vpack.c.bf16 %v2484_v12, %v2484_v12  ;;  %2502 = vmatmul.bf16.vlgmr.msra.gmra.mxu0 %v2487_v59  ;;  %2515 = vmatmul.bf16.vlgmr.msra.gmra.mxu1 %v2487_v59 }
 0x74e   :  { %2528 = vmatmul.bf16.vlgmr.msra.gmra.mxu2 %v2487_v59  ;;  %2541 = vmatmul.bf16.vlgmr.msra.gmra.mxu3 %v2487_v59 }
 0x74f   :  { %2486 = vst [vmem:[#allocation3 + $0x4] sm:$0xf] %v2485_v55  ;;  %2752 = vmatpush.bf16.msra.mxu0 %v6429_v14  ;;  %2765 = vmatpush.bf16.msra.mxu1 %v6431_v50  ;;  %v2492_v55 = vunpack.c.l.bf16 %v7289_v56 }
 0x750   :  { %2778 = vmatpush.bf16.msra.mxu2 %v6436_v46  ;;  %2791 = vmatpush.bf16.msra.mxu3 %v6433_v23 }
 0x753   :  { %2753 = vmatpush.bf16.msra.mxu0 %v6442_v58  ;;  %2766 = vmatpush.bf16.msra.mxu1 %v6447_v52 }
 0x754   :  { %2779 = vmatpush.bf16.msra.mxu2 %v6462_v53  ;;  %2792 = vmatpush.bf16.msra.mxu3 %v6457_v27 }
 0x757   :  { %2754 = vmatpush.bf16.msra.mxu0 %v6460_v24  ;;  %2767 = vmatpush.bf16.msra.mxu1 %v6466_v61 }
 0x758   :  { %2780 = vmatpush.bf16.msra.mxu2 %v6516_v28  ;;  %2793 = vmatpush.bf16.msra.mxu3 %v6471_v19 }
 0x75b   :  { %2755 = vmatpush.bf16.msra.mxu0 %v6474_v13  ;;  %2768 = vmatpush.bf16.msra.mxu1 %v6480_v26 }
 0x75c   :  { %2781 = vmatpush.bf16.msra.mxu2 %v6529_v47  ;;  %2794 = vmatpush.bf16.msra.mxu3 %v6501_v38 }
 0x75f   :  { %2756 = vmatpush.bf16.msra.mxu0 %v6519_v62  ;;  %2769 = vmatpush.bf16.msra.mxu1 %v6521_v48 }
 0x760   :  { %2782 = vmatpush.bf16.msra.mxu2 %v6568_v16  ;;  %2795 = vmatpush.bf16.msra.mxu3 %v6527_v41 }
 0x763   :  { %2757 = vmatpush.bf16.msra.mxu0 %v6535_v8  ;;  %2770 = vmatpush.bf16.msra.mxu1 %v6542_v51 }
 0x764   :  { %2783 = vmatpush.bf16.msra.mxu2 %v6582_v33  ;;  %2796 = vmatpush.bf16.msra.mxu3 %v6559_v54 }
 0x767   :  { %2758 = vmatpush.bf16.msra.mxu0 %v6573_v25  ;;  %2771 = vmatpush.bf16.msra.mxu1 %v6578_v60 }
 0x768   :  { %2784 = vmatpush.bf16.msra.mxu2 %v6609_v57  ;;  %2797 = vmatpush.bf16.msra.mxu3 %v6584_v35 }
 0x76b   :  { %2759 = vmatpush.bf16.msra.mxu0 %v6589_v3  ;;  %2772 = vmatpush.bf16.msra.mxu1 %v6593_v11 }
 0x76c   :  { %2785 = vmatpush.bf16.msra.mxu2 %v6621_v7  ;;  %2798 = vmatpush.bf16.msra.mxu3 %v6611_v63 }
 0x7ca   :  { %v2503_v20 = vpop.f32.mrf.mxu0  ;;  %v2516_v39 = vpop.f32.mrf.mxu1 }
 0x7cb   :  { %v2504_v21 = vadd.f32 %v2503_v20, %v2490_v15  ;;  %v2517_v31 = vadd.f32 %v2516_v39, %v2491_v0 }
 0x7cd   :  { %v2546_v44 = vadd.f32 %v2504_v21, %v6718_v42  ;;  %v2547_v29 = vadd.f32 %v2517_v31, %v6720_v37 }
 0x7cf   :  { %v4498_v6 = vmul.f32 -1.442695, %v2546_v44  ;;  %v4499_v2 = vmul.f32 -1.442695, %v2547_v29 }
 0x7d1   :  { %5137 = vpow2.f32 %v4498_v6  ;;  %v2529_v4 = vpop.f32.mrf.mxu2  ;;  %v2542_v1 = vpop.f32.mrf.mxu3 }
 0x7d2   :  { %5139 = vpow2.f32 %v4499_v2  ;;  %v2543_v45 = vadd.f32 %v2542_v1, %v2493_v30  ;;  %v2505_v43 = vpop.f32.mrf.mxu0  ;;  %v2518_v49 = vpop.f32.mrf.mxu1  ;;  %v2530_v40 = vadd.f32 %v2529_v4, %v2492_v55 }
 0x7d4   :  { %v2549_v22 = vadd.f32 %v2543_v45, %v7286_v5  ;;  %v2548_v39 = vadd.f32 %v2530_v40, %v7287_v17 }
 0x7d6   :  { %v4500_v9 = vmul.f32 -1.442695, %v2549_v22 }
 0x7d7   :  { %v5138_v34 = vpop.eup %5137 }
 0x7d8   :  { %v5140_v10 = vpop.eup %5139  ;;  %v2553_v32 = vadd.f32 1.0, %v5138_v34  ;;  %5141 = vpow2.f32 %v4500_v9 }
 0x7d9   :  { %v2572_v18 = vadd.f32 1.0, %v5140_v10  ;;  %v2531_v12 = vpop.f32.mrf.mxu2  ;;  %v2544_v59 = vpop.f32.mrf.mxu3 }
 0x7da   :  { %5143 = vrcp.f32 %v2553_v32  ;;  %v2565_v2 = vand.u32 2147483648, %v2553_v32  ;;  %v2563_v45 = vand.u32 2147483647, %v2553_v32  ;;  %vm2559_vm10 = vweird.f32 %v2553_v32 }
 0x7db   :  { %5145 = vrcp.f32 %v2572_v18  ;;  %v2584_v30 = vand.u32 2147483648, %v2572_v18  ;;  %v2582_v4 = vand.u32 2147483647, %v2572_v18  ;;  %vm2578_vm11 = vweird.f32 %v2572_v18 }
 0x7dc   :  { %v2566_v22 = vor.u32 1.1754944e-38, %v2565_v2  ;;  %vm2564_vm14 = vcmp.eq.f32.partialorder %v2563_v45, 8.507059e+37 }
 0x7dd   :  { %v2585_v10 = vor.u32 1.1754944e-38, %v2584_v30  ;;  %vm2583_vm15 = vcmp.eq.f32.partialorder %v2582_v4, 8.507059e+37 }
 0x7de   :  { %v5142_v15 = vpop.eup %5141 }
 0x7df   :  { %v2592_v0 = vadd.f32 1.0, %v5142_v15 }
 0x7e0   :  { %v5144_v20 = vpop.eup %5143 }
 0x7e1   :  { %v5146_v21 = vpop.eup %5145  ;;  %v2555_v31 = vmul.f32 %v5144_v20, %v2553_v32  ;;  %5147 = vrcp.f32 %v2592_v0  ;;  %vm2560_vm8 = vweird.f32 %v5144_v20  ;;  %vm2598_vm1 = vweird.f32 %v2592_v0 }
 0x7e2   :  { %v2574_v44 = vmul.f32 %v5146_v21, %v2572_v18  ;;  %5149 = vtanh.f32 %v2548_v39  ;;  %vm2579_vm9 = vweird.f32 %v5146_v21  ;;  %vm2561_vm12 = vmor %vm2559_vm10, %vm2560_vm8 }
 0x7e3   :  { %v2556_v29 = vsub.f32 1.0, %v2555_v31  ;;  %vm2580_vm13 = vmor %vm2578_vm11, %vm2579_vm9 }
 0x7e4   :  { %v2575_v6 = vsub.f32 1.0, %v2574_v44 }
 0x7e5   :  { %v2557_v1 = vmul.f32 %v5144_v20, %v2556_v29 }
 0x7e6   :  { %v2576_v56 = vmul.f32 %v5146_v21, %v2575_v6  ;;  %v2604_v6 = vand.u32 2147483648, %v2592_v0 }
 0x7e7   :  { %v5148_v43 = vpop.eup %5147  ;;  %v2558_v49 = vadd.f32 %v5144_v20, %v2557_v1 }
 0x7e8   :  { %v2577_v9 = vadd.f32 %v5146_v21, %v2576_v56  ;;  %v2594_v34 = vmul.f32 %v5148_v43, %v2592_v0  ;;  %v5150_v59 = vpop.eup %5149  ;;  %vm2599_vm0 = vweird.f32 %v5148_v43  ;;  %v2605_v30 = vor.u32 1.1754944e-38, %v2604_v6 }
 0x7e9   :  { %v2562_v12 = vsel %vm2561_vm12, %v5144_v20, %v2558_v49  ;;  %v2602_v20 = vand.u32 2147483647, %v2592_v0  ;;  %vm2600_vm2 = vmor %vm2598_vm1, %vm2599_vm0  ;;  %v7290_v0 = vld [vmem:[#allocation9_spill] sm:$0xff] }
 0x7ea   :  { %v2567_v55 = vsel %vm2564_vm14, %v2566_v22, %v2562_v12  ;;  %v2581_v40 = vsel %vm2580_vm13, %v5146_v21, %v2577_v9  ;;  %v2595_v15 = vsub.f32 1.0, %v2594_v34 }
 0x7eb   :  { %v2586_v39 = vsel %vm2583_vm15, %v2585_v10, %v2581_v40  ;;  %v2609_v31 = vmul.f32 %v5150_v59, %v2567_v55  ;;  %vm2603_vm3 = vcmp.eq.f32.partialorder %v2602_v20, 8.507059e+37  ;;  %v7292_v55 = vld [vmem:[#allocation10_spill] sm:$0xff]  ;;  %v7293_v40 = vld [vmem:[#allocation11_spill] sm:$0xff] }
 0x7ec   :  { %v2608_v44 = vmul.f32 %v2586_v39, %v6778_v36  ;;  %v2596_v29 = vmul.f32 %v5148_v43, %v2595_v15  ;;  %v2003_v15 = vpack.c.bf16 %v7293_v40, %v7292_v55 }
 0x7ee   :  { %v6822_v32 = vadd.f32 %v2609_v31, %v2608_v44  ;;  %v2597_v18 = vadd.f32 %v5148_v43, %v2596_v29 }
 0x7f0   :  { %5151 = vtanh.f32 %v6822_v32  ;;  %v2601_v2 = vsel %vm2600_vm2, %v5148_v43, %v2597_v18  ;;  %v7291_v43 = vld [vmem:[#allocation8_spill] sm:$0xff]  ;;  %v2622_v18 = vunpack.c.h.bf16 %v2003_v15 }
 0x7f1   :  { %v2606_v1 = vsel %vm2603_vm3, %v2605_v30, %v2601_v2  ;;  %v2002_v49 = vpack.c.bf16 %v7291_v43, %v7290_v0 }
 0x7f3   :  { %v2619_v22 = vunpack.c.l.bf16 %v2002_v49  ;;  %v2620_v9 = vunpack.c.h.bf16 %v2002_v49 }
 0x7f6   :  { %v5152_v21 = vpop.eup %5151 }
 0x7f7   :  { %v2612_v45 = vmul.f32 %v5152_v21, %v2606_v1 }
 0x7f9   :  { %v2613_v56 = vmax.f32 %v2612_v45, 0.0  ;;  %v2616_v4 = vpack.c.bf16 %v2612_v45, %v2612_v45 }
 0x7fb   :  { %v2614_v36 = vpack.c.bf16 %v2613_v56, %v2613_v56  ;;  %2631 = vmatmul.bf16.vlgmr.msrb.gmra.mxu0 %v2616_v4  ;;  %2644 = vmatmul.bf16.vlgmr.msrb.gmra.mxu1 %v2616_v4 }
 0x7fc   :  { %2657 = vmatmul.bf16.vlgmr.msrb.gmra.mxu2 %v2616_v4  ;;  %2670 = vmatmul.bf16.vlgmr.msrb.gmra.mxu3 %v2616_v4 }
 0x7fd   :  { %2615 = vst [vmem:[#allocation3 + $0x8] sm:$0xf] %v2614_v36  ;;  %2881 = vmatpush.bf16.msrb.mxu0 %v6429_v14  ;;  %2894 = vmatpush.bf16.msrb.mxu1 %v6431_v50 }
 0x7fe   :  { %2907 = vmatpush.bf16.msrb.mxu2 %v6436_v46  ;;  %2920 = vmatpush.bf16.msrb.mxu3 %v6433_v23 }
 0x801   :  { %2882 = vmatpush.bf16.msrb.mxu0 %v6442_v58  ;;  %2895 = vmatpush.bf16.msrb.mxu1 %v6447_v52 }
 0x802   :  { %2908 = vmatpush.bf16.msrb.mxu2 %v6462_v53  ;;  %2921 = vmatpush.bf16.msrb.mxu3 %v6457_v27 }
 0x805   :  { %2883 = vmatpush.bf16.msrb.mxu0 %v6460_v24  ;;  %2896 = vmatpush.bf16.msrb.mxu1 %v6466_v61 }
 0x806   :  { %2909 = vmatpush.bf16.msrb.mxu2 %v6516_v28  ;;  %2922 = vmatpush.bf16.msrb.mxu3 %v6471_v19 }
 0x809   :  { %2884 = vmatpush.bf16.msrb.mxu0 %v6474_v13  ;;  %2897 = vmatpush.bf16.msrb.mxu1 %v6480_v26 }
 0x80a   :  { %2910 = vmatpush.bf16.msrb.mxu2 %v6529_v47  ;;  %2923 = vmatpush.bf16.msrb.mxu3 %v6501_v38 }
 0x80d   :  { %2885 = vmatpush.bf16.msrb.mxu0 %v6519_v62  ;;  %2898 = vmatpush.bf16.msrb.mxu1 %v6521_v48 }
 0x80e   :  { %2911 = vmatpush.bf16.msrb.mxu2 %v6568_v16  ;;  %2924 = vmatpush.bf16.msrb.mxu3 %v6527_v41 }
 0x811   :  { %2886 = vmatpush.bf16.msrb.mxu0 %v6535_v8  ;;  %2899 = vmatpush.bf16.msrb.mxu1 %v6542_v51 }
 0x812   :  { %2912 = vmatpush.bf16.msrb.mxu2 %v6582_v33  ;;  %2925 = vmatpush.bf16.msrb.mxu3 %v6559_v54 }
 0x815   :  { %2887 = vmatpush.bf16.msrb.mxu0 %v6573_v25  ;;  %2900 = vmatpush.bf16.msrb.mxu1 %v6578_v60 }
 0x816   :  { %2913 = vmatpush.bf16.msrb.mxu2 %v6609_v57  ;;  %2926 = vmatpush.bf16.msrb.mxu3 %v6584_v35 }
 0x819   :  { %2888 = vmatpush.bf16.msrb.mxu0 %v6589_v3  ;;  %2901 = vmatpush.bf16.msrb.mxu1 %v6593_v11 }
 0x81a   :  { %2914 = vmatpush.bf16.msrb.mxu2 %v6621_v7  ;;  %2927 = vmatpush.bf16.msrb.mxu3 %v6611_v63 }
 0x878   :  { %v2632_v34 = vpop.f32.mrf.mxu0  ;;  %v2645_v10 = vpop.f32.mrf.mxu1 }
 0x879   :  { %v2633_v12 = vadd.f32 %v2632_v34, %v2619_v22  ;;  %v2646_v59 = vadd.f32 %v2645_v10, %v2620_v9  ;;  %v2621_v22 = vunpack.c.l.bf16 %v2003_v15 }
 0x87b   :  { %v2675_v39 = vadd.f32 %v2633_v12, %v6718_v42  ;;  %v2676_v31 = vadd.f32 %v2646_v59, %v6720_v37 }
 0x87d   :  { %v4501_v44 = vmul.f32 -1.442695, %v2675_v39  ;;  %v4502_v29 = vmul.f32 -1.442695, %v2676_v31 }
 0x87f   :  { %5153 = vpow2.f32 %v4501_v44  ;;  %v2658_v6 = vpop.f32.mrf.mxu2  ;;  %v2671_v20 = vpop.f32.mrf.mxu3 }
 0x880   :  { %5155 = vpow2.f32 %v4502_v29  ;;  %v2672_v2 = vadd.f32 %v2671_v20, %v2622_v18  ;;  %v2634_v30 = vpop.f32.mrf.mxu0  ;;  %v2647_v21 = vpop.f32.mrf.mxu1  ;;  %v2659_v9 = vadd.f32 %v2658_v6, %v2621_v22 }
 0x882   :  { %v2678_v1 = vadd.f32 %v2672_v2, %v7286_v5  ;;  %v2677_v59 = vadd.f32 %v2659_v9, %v7287_v17 }
 0x884   :  { %v4503_v45 = vmul.f32 -1.442695, %v2678_v1 }
 0x885   :  { %v5154_v56 = vpop.eup %5153 }
 0x886   :  { %v5156_v4 = vpop.eup %5155  ;;  %v2682_v36 = vadd.f32 1.0, %v5154_v56  ;;  %5157 = vpow2.f32 %v4503_v45 }
 0x887   :  { %v2701_v0 = vadd.f32 1.0, %v5156_v4  ;;  %v2660_v43 = vpop.f32.mrf.mxu2  ;;  %v2673_v49 = vpop.f32.mrf.mxu3 }
 0x888   :  { %5159 = vrcp.f32 %v2682_v36  ;;  %v2694_v29 = vand.u32 2147483648, %v2682_v36  ;;  %v2692_v2 = vand.u32 2147483647, %v2682_v36  ;;  %vm2688_vm6 = vweird.f32 %v2682_v36 }
 0x889   :  { %5161 = vrcp.f32 %v2701_v0  ;;  %v2713_v18 = vand.u32 2147483648, %v2701_v0  ;;  %v2711_v6 = vand.u32 2147483647, %v2701_v0  ;;  %vm2707_vm7 = vweird.f32 %v2701_v0 }
 0x88a   :  { %v2695_v1 = vor.u32 1.1754944e-38, %v2694_v29  ;;  %vm2693_vm10 = vcmp.eq.f32.partialorder %v2692_v2, 8.507059e+37 }
 0x88b   :  { %v2714_v4 = vor.u32 1.1754944e-38, %v2713_v18  ;;  %vm2712_vm11 = vcmp.eq.f32.partialorder %v2711_v6, 8.507059e+37 }
 0x88c   :  { %v5158_v34 = vpop.eup %5157 }
 0x88d   :  { %v2721_v10 = vadd.f32 1.0, %v5158_v34 }
 0x88e   :  { %v5160_v12 = vpop.eup %5159 }
 0x88f   :  { %v5162_v55 = vpop.eup %5161  ;;  %v2684_v40 = vmul.f32 %v5160_v12, %v2682_v36  ;;  %5163 = vrcp.f32 %v2721_v10  ;;  %vm2689_vm4 = vweird.f32 %v5160_v12  ;;  %vm2727_vm13 = vweird.f32 %v2721_v10 }
 0x890   :  { %v2703_v39 = vmul.f32 %v5162_v55, %v2701_v0  ;;  %5165 = vtanh.f32 %v2677_v59  ;;  %vm2708_vm5 = vweird.f32 %v5162_v55  ;;  %vm2690_vm8 = vmor %vm2688_vm6, %vm2689_vm4 }
 0x891   :  { %v2685_v31 = vsub.f32 1.0, %v2684_v40  ;;  %vm2709_vm9 = vmor %vm2707_vm7, %vm2708_vm5 }
 0x892   :  { %v2704_v44 = vsub.f32 1.0, %v2703_v39 }
 0x893   :  { %v2686_v20 = vmul.f32 %v5160_v12, %v2685_v31 }
 0x894   :  { %v2705_v15 = vmul.f32 %v5162_v55, %v2704_v44  ;;  %v2733_v44 = vand.u32 2147483648, %v2721_v10 }
 0x895   :  { %v5164_v30 = vpop.eup %5163  ;;  %v2687_v21 = vadd.f32 %v5160_v12, %v2686_v20 }
 0x896   :  { %v2706_v45 = vadd.f32 %v5162_v55, %v2705_v15  ;;  %v2723_v56 = vmul.f32 %v5164_v30, %v2721_v10  ;;  %v5166_v49 = vpop.eup %5165  ;;  %vm2728_vm12 = vweird.f32 %v5164_v30  ;;  %v2734_v18 = vor.u32 1.1754944e-38, %v2733_v44 }
 0x897   :  { %v2691_v43 = vsel %vm2690_vm8, %v5160_v12, %v2687_v21  ;;  %v2731_v12 = vand.u32 2147483647, %v2721_v10  ;;  %vm2729_vm14 = vmor %vm2727_vm13, %vm2728_vm12  ;;  %v7294_v10 = vld [vmem:[#allocation12_spill] sm:$0xff] }
 0x898   :  { %v2696_v22 = vsel %vm2693_vm10, %v2695_v1, %v2691_v43  ;;  %v2710_v9 = vsel %vm2709_vm9, %v5162_v55, %v2706_v45  ;;  %v2724_v34 = vsub.f32 1.0, %v2723_v56  ;;  %v2749_v21 = vunpack.c.h.bf16 %v7294_v10 }
 0x899   :  { %v2715_v59 = vsel %vm2712_vm11, %v2714_v4, %v2710_v9  ;;  %v2738_v40 = vmul.f32 %v5166_v49, %v2696_v22  ;;  %vm2732_vm15 = vcmp.eq.f32.partialorder %v2731_v12, 8.507059e+37 }
 0x89a   :  { %v2737_v39 = vmul.f32 %v2715_v59, %v6822_v32  ;;  %v2725_v31 = vmul.f32 %v5164_v30, %v2724_v34  ;;  %v7295_v34 = vld [vmem:[#allocation13_spill] sm:$0xff] }
 0x89b   :  { %v2751_v59 = vunpack.c.h.bf16 %v7295_v34 }
 0x89c   :  { %v6866_v36 = vadd.f32 %v2738_v40, %v2737_v39  ;;  %v2726_v0 = vadd.f32 %v5164_v30, %v2725_v31 }
 0x89e   :  { %5167 = vtanh.f32 %v6866_v36  ;;  %v2730_v29 = vsel %vm2729_vm14, %v5164_v30, %v2726_v0  ;;  %v2748_v30 = vunpack.c.l.bf16 %v7294_v10 }
 0x89f   :  { %v2735_v20 = vsel %vm2732_vm15, %v2734_v18, %v2730_v29 }
 0x8a4   :  { %v5168_v55 = vpop.eup %5167 }
 0x8a5   :  { %v2741_v2 = vmul.f32 %v5168_v55, %v2735_v20 }
 0x8a7   :  { %v2742_v15 = vmax.f32 %v2741_v2, 0.0  ;;  %v2745_v6 = vpack.c.bf16 %v2741_v2, %v2741_v2 }
 0x8a9   :  { %v2743_v32 = vpack.c.bf16 %v2742_v15, %v2742_v15  ;;  %2760 = vmatmul.bf16.vlgmr.msra.gmra.mxu0 %v2745_v6  ;;  %2773 = vmatmul.bf16.vlgmr.msra.gmra.mxu1 %v2745_v6 }
 0x8aa   :  { %2786 = vmatmul.bf16.vlgmr.msra.gmra.mxu2 %v2745_v6  ;;  %2799 = vmatmul.bf16.vlgmr.msra.gmra.mxu3 %v2745_v6 }
 0x8ab   :  { %2744 = vst [vmem:[#allocation3 + $0xc] sm:$0xf] %v2743_v32  ;;  %3010 = vmatpush.bf16.msra.mxu0 %v6429_v14  ;;  %3023 = vmatpush.bf16.msra.mxu1 %v6431_v50  ;;  %v2750_v32 = vunpack.c.l.bf16 %v7295_v34 }
 0x8ac   :  { %3036 = vmatpush.bf16.msra.mxu2 %v6436_v46  ;;  %3049 = vmatpush.bf16.msra.mxu3 %v6433_v23 }
 0x8af   :  { %3011 = vmatpush.bf16.msra.mxu0 %v6442_v58  ;;  %3024 = vmatpush.bf16.msra.mxu1 %v6447_v52 }
 0x8b0   :  { %3037 = vmatpush.bf16.msra.mxu2 %v6462_v53  ;;  %3050 = vmatpush.bf16.msra.mxu3 %v6457_v27 }
 0x8b3   :  { %3012 = vmatpush.bf16.msra.mxu0 %v6460_v24  ;;  %3025 = vmatpush.bf16.msra.mxu1 %v6466_v61 }
 0x8b4   :  { %3038 = vmatpush.bf16.msra.mxu2 %v6516_v28  ;;  %3051 = vmatpush.bf16.msra.mxu3 %v6471_v19 }
 0x8b7   :  { %3013 = vmatpush.bf16.msra.mxu0 %v6474_v13  ;;  %3026 = vmatpush.bf16.msra.mxu1 %v6480_v26 }
 0x8b8   :  { %3039 = vmatpush.bf16.msra.mxu2 %v6529_v47  ;;  %3052 = vmatpush.bf16.msra.mxu3 %v6501_v38 }
 0x8bb   :  { %3014 = vmatpush.bf16.msra.mxu0 %v6519_v62  ;;  %3027 = vmatpush.bf16.msra.mxu1 %v6521_v48 }
 0x8bc   :  { %3040 = vmatpush.bf16.msra.mxu2 %v6568_v16  ;;  %3053 = vmatpush.bf16.msra.mxu3 %v6527_v41 }
 0x8bf   :  { %3015 = vmatpush.bf16.msra.mxu0 %v6535_v8  ;;  %3028 = vmatpush.bf16.msra.mxu1 %v6542_v51 }
 0x8c0   :  { %3041 = vmatpush.bf16.msra.mxu2 %v6582_v33  ;;  %3054 = vmatpush.bf16.msra.mxu3 %v6559_v54 }
 0x8c3   :  { %3016 = vmatpush.bf16.msra.mxu0 %v6573_v25  ;;  %3029 = vmatpush.bf16.msra.mxu1 %v6578_v60 }
 0x8c4   :  { %3042 = vmatpush.bf16.msra.mxu2 %v6609_v57  ;;  %3055 = vmatpush.bf16.msra.mxu3 %v6584_v35 }
 0x8c7   :  { %3017 = vmatpush.bf16.msra.mxu0 %v6589_v3  ;;  %3030 = vmatpush.bf16.msra.mxu1 %v6593_v11 }
 0x8c8   :  { %3043 = vmatpush.bf16.msra.mxu2 %v6621_v7  ;;  %3056 = vmatpush.bf16.msra.mxu3 %v6611_v63 }
 0x926   :  { %v2761_v1 = vpop.f32.mrf.mxu0  ;;  %v2774_v45 = vpop.f32.mrf.mxu1 }
 0x927   :  { %v2762_v56 = vadd.f32 %v2761_v1, %v2748_v30  ;;  %v2775_v4 = vadd.f32 %v2774_v45, %v2749_v21 }
 0x929   :  { %v2804_v43 = vadd.f32 %v2762_v56, %v6718_v42  ;;  %v2805_v49 = vadd.f32 %v2775_v4, %v6720_v37 }
 0x92b   :  { %v4504_v22 = vmul.f32 -1.442695, %v2804_v43  ;;  %v4505_v9 = vmul.f32 -1.442695, %v2805_v49 }
 0x92d   :  { %5169 = vpow2.f32 %v4504_v22  ;;  %v2787_v40 = vpop.f32.mrf.mxu2  ;;  %v2800_v39 = vpop.f32.mrf.mxu3 }
 0x92e   :  { %5171 = vpow2.f32 %v4505_v9  ;;  %v2801_v31 = vadd.f32 %v2800_v39, %v2751_v59  ;;  %v2763_v0 = vpop.f32.mrf.mxu0  ;;  %v2776_v44 = vpop.f32.mrf.mxu1  ;;  %v2788_v10 = vadd.f32 %v2787_v40, %v2750_v32 }
 0x930   :  { %v2807_v12 = vadd.f32 %v2801_v31, %v7286_v5  ;;  %v2806_v45 = vadd.f32 %v2788_v10, %v7287_v17 }
 0x932   :  { %v4506_v29 = vmul.f32 -1.442695, %v2807_v12 }
 0x933   :  { %v5170_v18 = vpop.eup %5169 }
 0x934   :  { %v5172_v55 = vpop.eup %5171  ;;  %v2811_v20 = vadd.f32 1.0, %v5170_v18  ;;  %5173 = vpow2.f32 %v4506_v29 }
 0x935   :  { %v2830_v2 = vadd.f32 1.0, %v5172_v55  ;;  %v2789_v15 = vpop.f32.mrf.mxu2  ;;  %v2802_v6 = vpop.f32.mrf.mxu3 }
 0x936   :  { %5175 = vrcp.f32 %v2811_v20  ;;  %v2823_v9 = vand.u32 2147483648, %v2811_v20  ;;  %v2821_v31 = vand.u32 2147483647, %v2811_v20  ;;  %vm2817_vm2 = vweird.f32 %v2811_v20 }
 0x937   :  { %5177 = vrcp.f32 %v2830_v2  ;;  %v2842_v59 = vand.u32 2147483648, %v2830_v2  ;;  %v2840_v40 = vand.u32 2147483647, %v2830_v2  ;;  %vm2836_vm3 = vweird.f32 %v2830_v2 }
 0x938   :  { %v2824_v12 = vor.u32 1.1754944e-38, %v2823_v9  ;;  %vm2822_vm6 = vcmp.eq.f32.partialorder %v2821_v31, 8.507059e+37 }
 0x939   :  { %v2843_v55 = vor.u32 1.1754944e-38, %v2842_v59  ;;  %vm2841_vm7 = vcmp.eq.f32.partialorder %v2840_v40, 8.507059e+37 }
 0x93a   :  { %v5174_v30 = vpop.eup %5173 }
 0x93b   :  { %v2850_v21 = vadd.f32 1.0, %v5174_v30 }
 0x93c   :  { %v5176_v1 = vpop.eup %5175 }
 0x93d   :  { %v5178_v56 = vpop.eup %5177  ;;  %v2813_v4 = vmul.f32 %v5176_v1, %v2811_v20  ;;  %5179 = vrcp.f32 %v2850_v21  ;;  %vm2818_vm0 = vweird.f32 %v5176_v1  ;;  %vm2856_vm9 = vweird.f32 %v2850_v21 }
 0x93e   :  { %v2832_v43 = vmul.f32 %v5178_v56, %v2830_v2  ;;  %5181 = vtanh.f32 %v2806_v45  ;;  %vm2837_vm1 = vweird.f32 %v5178_v56  ;;  %vm2819_vm4 = vmor %vm2817_vm2, %vm2818_vm0 }
 0x93f   :  { %v2814_v49 = vsub.f32 1.0, %v2813_v4  ;;  %vm2838_vm5 = vmor %vm2836_vm3, %vm2837_vm1 }
 0x940   :  { %v2833_v22 = vsub.f32 1.0, %v2832_v43 }
 0x941   :  { %v2815_v39 = vmul.f32 %v5176_v1, %v2814_v49 }
 0x942   :  { %v2834_v34 = vmul.f32 %v5178_v56, %v2833_v22  ;;  %v2862_v22 = vand.u32 2147483648, %v2850_v21 }
 0x943   :  { %v5180_v0 = vpop.eup %5179  ;;  %v2816_v44 = vadd.f32 %v5176_v1, %v2815_v39 }
 0x944   :  { %v2835_v29 = vadd.f32 %v5178_v56, %v2834_v34  ;;  %v2852_v18 = vmul.f32 %v5180_v0, %v2850_v21  ;;  %v5182_v6 = vpop.eup %5181  ;;  %vm2857_vm8 = vweird.f32 %v5180_v0  ;;  %v2863_v59 = vor.u32 1.1754944e-38, %v2862_v22 }
 0x945   :  { %v2820_v15 = vsel %vm2819_vm4, %v5176_v1, %v2816_v44  ;;  %v2860_v1 = vand.u32 2147483647, %v2850_v21  ;;  %vm2858_vm10 = vmor %vm2856_vm9, %vm2857_vm8 }
 0x946   :  { %v2825_v32 = vsel %vm2822_vm6, %v2824_v12, %v2820_v15  ;;  %v2839_v10 = vsel %vm2838_vm5, %v5178_v56, %v2835_v29  ;;  %v2853_v30 = vsub.f32 1.0, %v2852_v18 }
 0x947   :  { %v2844_v45 = vsel %vm2841_vm7, %v2843_v55, %v2839_v10  ;;  %v2867_v4 = vmul.f32 %v5182_v6, %v2825_v32  ;;  %vm2861_vm11 = vcmp.eq.f32.partialorder %v2860_v1, 8.507059e+37 }
 0x948   :  { %v2866_v43 = vmul.f32 %v2844_v45, %v6866_v36  ;;  %v2854_v49 = vmul.f32 %v5180_v0, %v2853_v30 }
 0x94a   :  { %v6910_v20 = vadd.f32 %v2867_v4, %v2866_v43  ;;  %v2855_v2 = vadd.f32 %v5180_v0, %v2854_v49 }
 0x94c   :  { %5183 = vtanh.f32 %v6910_v20  ;;  %v2859_v9 = vsel %vm2858_vm10, %v5180_v0, %v2855_v2 }
 0x94d   :  { %v2864_v39 = vsel %vm2861_vm11, %v2863_v59, %v2859_v9 }
 0x952   :  { %v5184_v56 = vpop.eup %5183 }
 0x953   :  { %v2870_v31 = vmul.f32 %v5184_v56, %v2864_v39 }
 0x955   :  { %v2871_v34 = vmax.f32 %v2870_v31, 0.0  ;;  %v2874_v40 = vpack.c.bf16 %v2870_v31, %v2870_v31 }
 0x957   :  { %v2872_v36 = vpack.c.bf16 %v2871_v34, %v2871_v34  ;;  %2889 = vmatmul.bf16.vlgmr.msrb.gmra.mxu0 %v2874_v40  ;;  %2902 = vmatmul.bf16.vlgmr.msrb.gmra.mxu1 %v2874_v40 }
 0x958   :  { %2915 = vmatmul.bf16.vlgmr.msrb.gmra.mxu2 %v2874_v40  ;;  %2928 = vmatmul.bf16.vlgmr.msrb.gmra.mxu3 %v2874_v40 }
 0x959   :  { %2873 = vst [vmem:[#allocation3 + $0x10] sm:$0xf] %v2872_v36  ;;  %3139 = vmatpush.bf16.msrb.mxu0 %v6429_v14  ;;  %3152 = vmatpush.bf16.msrb.mxu1 %v6431_v50  ;;  %v7296_v14 = vld [vmem:[#allocation15_spill] sm:$0xff]  ;;  %v7297_v50 = vld [vmem:[#allocation14_spill] sm:$0xff] }
 0x95a   :  { %3165 = vmatpush.bf16.msrb.mxu2 %v6436_v46  ;;  %3178 = vmatpush.bf16.msrb.mxu3 %v6433_v23  ;;  %v2006_v23 = vpack.c.bf16 %v7297_v50, %v7296_v14 }
 0x95c   :  { %v2877_v46 = vunpack.c.l.bf16 %v2006_v23 }
 0x95d   :  { %3140 = vmatpush.bf16.msrb.mxu0 %v6442_v58  ;;  %3153 = vmatpush.bf16.msrb.mxu1 %v6447_v52  ;;  %v2878_v58 = vunpack.c.h.bf16 %v2006_v23 }
 0x95e   :  { %3166 = vmatpush.bf16.msrb.mxu2 %v6462_v53  ;;  %3179 = vmatpush.bf16.msrb.mxu3 %v6457_v27 }
 0x961   :  { %3141 = vmatpush.bf16.msrb.mxu0 %v6460_v24  ;;  %3154 = vmatpush.bf16.msrb.mxu1 %v6466_v61  ;;  %v7298_v61 = vld [vmem:[#allocation16_spill] sm:$0xff] }
 0x962   :  { %3167 = vmatpush.bf16.msrb.mxu2 %v6516_v28  ;;  %3180 = vmatpush.bf16.msrb.mxu3 %v6471_v19  ;;  %v7299_v19 = vld [vmem:[#allocation17_spill] sm:$0xff] }
 0x965   :  { %3142 = vmatpush.bf16.msrb.mxu0 %v6474_v13  ;;  %3155 = vmatpush.bf16.msrb.mxu1 %v6480_v26  ;;  %v2007_v13 = vpack.c.bf16 %v7299_v19, %v7298_v61 }
 0x966   :  { %3168 = vmatpush.bf16.msrb.mxu2 %v6529_v47  ;;  %3181 = vmatpush.bf16.msrb.mxu3 %v6501_v38 }
 0x969   :  { %3143 = vmatpush.bf16.msrb.mxu0 %v6519_v62  ;;  %3156 = vmatpush.bf16.msrb.mxu1 %v6521_v48  ;;  %v2880_v48 = vunpack.c.h.bf16 %v2007_v13 }
 0x96a   :  { %3169 = vmatpush.bf16.msrb.mxu2 %v6568_v16  ;;  %3182 = vmatpush.bf16.msrb.mxu3 %v6527_v41 }
 0x96d   :  { %3144 = vmatpush.bf16.msrb.mxu0 %v6535_v8  ;;  %3157 = vmatpush.bf16.msrb.mxu1 %v6542_v51 }
 0x96e   :  { %3170 = vmatpush.bf16.msrb.mxu2 %v6582_v33  ;;  %3183 = vmatpush.bf16.msrb.mxu3 %v6559_v54 }
 0x971   :  { %3145 = vmatpush.bf16.msrb.mxu0 %v6573_v25  ;;  %3158 = vmatpush.bf16.msrb.mxu1 %v6578_v60 }
 0x972   :  { %3171 = vmatpush.bf16.msrb.mxu2 %v6609_v57  ;;  %3184 = vmatpush.bf16.msrb.mxu3 %v6584_v35 }
 0x975   :  { %3146 = vmatpush.bf16.msrb.mxu0 %v6589_v3  ;;  %3159 = vmatpush.bf16.msrb.mxu1 %v6593_v11 }
 0x976   :  { %3172 = vmatpush.bf16.msrb.mxu2 %v6621_v7  ;;  %3185 = vmatpush.bf16.msrb.mxu3 %v6611_v63  ;;  %v2879_v63 = vunpack.c.l.bf16 %v2007_v13 }
 0x9d4   :  { %v2890_v52 = vpop.f32.mrf.mxu0  ;;  %v2903_v27 = vpop.f32.mrf.mxu1 }
 0x9d5   :  { %v2891_v24 = vadd.f32 %v2890_v52, %v2877_v46  ;;  %v2904_v53 = vadd.f32 %v2903_v27, %v2878_v58 }
 0x9d7   :  { %v2933_v26 = vadd.f32 %v2891_v24, %v6718_v42  ;;  %v2934_v38 = vadd.f32 %v2904_v53, %v6720_v37 }
 0x9d9   :  { %v4507_v28 = vmul.f32 -1.442695, %v2933_v26  ;;  %v4508_v62 = vmul.f32 -1.442695, %v2934_v38 }
 0x9db   :  { %5185 = vpow2.f32 %v4507_v28  ;;  %v2916_v41 = vpop.f32.mrf.mxu2  ;;  %v2929_v47 = vpop.f32.mrf.mxu3  ;;  %v4915_v28 = vld [vmem:[%s7194_s8 + $0x38] sm:$0xff] }
 0x9dc   :  { %5187 = vpow2.f32 %v4508_v62  ;;  %v2930_v8 = vadd.f32 %v2929_v47, %v2880_v48  ;;  %v2892_v51 = vpop.f32.mrf.mxu0  ;;  %v2905_v54 = vpop.f32.mrf.mxu1  ;;  %v2917_v7 = vadd.f32 %v2916_v41, %v2879_v63  ;;  %v4923_v62 = vld [vmem:[%s7194_s8 + $0x78] sm:$0xff]  ;;  %v4914_v41 = vld [vmem:[%s7194_s8 + $0x30] sm:$0xff]  ;;  %v4928_v63 = vld [vmem:[%s7194_s8 + $0xa0] sm:$0xff] }
 0x9dd   :  { %v4931_v48 = vld [vmem:[%s7194_s8 + $0xb8] sm:$0xff]  ;;  %v4922_v47 = vld [vmem:[%s7194_s8 + $0x70] sm:$0xff]  ;;  %v4913_v51 = vld [vmem:[%s7194_s8 + $0x28] sm:$0xff] }
 0x9de   :  { %v2936_v16 = vadd.f32 %v2930_v8, %v7286_v5  ;;  %v2935_v12 = vadd.f32 %v2917_v7, %v7287_v17  ;;  %v4930_v8 = vld [vmem:[%s7194_s8 + $0xb0] sm:$0xff]  ;;  %v4921_v54 = vld [vmem:[%s7194_s8 + $0x68] sm:$0xff] }
 0x9e0   :  { %v4509_v25 = vmul.f32 -1.442695, %v2936_v16  ;;  %v4929_v16 = vld [vmem:[%s7194_s8 + $0xa8] sm:$0xff] }
 0x9e1   :  { %v5186_v60 = vpop.eup %5185 }
 0x9e2   :  { %v5188_v33 = vpop.eup %5187  ;;  %v2940_v35 = vadd.f32 1.0, %v5186_v60  ;;  %5189 = vpow2.f32 %v4509_v25  ;;  %v7300_v25 = vld [vmem:[#allocation18_spill] sm:$0xff] }
 0x9e3   :  { %v2959_v3 = vadd.f32 1.0, %v5188_v33  ;;  %v2918_v11 = vpop.f32.mrf.mxu2  ;;  %v2931_v57 = vpop.f32.mrf.mxu3  ;;  %v3006_v60 = vunpack.c.l.bf16 %v7300_v25  ;;  %v3007_v33 = vunpack.c.h.bf16 %v7300_v25 }
 0x9e4   :  { %5191 = vrcp.f32 %v2940_v35  ;;  %v2952_v32 = vand.u32 2147483648, %v2940_v35  ;;  %v2950_v45 = vand.u32 2147483647, %v2940_v35  ;;  %vm2946_vm14 = vweird.f32 %v2940_v35  ;;  %v4912_v11 = vld [vmem:[%s7194_s8 + $0x20] sm:$0xff] }
 0x9e5   :  { %5193 = vrcp.f32 %v2959_v3  ;;  %v2971_v10 = vand.u32 2147483648, %v2959_v3  ;;  %v2969_v43 = vand.u32 2147483647, %v2959_v3  ;;  %vm2965_vm15 = vweird.f32 %v2959_v3  ;;  %v4920_v57 = vld [vmem:[%s7194_s8 + $0x60] sm:$0xff] }
 0x9e6   :  { %v2953_v22 = vor.u32 1.1754944e-38, %v2952_v32  ;;  %vm2951_vm2 = vcmp.eq.f32.partialorder %v2950_v45, 8.507059e+37  ;;  %v4938_v32 = vld [vmem:[%s7194_s8 + $0xf0] sm:$0xff] }
 0x9e7   :  { %v2972_v59 = vor.u32 1.1754944e-38, %v2971_v10  ;;  %vm2970_vm3 = vcmp.eq.f32.partialorder %v2969_v43, 8.507059e+37  ;;  %v7301_v10 = vld [vmem:[#allocation19_spill] sm:$0xff]  ;;  %v4910_v45 = vld [vmem:[%s7194_s8 + $0x10] sm:$0xff] }
 0x9e8   :  { %v5190_v21 = vpop.eup %5189 }
 0x9e9   :  { %v2979_v0 = vadd.f32 1.0, %v5190_v21 }
 0x9ea   :  { %v5192_v44 = vpop.eup %5191 }
 0x9eb   :  { %v5194_v29 = vpop.eup %5193  ;;  %v2942_v18 = vmul.f32 %v5192_v44, %v2940_v35  ;;  %5195 = vrcp.f32 %v2979_v0  ;;  %vm2947_vm12 = vweird.f32 %v5192_v44  ;;  %v2991_v52 = vand.u32 2147483648, %v2979_v0 }
 0x9ec   :  { %v2961_v55 = vmul.f32 %v5194_v29, %v2959_v3  ;;  %5197 = vtanh.f32 %v2935_v12  ;;  %vm2966_vm13 = vweird.f32 %v5194_v29  ;;  %vm2948_vm0 = vmor %vm2946_vm14, %vm2947_vm12  ;;  %vm2985_vm5 = vweird.f32 %v2979_v0 }
 0x9ed   :  { %v2943_v15 = vsub.f32 1.0, %v2942_v18  ;;  %vm2967_vm1 = vmor %vm2965_vm15, %vm2966_vm13  ;;  %v2989_v27 = vand.u32 2147483647, %v2979_v0  ;;  %v2992_v53 = vor.u32 1.1754944e-38, %v2991_v52  ;;  %v4919_v18 = vld [vmem:[%s7194_s8 + $0x58] sm:$0xff] }
 0x9ee   :  { %v2962_v6 = vsub.f32 1.0, %v2961_v55  ;;  %v4927_v55 = vld [vmem:[%s7194_s8 + $0x98] sm:$0xff] }
 0x9ef   :  { %v2944_v30 = vmul.f32 %v5192_v44, %v2943_v15  ;;  %vm2990_vm7 = vcmp.eq.f32.partialorder %v2989_v27, 8.507059e+37 }
 0x9f0   :  { %v2963_v4 = vmul.f32 %v5194_v29, %v2962_v6 }
 0x9f1   :  { %v5196_v49 = vpop.eup %5195  ;;  %v2945_v2 = vadd.f32 %v5192_v44, %v2944_v30  ;;  %v3009_v30 = vunpack.c.h.bf16 %v7301_v10 }
 0x9f2   :  { %v2964_v1 = vadd.f32 %v5194_v29, %v2963_v4  ;;  %v2981_v9 = vmul.f32 %v5196_v49, %v2979_v0  ;;  %v5198_v39 = vpop.eup %5197  ;;  %vm2986_vm4 = vweird.f32 %v5196_v49  ;;  %v4939_v0 = vld [vmem:[%s7194_s8 + $0xf8] sm:$0xff]  ;;  %v4918_v4 = vld [vmem:[%s7194_s8 + $0x50] sm:$0xff] }
 0x9f3   :  { %v2949_v56 = vsel %vm2948_vm0, %v5192_v44, %v2945_v2  ;;  %vm2987_vm6 = vmor %vm2985_vm5, %vm2986_vm4  ;;  %v4926_v2 = vld [vmem:[%s7194_s8 + $0x90] sm:$0xff] }
 0x9f4   :  { %v2954_v31 = vsel %vm2951_vm2, %v2953_v22, %v2949_v56  ;;  %v2968_v34 = vsel %vm2967_vm1, %v5194_v29, %v2964_v1  ;;  %v2982_v40 = vsub.f32 1.0, %v2981_v9  ;;  %v4911_v29 = vld [vmem:[%s7194_s8 + $0x18] sm:$0xff]  ;;  %v4937_v22 = vld [vmem:[%s7194_s8 + $0xe8] sm:$0xff] }
 0x9f5   :  { %v2973_v36 = vsel %vm2970_vm3, %v2972_v59, %v2968_v34  ;;  %v2996_v14 = vmul.f32 %v5198_v39, %v2954_v31  ;;  %v4909_v39 = vld [vmem:[%s7194_s8 + $0x8] sm:$0xff] }
 0x9f6   :  { %v2995_v50 = vmul.f32 %v2973_v36, %v6910_v20  ;;  %v2983_v23 = vmul.f32 %v5196_v49, %v2982_v40  ;;  %v4917_v31 = vld [vmem:[%s7194_s8 + $0x48] sm:$0xff]  ;;  %v4936_v40 = vld [vmem:[%s7194_s8 + $0xe0] sm:$0xff] }
 0x9f7   :  { %v4925_v34 = vld [vmem:[%s7194_s8 + $0x88] sm:$0xff] }
 0x9f8   :  { %v6954_v46 = vadd.f32 %v2996_v14, %v2995_v50  ;;  %v2984_v58 = vadd.f32 %v5196_v49, %v2983_v23 }
 0x9fa   :  { %5199 = vtanh.f32 %v6954_v46  ;;  %v2988_v24 = vsel %vm2987_vm6, %v5196_v49, %v2984_v58 }
 0x9fb   :  { %v2993_v19 = vsel %vm2990_vm7, %v2992_v53, %v2988_v24  ;;  %v3008_v24 = vunpack.c.l.bf16 %v7301_v10  ;;  %v4908_v53 = vld [vmem:[%s7194_s8] sm:$0xff] }
 0xa00   :  { %v5200_v61 = vpop.eup %5199 }
 0xa01   :  { %v2999_v13 = vmul.f32 %v5200_v61, %v2993_v19  ;;  %v4916_v61 = vld [vmem:[%s7194_s8 + $0x40] sm:$0xff] }
 0xa02   :  { %v4924_v19 = vld [vmem:[%s7194_s8 + $0x80] sm:$0xff] }
 0xa03   :  { %v3000_v26 = vmax.f32 %v2999_v13, 0.0  ;;  %v3003_v38 = vpack.c.bf16 %v2999_v13, %v2999_v13  ;;  %v4935_v13 = vld [vmem:[%s7194_s8 + $0xd8] sm:$0xff] }
 0xa05   :  { %v3001_v20 = vpack.c.bf16 %v3000_v26, %v3000_v26  ;;  %3018 = vmatmul.bf16.vlgmr.msra.gmra.mxu0 %v3003_v38  ;;  %3031 = vmatmul.bf16.vlgmr.msra.gmra.mxu1 %v3003_v38 }
 0xa06   :  { %3044 = vmatmul.bf16.vlgmr.msra.gmra.mxu2 %v3003_v38  ;;  %3057 = vmatmul.bf16.vlgmr.msra.gmra.mxu3 %v3003_v38 }
 0xa07   :  { %3002 = vst [vmem:[#allocation3 + $0x14] sm:$0xf] %v3001_v20  ;;  %3782 = vmatpush.bf16.msra.mxu0 %v4915_v28  ;;  %3795 = vmatpush.bf16.msra.mxu1 %v4923_v62  ;;  %v4934_v20 = vld [vmem:[%s7194_s8 + $0xd0] sm:$0xff] }
 0xa08   :  { %3808 = vmatpush.bf16.msra.mxu2 %v4931_v48  ;;  %3821 = vmatpush.bf16.msra.mxu3 %v4939_v0 }
 0xa0b   :  { %3783 = vmatpush.bf16.msra.mxu0 %v4914_v41  ;;  %3796 = vmatpush.bf16.msra.mxu1 %v4922_v47 }
 0xa0c   :  { %3809 = vmatpush.bf16.msra.mxu2 %v4930_v8  ;;  %3822 = vmatpush.bf16.msra.mxu3 %v4938_v32 }
 0xa0f   :  { %3784 = vmatpush.bf16.msra.mxu0 %v4913_v51  ;;  %3797 = vmatpush.bf16.msra.mxu1 %v4921_v54  ;;  %v4933_v51 = vld [vmem:[%s7194_s8 + $0xc8] sm:$0xff] }
 0xa10   :  { %3810 = vmatpush.bf16.msra.mxu2 %v4929_v16  ;;  %3823 = vmatpush.bf16.msra.mxu3 %v4937_v22 }
 0xa13   :  { %3785 = vmatpush.bf16.msra.mxu0 %v4912_v11  ;;  %3798 = vmatpush.bf16.msra.mxu1 %v4920_v57  ;;  %v4932_v57 = vld [vmem:[%s7194_s8 + $0xc0] sm:$0xff] }
 0xa14   :  { %3811 = vmatpush.bf16.msra.mxu2 %v4928_v63  ;;  %3824 = vmatpush.bf16.msra.mxu3 %v4936_v40  ;;  %v4963_v40 = vld [vmem:[%s7194_s8 + $0x1b8] sm:$0xff] }
 0xa17   :  { %3786 = vmatpush.bf16.msra.mxu0 %v4911_v29  ;;  %3799 = vmatpush.bf16.msra.mxu1 %v4919_v18 }
 0xa18   :  { %3812 = vmatpush.bf16.msra.mxu2 %v4927_v55  ;;  %3825 = vmatpush.bf16.msra.mxu3 %v4935_v13  ;;  %v4951_v13 = vld [vmem:[%s7194_s8 + $0x158] sm:$0xff] }
 0xa1b   :  { %3787 = vmatpush.bf16.msra.mxu0 %v4910_v45  ;;  %3800 = vmatpush.bf16.msra.mxu1 %v4918_v4 }
 0xa1c   :  { %3813 = vmatpush.bf16.msra.mxu2 %v4926_v2  ;;  %3826 = vmatpush.bf16.msra.mxu3 %v4934_v20  ;;  %v4959_v20 = vld [vmem:[%s7194_s8 + $0x198] sm:$0xff] }
 0xa1f   :  { %3788 = vmatpush.bf16.msra.mxu0 %v4909_v39  ;;  %3801 = vmatpush.bf16.msra.mxu1 %v4917_v31 }
 0xa20   :  { %3814 = vmatpush.bf16.msra.mxu2 %v4925_v34  ;;  %3827 = vmatpush.bf16.msra.mxu3 %v4933_v51  ;;  %v4955_v34 = vld [vmem:[%s7194_s8 + $0x178] sm:$0xff]  ;;  %v4949_v51 = vld [vmem:[%s7194_s8 + $0x148] sm:$0xff] }
 0xa23   :  { %3789 = vmatpush.bf16.msra.mxu0 %v4908_v53  ;;  %3802 = vmatpush.bf16.msra.mxu1 %v4916_v61  ;;  %v4952_v53 = vld [vmem:[%s7194_s8 + $0x160] sm:$0xff] }
 0xa24   :  { %3815 = vmatpush.bf16.msra.mxu2 %v4924_v19  ;;  %3828 = vmatpush.bf16.msra.mxu3 %v4932_v57  ;;  %v4960_v61 = vld [vmem:[%s7194_s8 + $0x1a0] sm:$0xff]  ;;  %v4943_v19 = vld [vmem:[%s7194_s8 + $0x118] sm:$0xff]  ;;  %v7302_v57 = vld [vmem:[#allocation21_spill] sm:$0xff] }
 0xa82   :  { %v3019_v35 = vpop.f32.mrf.mxu0  ;;  %v3032_v3 = vpop.f32.mrf.mxu1 }
 0xa83   :  { %v3020_v7 = vadd.f32 %v3019_v35, %v3006_v60  ;;  %v3033_v21 = vadd.f32 %v3032_v3, %v3007_v33 }
 0xa85   :  { %v3062_v44 = vadd.f32 %v3020_v7, %v6718_v42  ;;  %v3063_v12 = vadd.f32 %v3033_v21, %v6720_v37 }
 0xa87   :  { %v4510_v15 = vmul.f32 -1.442695, %v3062_v44  ;;  %v4511_v6 = vmul.f32 -1.442695, %v3063_v12 }
 0xa89   :  { %5201 = vpow2.f32 %v4510_v15  ;;  %v3045_v43 = vpop.f32.mrf.mxu2  ;;  %v3058_v49 = vpop.f32.mrf.mxu3 }
 0xa8a   :  { %5203 = vpow2.f32 %v4511_v6  ;;  %v3059_v1 = vadd.f32 %v3058_v49, %v3009_v30  ;;  %v3021_v9 = vpop.f32.mrf.mxu0  ;;  %v3034_v59 = vpop.f32.mrf.mxu1  ;;  %v3046_v26 = vadd.f32 %v3045_v43, %v3008_v24  ;;  %v4944_v24 = vld [vmem:[%s7194_s8 + $0x120] sm:$0xff] }
 0xa8c   :  { %v3065_v56 = vadd.f32 %v3059_v1, %v7286_v5  ;;  %v3064_v48 = vadd.f32 %v3046_v26, %v7287_v17  ;;  %v3261_v26 = vld [vmem:[#allocation3] sm:$0xf] }
 0xa8e   :  { %v4512_v36 = vmul.f32 -1.442695, %v3065_v56 }
 0xa8f   :  { %v5202_v14 = vpop.eup %5201 }
 0xa90   :  { %v5204_v50 = vpop.eup %5203  ;;  %v3069_v23 = vadd.f32 1.0, %v5202_v14  ;;  %5205 = vpow2.f32 %v4512_v36  ;;  %v4946_v14 = vld [vmem:[%s7194_s8 + $0x130] sm:$0xff] }
 0xa91   :  { %v3088_v58 = vadd.f32 1.0, %v5204_v50  ;;  %v3047_v52 = vpop.f32.mrf.mxu2  ;;  %v3060_v27 = vpop.f32.mrf.mxu3  ;;  %v4954_v50 = vld [vmem:[%s7194_s8 + $0x170] sm:$0xff] }
 0xa92   :  { %5207 = vrcp.f32 %v3069_v23  ;;  %v3081_v25 = vand.u32 2147483648, %v3069_v23  ;;  %v3079_v35 = vand.u32 2147483647, %v3069_v23  ;;  %vm3075_vm10 = vweird.f32 %v3069_v23  ;;  %v4953_v52 = vld [vmem:[%s7194_s8 + $0x168] sm:$0xff] }
 0xa93   :  { %5209 = vrcp.f32 %v3088_v58  ;;  %v3100_v60 = vand.u32 2147483648, %v3088_v58  ;;  %v3098_v11 = vand.u32 2147483647, %v3088_v58  ;;  %vm3094_vm11 = vweird.f32 %v3088_v58  ;;  %v4961_v27 = vld [vmem:[%s7194_s8 + $0x1a8] sm:$0xff] }
 0xa94   :  { %v3082_v21 = vor.u32 1.1754944e-38, %v3081_v25  ;;  %vm3080_vm14 = vcmp.eq.f32.partialorder %v3079_v35, 8.507059e+37  ;;  %v4948_v25 = vld [vmem:[%s7194_s8 + $0x140] sm:$0xff]  ;;  %v3266_v35 = vld [vmem:[#allocation3 + $0x14] sm:$0xf] }
 0xa95   :  { %v3101_v12 = vor.u32 1.1754944e-38, %v3100_v60  ;;  %vm3099_vm15 = vcmp.eq.f32.partialorder %v3098_v11, 8.507059e+37  ;;  %v4956_v60 = vld [vmem:[%s7194_s8 + $0x180] sm:$0xff]  ;;  %v4971_v11 = vld [vmem:[%s7194_s8 + $0x1f8] sm:$0xff] }
 0xa96   :  { %v5206_v38 = vpop.eup %5205 }
 0xa97   :  { %v3108_v28 = vadd.f32 1.0, %v5206_v38  ;;  %v3262_v38 = vld [vmem:[#allocation3 + $0x4] sm:$0xf] }
 0xa98   :  { %v5208_v62 = vpop.eup %5207 }
 0xa99   :  { %v5210_v41 = vpop.eup %5209  ;;  %v3071_v47 = vmul.f32 %v5208_v62, %v3069_v23  ;;  %5211 = vrcp.f32 %v3108_v28  ;;  %vm3076_vm8 = vweird.f32 %v5208_v62  ;;  %v3120_v49 = vand.u32 2147483648, %v3108_v28  ;;  %v4962_v23 = vld [vmem:[%s7194_s8 + $0x1b0] sm:$0xff] }
 0xa9a   :  { %v3090_v8 = vmul.f32 %v5210_v41, %v3088_v58  ;;  %5213 = vtanh.f32 %v3064_v48  ;;  %vm3095_vm9 = vweird.f32 %v5210_v41  ;;  %vm3077_vm12 = vmor %vm3075_vm10, %vm3076_vm8  ;;  %vm3114_vm1 = vweird.f32 %v3108_v28  ;;  %v4945_v58 = vld [vmem:[%s7194_s8 + $0x128] sm:$0xff]  ;;  %v4942_v48 = vld [vmem:[%s7194_s8 + $0x110] sm:$0xff] }
 0xa9b   :  { %v3072_v54 = vsub.f32 1.0, %v3071_v47  ;;  %vm3096_vm13 = vmor %vm3094_vm11, %vm3095_vm9  ;;  %v3118_v2 = vand.u32 2147483647, %v3108_v28  ;;  %v3121_v1 = vor.u32 1.1754944e-38, %v3120_v49  ;;  %v4958_v47 = vld [vmem:[%s7194_s8 + $0x190] sm:$0xff]  ;;  %v4968_v49 = vld [vmem:[%s7194_s8 + $0x1e0] sm:$0xff] }
 0xa9c   :  { %v3091_v16 = vsub.f32 1.0, %v3090_v8  ;;  %v4941_v8 = vld [vmem:[%s7194_s8 + $0x108] sm:$0xff] }
 0xa9d   :  { %v3073_v33 = vmul.f32 %v5208_v62, %v3072_v54  ;;  %vm3119_vm3 = vcmp.eq.f32.partialorder %v3118_v2, 8.507059e+37  ;;  %v4957_v54 = vld [vmem:[%s7194_s8 + $0x188] sm:$0xff] }
 0xa9e   :  { %v3092_v3 = vmul.f32 %v5210_v41, %v3091_v16  ;;  %v4940_v16 = vld [vmem:[%s7194_s8 + $0x100] sm:$0xff] }
 0xa9f   :  { %v5212_v63 = vpop.eup %5211  ;;  %v3074_v7 = vadd.f32 %v5208_v62, %v3073_v33  ;;  %v3265_v33 = vld [vmem:[#allocation3 + $0x10] sm:$0xf] }
 0xaa0   :  { %v3093_v0 = vadd.f32 %v5210_v41, %v3092_v3  ;;  %v3110_v44 = vmul.f32 %v5212_v63, %v3108_v28  ;;  %v5214_v18 = vpop.eup %5213  ;;  %vm3115_vm0 = vweird.f32 %v5212_v63  ;;  %v3263_v28 = vld [vmem:[#allocation3 + $0x8] sm:$0xf] }
 0xaa1   :  { %v3078_v29 = vsel %vm3077_vm12, %v5208_v62, %v3074_v7  ;;  %vm3116_vm2 = vmor %vm3114_vm1, %vm3115_vm0  ;;  %v3264_v62 = vld [vmem:[#allocation3 + $0xc] sm:$0xf]  ;;  %v3136_v7 = vunpack.c.h.bf16 %v7302_v57 }
 0xaa2   :  { %v3083_v55 = vsel %vm3080_vm14, %v3082_v21, %v3078_v29  ;;  %v3097_v15 = vsel %vm3096_vm13, %v5210_v41, %v3093_v0  ;;  %v3111_v6 = vsub.f32 1.0, %v3110_v44  ;;  %v4950_v41 = vld [vmem:[%s7194_s8 + $0x150] sm:$0xff] }
 0xaa3   :  { %v3102_v32 = vsel %vm3099_vm15, %v3101_v12, %v3097_v15  ;;  %v3125_v10 = vmul.f32 %v5214_v18, %v3083_v55  ;;  %v4970_v21 = vld [vmem:[%s7194_s8 + $0x1f0] sm:$0xff]  ;;  %v4969_v15 = vld [vmem:[%s7194_s8 + $0x1e8] sm:$0xff] }
 0xaa4   :  { %v3124_v30 = vmul.f32 %v3102_v32, %v6954_v46  ;;  %v3112_v45 = vmul.f32 %v5212_v63, %v3111_v6  ;;  %v4947_v46 = vld [vmem:[%s7194_s8 + $0x138] sm:$0xff] }
 0xaa6   :  { %v7062_v4 = vadd.f32 %v3125_v10, %v3124_v30  ;;  %v3113_v43 = vadd.f32 %v5212_v63, %v3112_v45  ;;  %v7303_v10 = vld [vmem:[#allocation20_spill] sm:$0xff] }
 0xaa7   :  { %v3138_v30 = vunpack.c.h.bf16 %v7303_v10 }
 0xaa8   :  { %5215 = vtanh.f32 %v7062_v4  ;;  %v3117_v22 = vsel %vm3116_vm2, %v5212_v63, %v3113_v43  ;;  %v3135_v63 = vunpack.c.l.bf16 %v7302_v57 }
 0xaa9   :  { %v3122_v59 = vsel %vm3119_vm3, %v3121_v1, %v3117_v22  ;;  %v4967_v1 = vld [vmem:[%s7194_s8 + $0x1d8] sm:$0xff] }
 0xaae   :  { %v5216_v9 = vpop.eup %5215 }
 0xaaf   :  { %v3128_v56 = vmul.f32 %v5216_v9, %v3122_v59 }
 0xab1   :  { %v3129_v39 = vmax.f32 %v3128_v56, 0.0  ;;  %v3132_v31 = vpack.c.bf16 %v3128_v56, %v3128_v56 }
 0xab3   :  { %v3130_v36 = vpack.c.bf16 %v3129_v39, %v3129_v39  ;;  %3147 = vmatmul.bf16.vlgmr.msrb.gmra.mxu0 %v3132_v31  ;;  %3160 = vmatmul.bf16.vlgmr.msrb.gmra.mxu1 %v3132_v31 }
 0xab4   :  { %3173 = vmatmul.bf16.vlgmr.msrb.gmra.mxu2 %v3132_v31  ;;  %3186 = vmatmul.bf16.vlgmr.msrb.gmra.mxu3 %v3132_v31 }
 0xab5   :  { %3131 = vst [vmem:[#allocation3 + $0x18] sm:$0xf] %v3130_v36  ;;  %3834 = vmatpush.bf16.msrb.mxu0 %v4947_v46  ;;  %3847 = vmatpush.bf16.msrb.mxu1 %v4955_v34 }
 0xab6   :  { %3860 = vmatpush.bf16.msrb.mxu2 %v4963_v40  ;;  %3873 = vmatpush.bf16.msrb.mxu3 %v4971_v11  ;;  %v4966_v40 = vld [vmem:[%s7194_s8 + $0x1d0] sm:$0xff] }
 0xab9   :  { %3835 = vmatpush.bf16.msrb.mxu0 %v4946_v14  ;;  %3848 = vmatpush.bf16.msrb.mxu1 %v4954_v50 }
 0xaba   :  { %3861 = vmatpush.bf16.msrb.mxu2 %v4962_v23  ;;  %3874 = vmatpush.bf16.msrb.mxu3 %v4970_v21 }
 0xabc   :  { %v3267_v3 = vld [vmem:[#allocation3 + $0x18] sm:$0xf] }
 0xabd   :  { %3836 = vmatpush.bf16.msrb.mxu0 %v4945_v58  ;;  %3849 = vmatpush.bf16.msrb.mxu1 %v4953_v52  ;;  %v4965_v58 = vld [vmem:[%s7194_s8 + $0x1c8] sm:$0xff] }
 0xabe   :  { %3862 = vmatpush.bf16.msrb.mxu2 %v4961_v27  ;;  %3875 = vmatpush.bf16.msrb.mxu3 %v4969_v15 }
 0xac1   :  { %3837 = vmatpush.bf16.msrb.mxu0 %v4944_v24  ;;  %3850 = vmatpush.bf16.msrb.mxu1 %v4952_v53  ;;  %v4964_v24 = vld [vmem:[%s7194_s8 + $0x1c0] sm:$0xff] }
 0xac2   :  { %3863 = vmatpush.bf16.msrb.mxu2 %v4960_v61  ;;  %3876 = vmatpush.bf16.msrb.mxu3 %v4968_v49 }
 0xac3   :  { %3790 = vmatmul.bf16.vlgmr.msra.gmra.mxu0 %v3261_v26  ;;  %3803 = vmatmul.bf16.vlgmr.msra.gmra.mxu1 %v3262_v38 }
 0xac4   :  { %3816 = vmatmul.bf16.vlgmr.msra.gmra.mxu2 %v3263_v28  ;;  %3829 = vmatmul.bf16.vlgmr.msra.gmra.mxu3 %v3264_v62 }
 0xac5   :  { %3838 = vmatpush.bf16.msrb.mxu0 %v4943_v19  ;;  %3851 = vmatpush.bf16.msrb.mxu1 %v4951_v13 }
 0xac6   :  { %3864 = vmatpush.bf16.msrb.mxu2 %v4959_v20  ;;  %3877 = vmatpush.bf16.msrb.mxu3 %v4967_v1 }
 0xac9   :  { %3839 = vmatpush.bf16.msrb.mxu0 %v4942_v48  ;;  %3852 = vmatpush.bf16.msrb.mxu1 %v4950_v41 }
 0xaca   :  { %3865 = vmatpush.bf16.msrb.mxu2 %v4958_v47  ;;  %3878 = vmatpush.bf16.msrb.mxu3 %v4966_v40 }
 0xacd   :  { %3840 = vmatpush.bf16.msrb.mxu0 %v4941_v8  ;;  %3853 = vmatpush.bf16.msrb.mxu1 %v4949_v51 }
 0xace   :  { %3866 = vmatpush.bf16.msrb.mxu2 %v4957_v54  ;;  %3879 = vmatpush.bf16.msrb.mxu3 %v4965_v58 }
 0xad1   :  { %3841 = vmatpush.bf16.msrb.mxu0 %v4940_v16  ;;  %3854 = vmatpush.bf16.msrb.mxu1 %v4948_v25 }
 0xad2   :  { %3867 = vmatpush.bf16.msrb.mxu2 %v4956_v60  ;;  %3880 = vmatpush.bf16.msrb.mxu3 %v4964_v24 }
 0xad4   :  { %3842 = vmatmul.bf16.vlgmr.msrb.gmra.mxu0 %v3265_v33  ;;  %3855 = vmatmul.bf16.vlgmr.msrb.gmra.mxu1 %v3266_v35 }
 0xad5   :  { %3868 = vmatmul.bf16.vlgmr.msrb.gmra.mxu2 %v3267_v3 }
 0xb30   :  { %v3148_v0 = vpop.f32.mrf.mxu0  ;;  %v3161_v44 = vpop.f32.mrf.mxu1 }
 0xb31   :  { %v3149_v12 = vadd.f32 %v3148_v0, %v3135_v63  ;;  %v3162_v29 = vadd.f32 %v3161_v44, %v3136_v7 }
 0xb33   :  { %v3191_v18 = vadd.f32 %v3149_v12, %v6718_v42  ;;  %v3192_v55 = vadd.f32 %v3162_v29, %v6720_v37 }
 0xb35   :  { %v4513_v6 = vmul.f32 -1.442695, %v3191_v18  ;;  %v4514_v32 = vmul.f32 -1.442695, %v3192_v55 }
 0xb37   :  { %5217 = vpow2.f32 %v4513_v6  ;;  %v3174_v45 = vpop.f32.mrf.mxu2  ;;  %v3187_v43 = vpop.f32.mrf.mxu3 }
 0xb38   :  { %5219 = vpow2.f32 %v4514_v32  ;;  %v3188_v42 = vadd.f32 %v3187_v43, %v3138_v30  ;;  %v3150_v2 = vpop.f32.mrf.mxu0  ;;  %v3163_v37 = vpop.f32.mrf.mxu1 }
 0xb3a   :  { %v3194_v22 = vadd.f32 %v3188_v42, %v7286_v5  ;;  %v3137_v5 = vunpack.c.l.bf16 %v7303_v10 }
 0xb3c   :  { %v4515_v9 = vmul.f32 -1.442695, %v3194_v22  ;;  %v3175_v50 = vadd.f32 %v3174_v45, %v3137_v5 }
 0xb3d   :  { %v5218_v59 = vpop.eup %5217 }
 0xb3e   :  { %v5220_v56 = vpop.eup %5219  ;;  %v3198_v39 = vadd.f32 1.0, %v5218_v59  ;;  %5221 = vpow2.f32 %v4515_v9  ;;  %v3193_v61 = vadd.f32 %v3175_v50, %v7287_v17  ;;  %v3269_v50 = vld [vmem:[%s7187_s1] sm:$0xff] }
 0xb3f   :  { %v3217_v31 = vadd.f32 1.0, %v5220_v56  ;;  %v3176_v46 = vpop.f32.mrf.mxu2  ;;  %v3189_v34 = vpop.f32.mrf.mxu3 }
 0xb40   :  { %5223 = vrcp.f32 %v3198_v39  ;;  %v3791_v36 = vpop.f32.mrf.mxu0  ;;  %v3804_v14 = vpop.f32.mrf.mxu1  ;;  %v3208_v8 = vand.u32 2147483647, %v3198_v39  ;;  %v3210_v51 = vand.u32 2147483648, %v3198_v39  ;;  %vm3204_vm6 = vweird.f32 %v3198_v39 }
 0xb41   :  { %5225 = vrcp.f32 %v3217_v31  ;;  %v3805_v23 = vadd.f32 %v3804_v14, %v3791_v36  ;;  %v3229_v54 = vand.u32 2147483648, %v3217_v31  ;;  %v3227_v60 = vand.u32 2147483647, %v3217_v31 }
 0xb42   :  { %vm3223_vm7 = vweird.f32 %v3217_v31  ;;  %v3211_v3 = vor.u32 1.1754944e-38, %v3210_v51  ;;  %vm3209_vm10 = vcmp.eq.f32.partialorder %v3208_v8, 8.507059e+37  ;;  %v3892_v14 = vlaneseq }
 0xb43   :  { %v3230_v63 = vor.u32 1.1754944e-38, %v3229_v54  ;;  %vm3228_vm11 = vcmp.eq.f32.partialorder %v3227_v60, 8.507059e+37 }
 0xb44   :  { %v5222_v52 = vpop.eup %5221  ;;  %v3893_v58 = vand.u32 127, %v3892_v14 }
 0xb45   :  { %v7165_v27 = vadd.f32 1.0, %v5222_v52 }
 0xb46   :  { %v5224_v53 = vpop.eup %5223  ;;  %vm3894_vm0 = vcmp.lt.s32.totalorder %v3893_v58, 5 }
 0xb47   :  { %v5226_v19 = vpop.eup %5225  ;;  %v3200_v13 = vmul.f32 %v5224_v53, %v3198_v39  ;;  %5227 = vrcp.f32 %v7165_v27  ;;  %v3817_v26 = vpop.f32.mrf.mxu2  ;;  %vm3205_vm4 = vweird.f32 %v5224_v53  ;;  %v3249_v2 = vand.u32 2147483648, %v7165_v27 }
 0xb48   :  { %v3830_v38 = vpop.f32.mrf.mxu3  ;;  %v3219_v20 = vmul.f32 %v5226_v19, %v3217_v31  ;;  %v3793_v28 = vpop.f32.mrf.mxu0  ;;  %v3818_v41 = vadd.f32 %v3817_v26, %v3805_v23  ;;  %5229 = vtanh.f32 %v3193_v61  ;;  %vm3224_vm5 = vweird.f32 %v5226_v19  ;;  %vm3206_vm8 = vmor %vm3204_vm6, %vm3205_vm4 }
 0xb49   :  { %v3806_v62 = vpop.f32.mrf.mxu1  ;;  %v3201_v48 = vsub.f32 1.0, %v3200_v13  ;;  %vm3225_vm9 = vmor %vm3223_vm7, %vm3224_vm5  ;;  %vm3243_vm13 = vweird.f32 %v7165_v27  ;;  %v3247_v37 = vand.u32 2147483647, %v7165_v27 }
 0xb4a   :  { %v3220_v47 = vsub.f32 1.0, %v3219_v20  ;;  %v3831_v17 = vadd.f32 %v3830_v38, %v3818_v41 }
 0xb4b   :  { %v3202_v16 = vmul.f32 %v5224_v53, %v3201_v48  ;;  %vm3248_vm15 = vcmp.eq.f32.partialorder %v3247_v37, 8.507059e+37 }
 0xb4c   :  { %v3221_v25 = vmul.f32 %v5226_v19, %v3220_v47 }
 0xb4d   :  { %v5228_v33 = vpop.eup %5227  ;;  %v3203_v35 = vadd.f32 %v5224_v53, %v3202_v16 }
 0xb4e   :  { %v3222_v11 = vadd.f32 %v5226_v19, %v3221_v25  ;;  %v3239_v57 = vmul.f32 %v5228_v33, %v7165_v27  ;;  %v5230_v44 = vpop.eup %5229  ;;  %vm3244_vm12 = vweird.f32 %v5228_v33  ;;  %v4976_v27 = vld [vmem:[%s7195_s9] ss:$0 sm:$0xff] }
 0xb4f   :  { %v3207_v7 = vsel %vm3206_vm8, %v5224_v53, %v3203_v35  ;;  %v3819_v21 = vpop.f32.mrf.mxu2  ;;  %vm3245_vm14 = vmor %vm3243_vm13, %vm3244_vm12 }
 0xb50   :  { %v3832_v0 = vpop.f32.mrf.mxu3  ;;  %v3212_v12 = vsel %vm3209_vm10, %v3211_v3, %v3207_v7  ;;  %v3226_v29 = vsel %vm3225_vm9, %v5226_v19, %v3222_v11  ;;  %v3240_v18 = vsub.f32 1.0, %v3239_v57 }
 0xb51   :  { %v3231_v55 = vsel %vm3228_vm11, %v3230_v63, %v3226_v29  ;;  %v3254_v15 = vmul.f32 %v5230_v44, %v3212_v12  ;;  %v3843_v6 = vpop.f32.mrf.mxu0  ;;  %v3856_v32 = vpop.f32.mrf.mxu1 }
 0xb52   :  { %v3253_v10 = vmul.f32 %v3231_v55, %v7062_v4  ;;  %v3241_v30 = vmul.f32 %v5228_v33, %v3240_v18  ;;  %v3844_v45 = vadd.f32 %v3843_v6, %v3831_v17  ;;  %v3250_v4 = vor.u32 1.1754944e-38, %v3249_v2 }
 0xb54   :  { %v3255_v43 = vadd.f32 %v3254_v15, %v3253_v10  ;;  %v3857_v49 = vadd.f32 %v3856_v32, %v3844_v45  ;;  %v3242_v42 = vadd.f32 %v5228_v33, %v3241_v30 }
 0xb56   :  { %5231 = vtanh.f32 %v3255_v43  ;;  %v3246_v1 = vsel %vm3245_vm14, %v5228_v33, %v3242_v42 }
 0xb57   :  { %v3251_v31 = vsel %vm3248_vm15, %v3250_v4, %v3246_v1 }
 0xb58   :  { %v3869_v22 = vpop.f32.mrf.mxu2 }
 0xb59   :  { %v3870_v9 = vadd.f32 %v3869_v22, %v3857_v49  ;;  %v3845_v59 = vpop.f32.mrf.mxu0  ;;  %v3858_v56 = vpop.f32.mrf.mxu1 }
 0xb5c   :  { %v5232_v39 = vpop.eup %5231 }
 0xb5d   :  { %v3257_v46 = vmul.f32 %v5232_v39, %v3251_v31 }
 0xb5f   :  { %v3258_v34 = vmax.f32 %v3257_v46, 0.0 }
 0xb60   :  { %v3871_v40 = vpop.f32.mrf.mxu2 }
 0xb61   :  { %v3259_v5 = vpack.c.bf16 %v3258_v34, %v3258_v34 }
 0xb63   :  { %3260 = vst [vmem:[#allocation3 + $0x1c] sm:$0xf] %v3259_v5 }
 0xb6a   :  { %v3268_v36 = vld [vmem:[#allocation3 + $0x1c] sm:$0xf] }
 0xb6b   :  { %3881 = vmatmul.bf16.vlgmr.msrb.gmra.mxu3 %v3268_v36 }
 0xbee   :  { %v3882_v23 = vpop.f32.mrf.mxu3 }
 0xbef   :  { %v3883_v52 = vadd.f32 %v3882_v23, %v3870_v9 }
 0xbf1   :  { %v3886_v24 = vadd.f32 %v3883_v52, %v3269_v50 }
 0xbf3   :  { %v3891_v53 = vadd.f32 %v4976_v27, %v3886_v24 }
 0xbf5   :  { %v3895_v61 = vsel %vm3894_vm0, %v3891_v53, -1e+30 }
 0xbf6   :  { %v3884_v19 = vpop.f32.mrf.mxu3  ;;  %3896 = vmax.xlane.f32.xlu0 %v3895_v61 }
 0xc69   :  { %v3897_v13 = vpop.xlane.xlu0 %3896 }
 0xc6a   :  { %v3898_v26 = vsub.f32 %v3895_v61, %v3897_v13 }
 0xc6c   :  { %v3899_v38 = vmul.f32 1.442695, %v3898_v26 }
 0xc6e   :  { %5233 = vpow2.f32 %v3899_v38 }
 0xc74   :  { %v5234_v20 = vpop.eup %5233 }
 0xc75   :  { %3901 = vadd.xlane.f32.xlu0 %v5234_v20 }
 0xce8   :  { %v3902_v28 = vpop.xlane.xlu0 %3901 }
 0xce9   :  { %5235 = vrcp.f32 %v3902_v28  ;;  %v3914_v47 = vand.u32 2147483648, %v3902_v28  ;;  %v3912_v51 = vand.u32 2147483647, %v3902_v28  ;;  %vm3908_vm2 = vweird.f32 %v3902_v28 }
 0xceb   :  { %v3915_v16 = vor.u32 1.1754944e-38, %v3914_v47  ;;  %vm3913_vm4 = vcmp.eq.f32.partialorder %v3912_v51, 8.507059e+37 }
 0xcef   :  { %v5236_v62 = vpop.eup %5235 }
 0xcf0   :  { %v3904_v48 = vmul.f32 %v5236_v62, %v3902_v28  ;;  %vm3909_vm1 = vweird.f32 %v5236_v62 }
 0xcf1   :  { %vm3910_vm3 = vmor %vm3908_vm2, %vm3909_vm1 }
 0xcf2   :  { %v3905_v41 = vsub.f32 1.0, %v3904_v48 }
 0xcf4   :  { %v3906_v8 = vmul.f32 %v5236_v62, %v3905_v41 }
 0xcf6   :  { %v3907_v54 = vadd.f32 %v5236_v62, %v3906_v8 }
 0xcf8   :  { %v3911_v17 = vsel %vm3910_vm3, %v5236_v62, %v3907_v54 }
 0xcf9   :  { %v3916_v25 = vsel %vm3913_vm4, %v3915_v16, %v3911_v17 }
 0xcfa   :  { %v3917_v60 = vmul.f32 %v5234_v20, %v3916_v25 }
 0xcfc   :  { %3918 = vst [vmem:[%s7196_s10] sm:$0xff] %v3917_v60 }
 0xcfd   :  { %3923 = vsyncpa [#allocation5], 1 }

</bundles_post_ra>
